<compile_context>
chip_gen: v5e
topology: v5e:2x2
jax: 0.10.0
libtpu: 0.0.40
codegen_flags: <defaults>
</compile_context>

<pallas_src>
import jax
import jax.numpy as jnp
from jax import lax
from jax.experimental import pallas as pl
from jax.experimental.pallas import tpu as pltpu


# ----------------------------------------------------------------------------
# Model configuration (scaled-down but structurally faithful PointNet2-MSG).
# ----------------------------------------------------------------------------
NUM_CLASS = 40  # DATASET_NUM_CLASS['modelnet40']

SA1_CFG = dict(npoint=16, radii=(0.2, 0.4), nsamples=(8, 16),
               mlps=((16, 16, 32), (16, 16, 32)), in_ch=3)
SA2_CFG = dict(npoint=8, radii=(0.4, 0.8), nsamples=(8, 16),
               mlps=((32, 32, 64), (32, 32, 64)), in_ch=64 + 3)
SA3_CFG = dict(mlp=(64, 128, 256), in_ch=128 + 3)          # group_all
FC_CFG = ((256, 128, True), (128, 64, True), (64, NUM_CLASS, False))

_CH_PAD = 16   # pad first-layer input channels to a multiple of this (only)


def _round_up(x, m):
    return (x + m - 1) // m * m


# ----------------------------------------------------------------------------
# VMEM / tiling helpers (generation aware).
# ----------------------------------------------------------------------------
def _physical_vmem_bytes():
    cap = 64 * 1024 * 1024            # conservative fallback (v7x per-core VMEM)
    try:
        cap = int(pltpu.get_tpu_info().vmem_capacity_bytes)
    except Exception:
        pass
    return cap


def _vmem_limit_bytes():
    # 128 MiB on v5e/v6e -> ~96 MiB scoped limit; 64 MiB on v7x -> 48 MiB.
    return min(int(_physical_vmem_bytes() * 0.75), 100 * 1024 * 1024)


def _sa_step_bytes(tg, samples, cpads, couts_all, ctot):
    """Rough per-grid-step VMEM bytes: double-buffered IO + f32 intermediates
    + resident weights."""
    total = 2 * tg * ctot * 2                       # bf16 output, double buffered
    for S, cpad, couts in zip(samples, cpads, couts_all):
        rows = tg * S
        total += 2 * rows * cpad * 2                # bf16 input, double buffered
        total += 2 * rows * max(couts) * 4          # f32 matmul intermediates
        cin = cpad
        for c in couts:                             # resident weights + shifts
            total += 2 * (cin * c * 2 + c * 4)
            cin = c
    return total


def _pick_g_tile(G, samples, cpads, couts_all, ctot):
    """Group-tile size: multiple of 8, VMEM-bytes aware, and >= 2 grid steps
    whenever possible so both v7x TensorCores get work."""
    if G <= 8:
        return G                                    # single full block
    budget = int(_vmem_limit_bytes() * 0.8)
    tg = max(8, (G // 2 // 8) * 8)                  # start near G/2 (>= 2 steps)
    while tg > 8 and _sa_step_bytes(tg, samples, cpads, couts_all, ctot) > budget:
        tg -= 8
    return tg


def _maybe_buffered(shape, index_map, grid_steps):
    """3-deep input pipeline when the grid is long enough (DMA-limited case)."""
    if grid_steps >= 3 and hasattr(pl, "Buffered"):
        try:
            return pl.BlockSpec(shape, index_map, pipeline_mode=pl.Buffered(3))
        except TypeError:
            pass
    return pl.BlockSpec(shape, index_map)


# ----------------------------------------------------------------------------
# Pallas kernels
# ----------------------------------------------------------------------------
def _make_sa_kernel(samples, n_layers, tg):
    """Fused shared-MLP (conv1x1/BN/ReLU x3) + neighbor max for all MSG scales."""
    n_scales = len(samples)

    def kernel(*args):
        o_ref = args[-1]                               # (tg, ctot) bf16
        xs = args[:n_scales]                           # (tg*S_i, Cpad_i) bf16
        prm = args[n_scales:-1]                        # per scale: w1,s1,w2,s2,w3,s3
        outs = []
        for si in range(n_scales):
            S = samples[si]
            h = xs[si][...]
            base = si * 2 * n_layers
            for li in range(n_layers):
                w = prm[base + 2 * li][...]            # bf16 (Cin, Cout), BN folded
                shift = prm[base + 2 * li + 1][...]    # f32  (1, Cout)
                y = jnp.maximum(
                    jnp.dot(h, w, preferred_element_type=jnp.float32) + shift, 0.0)
                h = y.astype(jnp.bfloat16) if li + 1 < n_layers else y
            C = h.shape[-1]
            outs.append(jnp.max(h.reshape(tg, S, C), axis=1))   # (tg, C) f32
        # Single lane-dense full-width store (no masked column-slice stores).
        o_ref[...] = jnp.concatenate(outs, axis=-1).astype(o_ref.dtype)

    return kernel


def sa_mlp_max(grouped_list, params_list):
    """grouped_list[i]: (G, S_i, Cpad_i) bf16;  params_list[i]: [(w, shift)] * 3.

    Returns (G, sum_i Cout_i) bf16 = max over neighbors of the shared MLP,
    concatenated over MSG radius scales — all in one pallas_call.
    """
    G = grouped_list[0].shape[0]
    samples = tuple(g.shape[1] for g in grouped_list)
    cpads = tuple(g.shape[2] for g in grouped_list)
    n_layers = len(params_list[0])
    couts_all = tuple(tuple(w.shape[1] for (w, _) in layers) for layers in params_list)
    ctot = sum(c[-1] for c in couts_all)

    tg = _pick_g_tile(G, samples, cpads, couts_all, ctot)
    g_pad = _round_up(G, tg)                 # pad G to a tile multiple (no giant
    grid_g = g_pad // tg                     # full-G fallback block)

    xs, in_specs, flat_params = [], [], []
    for g, S in zip(grouped_list, samples):
        if g_pad > G:
            g = jnp.pad(g, ((0, g_pad - G), (0, 0), (0, 0)))
        x = g.reshape(g_pad * S, g.shape[2])                  # group-major rows
        xs.append(x)
        in_specs.append(_maybe_buffered((tg * S, x.shape[1]),
                                        lambda i: (i, 0), grid_g))
    for layers in params_list:
        for w, shift in layers:
            flat_params += [w, shift]
            in_specs.append(pl.BlockSpec(w.shape, lambda i: (0, 0)))      # resident
            in_specs.append(pl.BlockSpec(shift.shape, lambda i: (0, 0)))  # resident

    out = pl.pallas_call(
        _make_sa_kernel(samples, n_layers, tg),
        out_shape=jax.ShapeDtypeStruct((g_pad, ctot), jnp.bfloat16),
        grid=(grid_g,),
        in_specs=in_specs,
        out_specs=pl.BlockSpec((tg, ctot), lambda i: (i, 0)),
        compiler_params=pltpu.CompilerParams(
            dimension_semantics=("parallel",),       # G tiles are independent
            vmem_limit_bytes=_vmem_limit_bytes()),
    )(*xs, *flat_params)
    return out[:G] if g_pad > G else out


def _make_tail_kernel(B, N, n_mlp, n_fc):
    """Fused SA3 group-all shared MLP + global max + 3-layer FC head."""

    def kernel(*args):
        x_ref, o_ref = args[0], args[-1]
        prm = args[1:-1]
        h = x_ref[...]                                 # (B*N, Cpad) bf16
        for li in range(n_mlp):
            w = prm[2 * li][...]
            shift = prm[2 * li + 1][...]
            y = jnp.maximum(
                jnp.dot(h, w, preferred_element_type=jnp.float32) + shift, 0.0)
            h = y.astype(jnp.bfloat16) if li + 1 < n_mlp else y
        C = h.shape[-1]
        h = jnp.max(h.reshape(B, N, C), axis=1)        # (B, 256) f32 global max
        h = h.astype(jnp.bfloat16)
        off = 2 * n_mlp
        for li in range(n_fc):
            w = prm[off + 2 * li][...]
            shift = prm[off + 2 * li + 1][...]
            y = jnp.dot(h, w, preferred_element_type=jnp.float32) + shift
            if li + 1 < n_fc:                          # dropout = identity (eval)
                h = jnp.maximum(y, 0.0).astype(jnp.bfloat16)
            else:
                h = y
        o_ref[...] = h                                 # (B, NUM_CLASS) f32 logits

    return kernel


def sa3_fc_head(grouped, mlp_params, fc_params):
    """grouped: (B, N, Cpad) bf16.  Returns logits (B, NUM_CLASS) f32."""
    B, N, cpad = grouped.shape
    x = grouped.reshape(B * N, cpad)
    flat = []
    for w, s in list(mlp_params) + list(fc_params):
        flat += [w, s]
    nclass = fc_params[-1][0].shape[1]
    args = (x, *flat)
    return pl.pallas_call(
        _make_tail_kernel(B, N, len(mlp_params), len(fc_params)),
        out_shape=jax.ShapeDtypeStruct((B, nclass), jnp.float32),
        grid=(1,),   # batch is tiny for the cls head; one resident block
        in_specs=[pl.BlockSpec(a.shape, lambda i: (0, 0)) for a in args],
        out_specs=pl.BlockSpec((B, nclass), lambda i: (0, 0)),
        compiler_params=pltpu.CompilerParams(
            dimension_semantics=("arbitrary",),
            vmem_limit_bytes=_vmem_limit_bytes()),
    )(*args)


# ----------------------------------------------------------------------------
# Plain-JAX glue: sampling / grouping (data-dependent index selection).
# ----------------------------------------------------------------------------
def square_distance(src, dst):
    # src (B, M, 3), dst (B, N, 3) -> (B, M, N)
    return jnp.sum((src[:, :, None, :] - dst[:, None, :, :]) ** 2, axis=-1)


def index_points(points, idx):
    # points (B, N, C), idx (B, ...) -> (B, ..., C)
    B = points.shape[0]
    batch = jnp.arange(B).reshape((B,) + (1,) * (idx.ndim - 1))
    return points[batch, idx]


def farthest_point_sample(xyz, npoint):
    # deterministic start at index 0 (PyTorch uses a random start index)
    B, N, _ = xyz.shape

    def body(i, state):
        centroids, distance, farthest = state
        centroids = centroids.at[:, i].set(farthest)
        centroid = xyz[jnp.arange(B), farthest]                 # (B, 3)
        dist = jnp.sum((xyz - centroid[:, None, :]) ** 2, -1)   # (B, N)
        distance = jnp.minimum(distance, dist)
        farthest = jnp.argmax(distance, axis=-1).astype(jnp.int32)
        return centroids, distance, farthest

    init = (jnp.zeros((B, npoint), jnp.int32),
            jnp.full((B, N), 1e10, jnp.float32),
            jnp.zeros((B,), jnp.int32))
    centroids, _, _ = lax.fori_loop(0, npoint, body, init)
    return centroids


def query_ball_point(radius, nsample, xyz, new_xyz):
    B, N, _ = xyz.shape
    S = new_xyz.shape[1]
    sqrdists = square_distance(new_xyz, xyz)                    # (B, S, N)
    group_idx = jnp.broadcast_to(jnp.arange(N, dtype=jnp.int32), (B, S, N))
    group_idx = jnp.where(sqrdists > radius ** 2, N, group_idx)
    group_idx = jnp.sort(group_idx, axis=-1)[:, :, :nsample]
    group_first = jnp.broadcast_to(group_idx[:, :, :1], group_idx.shape)
    group_idx = jnp.where(group_idx == N, group_first, group_idx)
    return group_idx


def _pad_channels(x, cpad):
    c = x.shape[-1]
    if cpad > c:
        x = jnp.pad(x, [(0, 0)] * (x.ndim - 1) + [(0, cpad - c)])
    return x


# ----------------------------------------------------------------------------
# Deterministic parameter init (fresh PyTorch module, eval mode: BN uses
# default running stats mean=0/var=1/gamma=1/beta=0; dropout is identity).
# BN scale is folded into the weight columns; only the shift stays separate.
# ----------------------------------------------------------------------------
def _init_layer(key, cin, cout, with_bn, cin_pad=None):
    kw, kb = jax.random.split(key)
    w = jax.random.normal(kw, (cin, cout), jnp.float32) * 0.1
    b = jax.random.normal(kb, (cout,), jnp.float32) * 0.01
    if with_bn:
        gamma = jnp.ones((cout,), jnp.float32)
        beta = jnp.zeros((cout,), jnp.float32)
        mean = jnp.zeros((cout,), jnp.float32)
        var = jnp.ones((cout,), jnp.float32)
        scale = gamma * lax.rsqrt(var + 1e-5)
        shift = beta - mean * scale + b * scale
        w = w * scale[None, :]                 # fold BN scale into weights
    else:
        shift = b
    if cin_pad is not None and cin_pad > cin:  # zero rows for padded channels
        w = jnp.concatenate(
            [w, jnp.zeros((cin_pad - cin, cout), jnp.float32)], axis=0)
    return w.astype(jnp.bfloat16), shift.reshape(1, cout).astype(jnp.float32)


def _init_mlp(key, cin, channels):
    layers = []
    cin_pad = _round_up(cin, _CH_PAD)
    for cout in channels:
        key, sub = jax.random.split(key)
        layers.append(_init_layer(sub, cin, cout, with_bn=True, cin_pad=cin_pad))
        cin = cout
        cin_pad = cout   # hidden widths (16/32/64/128) are already aligned
    return layers


def init_params(key):
    keys = jax.random.split(key, 8)
    return {
        'sa1': [_init_mlp(keys[0], SA1_CFG['in_ch'], SA1_CFG['mlps'][0]),
                _init_mlp(keys[1], SA1_CFG['in_ch'], SA1_CFG['mlps'][1])],
        'sa2': [_init_mlp(keys[2], SA2_CFG['in_ch'], SA2_CFG['mlps'][0]),
                _init_mlp(keys[3], SA2_CFG['in_ch'], SA2_CFG['mlps'][1])],
        'sa3': _init_mlp(keys[4], SA3_CFG['in_ch'], SA3_CFG['mlp']),
        'fc': [_init_layer(keys[5 + i], cin, cout, with_bn=bn)
               for i, (cin, cout, bn) in enumerate(FC_CFG)],
    }


# ----------------------------------------------------------------------------
# Forward pass
# ----------------------------------------------------------------------------
def _sa_msg(xyz, feats, cfg, scale_params):
    B = xyz.shape[0]
    npoint = cfg['npoint']
    fps_idx = farthest_point_sample(xyz, npoint)
    new_xyz = index_points(xyz, fps_idx)                    # (B, npoint, 3)
    G = B * npoint
    grouped_list = []
    # TODO(synk): at realistic N (1k-4k points) scalar-prefetch the ball-query
    # indices (PrefetchScalarGridSpec) and gather neighbor rows in-kernel from
    # HBM instead of materializing grouped tensors in HBM and re-reading them.
    for radius, nsample in zip(cfg['radii'], cfg['nsamples']):
        idx = query_ball_point(radius, nsample, xyz, new_xyz)
        grouped_xyz = (index_points(xyz, idx) - new_xyz[:, :, None, :]
                       ).astype(jnp.bfloat16)
        if feats is not None:
            grouped = jnp.concatenate(
                [index_points(feats, idx), grouped_xyz], axis=-1)
        else:
            grouped = grouped_xyz
        cpad = _round_up(grouped.shape[-1], _CH_PAD)
        grouped = _pad_channels(grouped, cpad).astype(jnp.bfloat16)
        grouped_list.append(grouped.reshape(G, nsample, cpad))
    out = sa_mlp_max(grouped_list, scale_params)            # (G, C0+C1) bf16
    return new_xyz, out.reshape(B, npoint, -1)


def pointnet2_msg(params, pc):
    xyz1, feats1 = _sa_msg(pc, None, SA1_CFG, params['sa1'])
    xyz2, feats2 = _sa_msg(xyz1, feats1, SA2_CFG, params['sa2'])
    # SA3 (group_all) + FC head fused in one pallas_call: the (B, 256) global
    # feature stays in VMEM; dropout layers are identity in eval mode.
    grouped = jnp.concatenate([xyz2.astype(jnp.bfloat16), feats2], axis=-1)
    cpad = _round_up(grouped.shape[-1], _CH_PAD)
    grouped = _pad_channels(grouped, cpad).astype(jnp.bfloat16)
    return sa3_fc_head(grouped, params['sa3'], params['fc'])  # (B, NUM_CLASS)


def pointnet2_forward(params, pc, task='cls', normal=None, cls=None):
    """Mirrors PointNet2.forward: returns {'logit': logits}."""
    if task == 'cls':
        assert cls is None and normal is None
        return {'logit': pointnet2_msg(params, pc)}
    assert False


# ----------------------------------------------------------------------------
if __name__ == "__main__":
    key = jax.random.PRNGKey(0)
    kparams, kdata = jax.random.split(key)
    params = init_params(kparams)

    B, N = 2, 64
    pc = jax.random.uniform(kdata, (B, N, 3), jnp.float32,
                            minval=-1.0, maxval=1.0)

    fwd = jax.jit(pointnet2_forward)
    out = fwd(params, pc)
    logit = jax.block_until_ready(out['logit'])
    assert logit.shape == (B, NUM_CLASS), logit.shape
    assert bool(jnp.all(jnp.isfinite(logit)))
    print("KERNEL_OK")
</pallas_src>

<mosaic_0001>
module attributes {stable_mosaic.version = 11 : i64} {
  func.func @kernel(%arg0: i32, %arg1: memref<128x16xbf16, #tpu.memory_space<vmem>>, %arg2: memref<256x16xbf16, #tpu.memory_space<vmem>>, %arg3: memref<16x16xbf16, #tpu.memory_space<vmem>>, %arg4: memref<1x16xf32, #tpu.memory_space<vmem>>, %arg5: memref<16x16xbf16, #tpu.memory_space<vmem>>, %arg6: memref<1x16xf32, #tpu.memory_space<vmem>>, %arg7: memref<16x32xbf16, #tpu.memory_space<vmem>>, %arg8: memref<1x32xf32, #tpu.memory_space<vmem>>, %arg9: memref<16x16xbf16, #tpu.memory_space<vmem>>, %arg10: memref<1x16xf32, #tpu.memory_space<vmem>>, %arg11: memref<16x16xbf16, #tpu.memory_space<vmem>>, %arg12: memref<1x16xf32, #tpu.memory_space<vmem>>, %arg13: memref<16x32xbf16, #tpu.memory_space<vmem>>, %arg14: memref<1x32xf32, #tpu.memory_space<vmem>>, %arg15: memref<16x64xbf16, #tpu.memory_space<vmem>>) attributes {dimension_semantics = [#tpu.dimension_semantics<parallel>], iteration_bounds = array<i64: 2>, scalar_prefetch = 0 : i64, scratch_operands = 0 : i64, tpu.core_type = #tpu.core_type<tc>, window_params = [{transform_indices = @transform_0, window_bounds = array<i64: 128, 16>}, {transform_indices = @transform_1, window_bounds = array<i64: 256, 16>}, {pipeline_mode = #tpu.pipeline_mode<synchronous>, transform_indices = @transform_2, window_bounds = array<i64: 16, 16>}, {pipeline_mode = #tpu.pipeline_mode<synchronous>, transform_indices = @transform_3, window_bounds = array<i64: 1, 16>}, {pipeline_mode = #tpu.pipeline_mode<synchronous>, transform_indices = @transform_4, window_bounds = array<i64: 16, 16>}, {pipeline_mode = #tpu.pipeline_mode<synchronous>, transform_indices = @transform_5, window_bounds = array<i64: 1, 16>}, {pipeline_mode = #tpu.pipeline_mode<synchronous>, transform_indices = @transform_6, window_bounds = array<i64: 16, 32>}, {pipeline_mode = #tpu.pipeline_mode<synchronous>, transform_indices = @transform_7, window_bounds = array<i64: 1, 32>}, {pipeline_mode = #tpu.pipeline_mode<synchronous>, transform_indices = @transform_8, window_bounds = array<i64: 16, 16>}, {pipeline_mode = #tpu.pipeline_mode<synchronous>, transform_indices = @transform_9, window_bounds = array<i64: 1, 16>}, {pipeline_mode = #tpu.pipeline_mode<synchronous>, transform_indices = @transform_10, window_bounds = array<i64: 16, 16>}, {pipeline_mode = #tpu.pipeline_mode<synchronous>, transform_indices = @transform_11, window_bounds = array<i64: 1, 16>}, {pipeline_mode = #tpu.pipeline_mode<synchronous>, transform_indices = @transform_12, window_bounds = array<i64: 16, 32>}, {pipeline_mode = #tpu.pipeline_mode<synchronous>, transform_indices = @transform_13, window_bounds = array<i64: 1, 32>}, {transform_indices = @transform_14, window_bounds = array<i64: 16, 64>}]} {
    %c0 = arith.constant 0 : index
    %c0_0 = arith.constant 0 : index
    %0 = vector.load %arg1[%c0, %c0_0] : memref<128x16xbf16, #tpu.memory_space<vmem>>, vector<128x16xbf16>
    %c0_1 = arith.constant 0 : index
    %c0_2 = arith.constant 0 : index
    %1 = vector.load %arg3[%c0_1, %c0_2] : memref<16x16xbf16, #tpu.memory_space<vmem>>, vector<16x16xbf16>
    %c0_3 = arith.constant 0 : index
    %c0_4 = arith.constant 0 : index
    %2 = vector.load %arg4[%c0_3, %c0_4] : memref<1x16xf32, #tpu.memory_space<vmem>>, vector<1x16xf32>
    %cst = arith.constant dense<0.000000e+00> : vector<128x16xf32>
    %3 = tpu.matmul %0, %1, %cst {dimension_numbers = #tpu.dot_dimension_numbers<[1], [0], [0], [1], [0, 0, 1, 1], [], []>} : vector<128x16xbf16>, vector<16x16xbf16>, vector<128x16xf32> -> vector<128x16xf32>
    %4 = vector.broadcast %2 : vector<1x16xf32> to vector<128x16xf32>
    %5 = arith.addf %3, %4 : vector<128x16xf32>
    %cst_5 = arith.constant 0.000000e+00 : f32
    %6 = vector.broadcast %cst_5 : f32 to vector<128x16xf32>
    %7 = arith.maximumf %5, %6 : vector<128x16xf32>
    %8 = arith.truncf %7 : vector<128x16xf32> to vector<128x16xbf16>
    %c0_6 = arith.constant 0 : index
    %c0_7 = arith.constant 0 : index
    %9 = vector.load %arg5[%c0_6, %c0_7] : memref<16x16xbf16, #tpu.memory_space<vmem>>, vector<16x16xbf16>
    %c0_8 = arith.constant 0 : index
    %c0_9 = arith.constant 0 : index
    %10 = vector.load %arg6[%c0_8, %c0_9] : memref<1x16xf32, #tpu.memory_space<vmem>>, vector<1x16xf32>
    %cst_10 = arith.constant dense<0.000000e+00> : vector<128x16xf32>
    %11 = tpu.matmul %8, %9, %cst_10 {dimension_numbers = #tpu.dot_dimension_numbers<[1], [0], [0], [1], [0, 0, 1, 1], [], []>} : vector<128x16xbf16>, vector<16x16xbf16>, vector<128x16xf32> -> vector<128x16xf32>
    %12 = vector.broadcast %10 : vector<1x16xf32> to vector<128x16xf32>
    %13 = arith.addf %11, %12 : vector<128x16xf32>
    %cst_11 = arith.constant 0.000000e+00 : f32
    %14 = vector.broadcast %cst_11 : f32 to vector<128x16xf32>
    %15 = arith.maximumf %13, %14 : vector<128x16xf32>
    %16 = arith.truncf %15 : vector<128x16xf32> to vector<128x16xbf16>
    %c0_12 = arith.constant 0 : index
    %c0_13 = arith.constant 0 : index
    %17 = vector.load %arg7[%c0_12, %c0_13] : memref<16x32xbf16, #tpu.memory_space<vmem>>, vector<16x32xbf16>
    %c0_14 = arith.constant 0 : index
    %c0_15 = arith.constant 0 : index
    %18 = vector.load %arg8[%c0_14, %c0_15] : memref<1x32xf32, #tpu.memory_space<vmem>>, vector<1x32xf32>
    %cst_16 = arith.constant dense<0.000000e+00> : vector<128x32xf32>
    %19 = tpu.matmul %16, %17, %cst_16 {dimension_numbers = #tpu.dot_dimension_numbers<[1], [0], [0], [1], [0, 0, 1, 1], [], []>} : vector<128x16xbf16>, vector<16x32xbf16>, vector<128x32xf32> -> vector<128x32xf32>
    %20 = vector.broadcast %18 : vector<1x32xf32> to vector<128x32xf32>
    %21 = arith.addf %19, %20 : vector<128x32xf32>
    %cst_17 = arith.constant 0.000000e+00 : f32
    %22 = vector.broadcast %cst_17 : f32 to vector<128x32xf32>
    %23 = arith.maximumf %21, %22 : vector<128x32xf32>
    %24 = vector.shape_cast %23 : vector<128x32xf32> to vector<16x8x32xf32>
    %cst_18 = arith.constant dense<0xFF800000> : vector<16x32xf32>
    %25 = vector.multi_reduction <maximumf>, %24, %cst_18 [1] : vector<16x8x32xf32> to vector<16x32xf32>
    %c0_19 = arith.constant 0 : index
    %c0_20 = arith.constant 0 : index
    %26 = vector.load %arg2[%c0_19, %c0_20] : memref<256x16xbf16, #tpu.memory_space<vmem>>, vector<256x16xbf16>
    %c0_21 = arith.constant 0 : index
    %c0_22 = arith.constant 0 : index
    %27 = vector.load %arg9[%c0_21, %c0_22] : memref<16x16xbf16, #tpu.memory_space<vmem>>, vector<16x16xbf16>
    %c0_23 = arith.constant 0 : index
    %c0_24 = arith.constant 0 : index
    %28 = vector.load %arg10[%c0_23, %c0_24] : memref<1x16xf32, #tpu.memory_space<vmem>>, vector<1x16xf32>
    %cst_25 = arith.constant dense<0.000000e+00> : vector<256x16xf32>
    %29 = tpu.matmul %26, %27, %cst_25 {dimension_numbers = #tpu.dot_dimension_numbers<[1], [0], [0], [1], [0, 0, 1, 1], [], []>} : vector<256x16xbf16>, vector<16x16xbf16>, vector<256x16xf32> -> vector<256x16xf32>
    %30 = vector.broadcast %28 : vector<1x16xf32> to vector<256x16xf32>
    %31 = arith.addf %29, %30 : vector<256x16xf32>
    %cst_26 = arith.constant 0.000000e+00 : f32
    %32 = vector.broadcast %cst_26 : f32 to vector<256x16xf32>
    %33 = arith.maximumf %31, %32 : vector<256x16xf32>
    %34 = arith.truncf %33 : vector<256x16xf32> to vector<256x16xbf16>
    %c0_27 = arith.constant 0 : index
    %c0_28 = arith.constant 0 : index
    %35 = vector.load %arg11[%c0_27, %c0_28] : memref<16x16xbf16, #tpu.memory_space<vmem>>, vector<16x16xbf16>
    %c0_29 = arith.constant 0 : index
    %c0_30 = arith.constant 0 : index
    %36 = vector.load %arg12[%c0_29, %c0_30] : memref<1x16xf32, #tpu.memory_space<vmem>>, vector<1x16xf32>
    %cst_31 = arith.constant dense<0.000000e+00> : vector<256x16xf32>
    %37 = tpu.matmul %34, %35, %cst_31 {dimension_numbers = #tpu.dot_dimension_numbers<[1], [0], [0], [1], [0, 0, 1, 1], [], []>} : vector<256x16xbf16>, vector<16x16xbf16>, vector<256x16xf32> -> vector<256x16xf32>
    %38 = vector.broadcast %36 : vector<1x16xf32> to vector<256x16xf32>
    %39 = arith.addf %37, %38 : vector<256x16xf32>
    %cst_32 = arith.constant 0.000000e+00 : f32
    %40 = vector.broadcast %cst_32 : f32 to vector<256x16xf32>
    %41 = arith.maximumf %39, %40 : vector<256x16xf32>
    %42 = arith.truncf %41 : vector<256x16xf32> to vector<256x16xbf16>
    %c0_33 = arith.constant 0 : index
    %c0_34 = arith.constant 0 : index
    %43 = vector.load %arg13[%c0_33, %c0_34] : memref<16x32xbf16, #tpu.memory_space<vmem>>, vector<16x32xbf16>
    %c0_35 = arith.constant 0 : index
    %c0_36 = arith.constant 0 : index
    %44 = vector.load %arg14[%c0_35, %c0_36] : memref<1x32xf32, #tpu.memory_space<vmem>>, vector<1x32xf32>
    %cst_37 = arith.constant dense<0.000000e+00> : vector<256x32xf32>
    %45 = tpu.matmul %42, %43, %cst_37 {dimension_numbers = #tpu.dot_dimension_numbers<[1], [0], [0], [1], [0, 0, 1, 1], [], []>} : vector<256x16xbf16>, vector<16x32xbf16>, vector<256x32xf32> -> vector<256x32xf32>
    %46 = vector.broadcast %44 : vector<1x32xf32> to vector<256x32xf32>
    %47 = arith.addf %45, %46 : vector<256x32xf32>
    %cst_38 = arith.constant 0.000000e+00 : f32
    %48 = vector.broadcast %cst_38 : f32 to vector<256x32xf32>
    %49 = arith.maximumf %47, %48 : vector<256x32xf32>
    %50 = vector.shape_cast %49 : vector<256x32xf32> to vector<16x16x32xf32>
    %cst_39 = arith.constant dense<0xFF800000> : vector<16x32xf32>
    %51 = vector.multi_reduction <maximumf>, %50, %cst_39 [1] : vector<16x16x32xf32> to vector<16x32xf32>
    %52 = tpu.concatenate %25, %51 in 1 : vector<16x32xf32>, vector<16x32xf32> -> vector<16x64xf32>
    %53 = arith.truncf %52 : vector<16x64xf32> to vector<16x64xbf16>
    %c0_40 = arith.constant 0 : index
    %c0_41 = arith.constant 0 : index
    %54 = vector.load %arg15[%c0_40, %c0_41] : memref<16x64xbf16, #tpu.memory_space<vmem>>, vector<16x64xbf16>
    tpu.vector_store %arg15[%c0_40, %c0_41], %53 {strides = array<i32>} : memref<16x64xbf16, #tpu.memory_space<vmem>>, vector<16x64xbf16>,
    return
  }
  func.func @transform_0(%arg0: i32) -> (i32, i32) {
    %c0_i32 = arith.constant 0 : i32
    %c0_i32_0 = arith.constant 0 : i32
    return %arg0, %c0_i32 : i32, i32
  }
  func.func @transform_1(%arg0: i32) -> (i32, i32) {
    %c0_i32 = arith.constant 0 : i32
    %c0_i32_0 = arith.constant 0 : i32
    return %arg0, %c0_i32 : i32, i32
  }
  func.func @transform_2(%arg0: i32) -> (i32, i32) {
    %c0_i32 = arith.constant 0 : i32
    %c0_i32_0 = arith.constant 0 : i32
    %c0_i32_1 = arith.constant 0 : i32
    return %c0_i32, %c0_i32_0 : i32, i32
  }
  func.func @transform_3(%arg0: i32) -> (i32, i32) {
    %c0_i32 = arith.constant 0 : i32
    %c0_i32_0 = arith.constant 0 : i32
    %c0_i32_1 = arith.constant 0 : i32
    return %c0_i32, %c0_i32_0 : i32, i32
  }
  func.func @transform_4(%arg0: i32) -> (i32, i32) {
    %c0_i32 = arith.constant 0 : i32
    %c0_i32_0 = arith.constant 0 : i32
    %c0_i32_1 = arith.constant 0 : i32
    return %c0_i32, %c0_i32_0 : i32, i32
  }
  func.func @transform_5(%arg0: i32) -> (i32, i32) {
    %c0_i32 = arith.constant 0 : i32
    %c0_i32_0 = arith.constant 0 : i32
    %c0_i32_1 = arith.constant 0 : i32
    return %c0_i32, %c0_i32_0 : i32, i32
  }
  func.func @transform_6(%arg0: i32) -> (i32, i32) {
    %c0_i32 = arith.constant 0 : i32
    %c0_i32_0 = arith.constant 0 : i32
    %c0_i32_1 = arith.constant 0 : i32
    return %c0_i32, %c0_i32_0 : i32, i32
  }
  func.func @transform_7(%arg0: i32) -> (i32, i32) {
    %c0_i32 = arith.constant 0 : i32
    %c0_i32_0 = arith.constant 0 : i32
    %c0_i32_1 = arith.constant 0 : i32
    return %c0_i32, %c0_i32_0 : i32, i32
  }
  func.func @transform_8(%arg0: i32) -> (i32, i32) {
    %c0_i32 = arith.constant 0 : i32
    %c0_i32_0 = arith.constant 0 : i32
    %c0_i32_1 = arith.constant 0 : i32
    return %c0_i32, %c0_i32_0 : i32, i32
  }
  func.func @transform_9(%arg0: i32) -> (i32, i32) {
    %c0_i32 = arith.constant 0 : i32
    %c0_i32_0 = arith.constant 0 : i32
    %c0_i32_1 = arith.constant 0 : i32
    return %c0_i32, %c0_i32_0 : i32, i32
  }
  func.func @transform_10(%arg0: i32) -> (i32, i32) {
    %c0_i32 = arith.constant 0 : i32
    %c0_i32_0 = arith.constant 0 : i32
    %c0_i32_1 = arith.constant 0 : i32
    return %c0_i32, %c0_i32_0 : i32, i32
  }
  func.func @transform_11(%arg0: i32) -> (i32, i32) {
    %c0_i32 = arith.constant 0 : i32
    %c0_i32_0 = arith.constant 0 : i32
    %c0_i32_1 = arith.constant 0 : i32
    return %c0_i32, %c0_i32_0 : i32, i32
  }
  func.func @transform_12(%arg0: i32) -> (i32, i32) {
    %c0_i32 = arith.constant 0 : i32
    %c0_i32_0 = arith.constant 0 : i32
    %c0_i32_1 = arith.constant 0 : i32
    return %c0_i32, %c0_i32_0 : i32, i32
  }
  func.func @transform_13(%arg0: i32) -> (i32, i32) {
    %c0_i32 = arith.constant 0 : i32
    %c0_i32_0 = arith.constant 0 : i32
    %c0_i32_1 = arith.constant 0 : i32
    return %c0_i32, %c0_i32_0 : i32, i32
  }
  func.func @transform_14(%arg0: i32) -> (i32, i32) {
    %c0_i32 = arith.constant 0 : i32
    %c0_i32_0 = arith.constant 0 : i32
    return %arg0, %c0_i32 : i32, i32
  }
}

module attributes {stable_mosaic.version = 11 : i64} {
  func.func @kernel(%arg0: i32, %arg1: memref<64x80xbf16, #tpu.memory_space<vmem>>, %arg2: memref<128x80xbf16, #tpu.memory_space<vmem>>, %arg3: memref<80x32xbf16, #tpu.memory_space<vmem>>, %arg4: memref<1x32xf32, #tpu.memory_space<vmem>>, %arg5: memref<32x32xbf16, #tpu.memory_space<vmem>>, %arg6: memref<1x32xf32, #tpu.memory_space<vmem>>, %arg7: memref<32x64xbf16, #tpu.memory_space<vmem>>, %arg8: memref<1x64xf32, #tpu.memory_space<vmem>>, %arg9: memref<80x32xbf16, #tpu.memory_space<vmem>>, %arg10: memref<1x32xf32, #tpu.memory_space<vmem>>, %arg11: memref<32x32xbf16, #tpu.memory_space<vmem>>, %arg12: memref<1x32xf32, #tpu.memory_space<vmem>>, %arg13: memref<32x64xbf16, #tpu.memory_space<vmem>>, %arg14: memref<1x64xf32, #tpu.memory_space<vmem>>, %arg15: memref<8x128xbf16, #tpu.memory_space<vmem>>) attributes {dimension_semantics = [#tpu.dimension_semantics<parallel>], iteration_bounds = array<i64: 2>, scalar_prefetch = 0 : i64, scratch_operands = 0 : i64, tpu.core_type = #tpu.core_type<tc>, window_params = [{transform_indices = @transform_0, window_bounds = array<i64: 64, 80>}, {transform_indices = @transform_1, window_bounds = array<i64: 128, 80>}, {pipeline_mode = #tpu.pipeline_mode<synchronous>, transform_indices = @transform_2, window_bounds = array<i64: 80, 32>}, {pipeline_mode = #tpu.pipeline_mode<synchronous>, transform_indices = @transform_3, window_bounds = array<i64: 1, 32>}, {pipeline_mode = #tpu.pipeline_mode<synchronous>, transform_indices = @transform_4, window_bounds = array<i64: 32, 32>}, {pipeline_mode = #tpu.pipeline_mode<synchronous>, transform_indices = @transform_5, window_bounds = array<i64: 1, 32>}, {pipeline_mode = #tpu.pipeline_mode<synchronous>, transform_indices = @transform_6, window_bounds = array<i64: 32, 64>}, {pipeline_mode = #tpu.pipeline_mode<synchronous>, transform_indices = @transform_7, window_bounds = array<i64: 1, 64>}, {pipeline_mode = #tpu.pipeline_mode<synchronous>, transform_indices = @transform_8, window_bounds = array<i64: 80, 32>}, {pipeline_mode = #tpu.pipeline_mode<synchronous>, transform_indices = @transform_9, window_bounds = array<i64: 1, 32>}, {pipeline_mode = #tpu.pipeline_mode<synchronous>, transform_indices = @transform_10, window_bounds = array<i64: 32, 32>}, {pipeline_mode = #tpu.pipeline_mode<synchronous>, transform_indices = @transform_11, window_bounds = array<i64: 1, 32>}, {pipeline_mode = #tpu.pipeline_mode<synchronous>, transform_indices = @transform_12, window_bounds = array<i64: 32, 64>}, {pipeline_mode = #tpu.pipeline_mode<synchronous>, transform_indices = @transform_13, window_bounds = array<i64: 1, 64>}, {transform_indices = @transform_14, window_bounds = array<i64: 8, 128>}]} {
    %c0 = arith.constant 0 : index
    %c0_0 = arith.constant 0 : index
    %0 = vector.load %arg1[%c0, %c0_0] : memref<64x80xbf16, #tpu.memory_space<vmem>>, vector<64x80xbf16>
    %c0_1 = arith.constant 0 : index
    %c0_2 = arith.constant 0 : index
    %1 = vector.load %arg3[%c0_1, %c0_2] : memref<80x32xbf16, #tpu.memory_space<vmem>>, vector<80x32xbf16>
    %c0_3 = arith.constant 0 : index
    %c0_4 = arith.constant 0 : index
    %2 = vector.load %arg4[%c0_3, %c0_4] : memref<1x32xf32, #tpu.memory_space<vmem>>, vector<1x32xf32>
    %cst = arith.constant dense<0.000000e+00> : vector<64x32xf32>
    %3 = tpu.matmul %0, %1, %cst {dimension_numbers = #tpu.dot_dimension_numbers<[1], [0], [0], [1], [0, 0, 1, 1], [], []>} : vector<64x80xbf16>, vector<80x32xbf16>, vector<64x32xf32> -> vector<64x32xf32>
    %4 = vector.broadcast %2 : vector<1x32xf32> to vector<64x32xf32>
    %5 = arith.addf %3, %4 : vector<64x32xf32>
    %cst_5 = arith.constant 0.000000e+00 : f32
    %6 = vector.broadcast %cst_5 : f32 to vector<64x32xf32>
    %7 = arith.maximumf %5, %6 : vector<64x32xf32>
    %8 = arith.truncf %7 : vector<64x32xf32> to vector<64x32xbf16>
    %c0_6 = arith.constant 0 : index
    %c0_7 = arith.constant 0 : index
    %9 = vector.load %arg5[%c0_6, %c0_7] : memref<32x32xbf16, #tpu.memory_space<vmem>>, vector<32x32xbf16>
    %c0_8 = arith.constant 0 : index
    %c0_9 = arith.constant 0 : index
    %10 = vector.load %arg6[%c0_8, %c0_9] : memref<1x32xf32, #tpu.memory_space<vmem>>, vector<1x32xf32>
    %cst_10 = arith.constant dense<0.000000e+00> : vector<64x32xf32>
    %11 = tpu.matmul %8, %9, %cst_10 {dimension_numbers = #tpu.dot_dimension_numbers<[1], [0], [0], [1], [0, 0, 1, 1], [], []>} : vector<64x32xbf16>, vector<32x32xbf16>, vector<64x32xf32> -> vector<64x32xf32>
    %12 = vector.broadcast %10 : vector<1x32xf32> to vector<64x32xf32>
    %13 = arith.addf %11, %12 : vector<64x32xf32>
    %cst_11 = arith.constant 0.000000e+00 : f32
    %14 = vector.broadcast %cst_11 : f32 to vector<64x32xf32>
    %15 = arith.maximumf %13, %14 : vector<64x32xf32>
    %16 = arith.truncf %15 : vector<64x32xf32> to vector<64x32xbf16>
    %c0_12 = arith.constant 0 : index
    %c0_13 = arith.constant 0 : index
    %17 = vector.load %arg7[%c0_12, %c0_13] : memref<32x64xbf16, #tpu.memory_space<vmem>>, vector<32x64xbf16>
    %c0_14 = arith.constant 0 : index
    %c0_15 = arith.constant 0 : index
    %18 = vector.load %arg8[%c0_14, %c0_15] : memref<1x64xf32, #tpu.memory_space<vmem>>, vector<1x64xf32>
    %cst_16 = arith.constant dense<0.000000e+00> : vector<64x64xf32>
    %19 = tpu.matmul %16, %17, %cst_16 {dimension_numbers = #tpu.dot_dimension_numbers<[1], [0], [0], [1], [0, 0, 1, 1], [], []>} : vector<64x32xbf16>, vector<32x64xbf16>, vector<64x64xf32> -> vector<64x64xf32>
    %20 = vector.broadcast %18 : vector<1x64xf32> to vector<64x64xf32>
    %21 = arith.addf %19, %20 : vector<64x64xf32>
    %cst_17 = arith.constant 0.000000e+00 : f32
    %22 = vector.broadcast %cst_17 : f32 to vector<64x64xf32>
    %23 = arith.maximumf %21, %22 : vector<64x64xf32>
    %24 = vector.shape_cast %23 : vector<64x64xf32> to vector<8x8x64xf32>
    %cst_18 = arith.constant dense<0xFF800000> : vector<8x64xf32>
    %25 = vector.multi_reduction <maximumf>, %24, %cst_18 [1] : vector<8x8x64xf32> to vector<8x64xf32>
    %c0_19 = arith.constant 0 : index
    %c0_20 = arith.constant 0 : index
    %26 = vector.load %arg2[%c0_19, %c0_20] : memref<128x80xbf16, #tpu.memory_space<vmem>>, vector<128x80xbf16>
    %c0_21 = arith.constant 0 : index
    %c0_22 = arith.constant 0 : index
    %27 = vector.load %arg9[%c0_21, %c0_22] : memref<80x32xbf16, #tpu.memory_space<vmem>>, vector<80x32xbf16>
    %c0_23 = arith.constant 0 : index
    %c0_24 = arith.constant 0 : index
    %28 = vector.load %arg10[%c0_23, %c0_24] : memref<1x32xf32, #tpu.memory_space<vmem>>, vector<1x32xf32>
    %cst_25 = arith.constant dense<0.000000e+00> : vector<128x32xf32>
    %29 = tpu.matmul %26, %27, %cst_25 {dimension_numbers = #tpu.dot_dimension_numbers<[1], [0], [0], [1], [0, 0, 1, 1], [], []>} : vector<128x80xbf16>, vector<80x32xbf16>, vector<128x32xf32> -> vector<128x32xf32>
    %30 = vector.broadcast %28 : vector<1x32xf32> to vector<128x32xf32>
    %31 = arith.addf %29, %30 : vector<128x32xf32>
    %cst_26 = arith.constant 0.000000e+00 : f32
    %32 = vector.broadcast %cst_26 : f32 to vector<128x32xf32>
    %33 = arith.maximumf %31, %32 : vector<128x32xf32>
    %34 = arith.truncf %33 : vector<128x32xf32> to vector<128x32xbf16>
    %c0_27 = arith.constant 0 : index
    %c0_28 = arith.constant 0 : index
    %35 = vector.load %arg11[%c0_27, %c0_28] : memref<32x32xbf16, #tpu.memory_space<vmem>>, vector<32x32xbf16>
    %c0_29 = arith.constant 0 : index
    %c0_30 = arith.constant 0 : index
    %36 = vector.load %arg12[%c0_29, %c0_30] : memref<1x32xf32, #tpu.memory_space<vmem>>, vector<1x32xf32>
    %cst_31 = arith.constant dense<0.000000e+00> : vector<128x32xf32>
    %37 = tpu.matmul %34, %35, %cst_31 {dimension_numbers = #tpu.dot_dimension_numbers<[1], [0], [0], [1], [0, 0, 1, 1], [], []>} : vector<128x32xbf16>, vector<32x32xbf16>, vector<128x32xf32> -> vector<128x32xf32>
    %38 = vector.broadcast %36 : vector<1x32xf32> to vector<128x32xf32>
    %39 = arith.addf %37, %38 : vector<128x32xf32>
    %cst_32 = arith.constant 0.000000e+00 : f32
    %40 = vector.broadcast %cst_32 : f32 to vector<128x32xf32>
    %41 = arith.maximumf %39, %40 : vector<128x32xf32>
    %42 = arith.truncf %41 : vector<128x32xf32> to vector<128x32xbf16>
    %c0_33 = arith.constant 0 : index
    %c0_34 = arith.constant 0 : index
    %43 = vector.load %arg13[%c0_33, %c0_34] : memref<32x64xbf16, #tpu.memory_space<vmem>>, vector<32x64xbf16>
    %c0_35 = arith.constant 0 : index
    %c0_36 = arith.constant 0 : index
    %44 = vector.load %arg14[%c0_35, %c0_36] : memref<1x64xf32, #tpu.memory_space<vmem>>, vector<1x64xf32>
    %cst_37 = arith.constant dense<0.000000e+00> : vector<128x64xf32>
    %45 = tpu.matmul %42, %43, %cst_37 {dimension_numbers = #tpu.dot_dimension_numbers<[1], [0], [0], [1], [0, 0, 1, 1], [], []>} : vector<128x32xbf16>, vector<32x64xbf16>, vector<128x64xf32> -> vector<128x64xf32>
    %46 = vector.broadcast %44 : vector<1x64xf32> to vector<128x64xf32>
    %47 = arith.addf %45, %46 : vector<128x64xf32>
    %cst_38 = arith.constant 0.000000e+00 : f32
    %48 = vector.broadcast %cst_38 : f32 to vector<128x64xf32>
    %49 = arith.maximumf %47, %48 : vector<128x64xf32>
    %50 = vector.shape_cast %49 : vector<128x64xf32> to vector<8x16x64xf32>
    %cst_39 = arith.constant dense<0xFF800000> : vector<8x64xf32>
    %51 = vector.multi_reduction <maximumf>, %50, %cst_39 [1] : vector<8x16x64xf32> to vector<8x64xf32>
    %52 = tpu.concatenate %25, %51 in 1 : vector<8x64xf32>, vector<8x64xf32> -> vector<8x128xf32>
    %53 = arith.truncf %52 : vector<8x128xf32> to vector<8x128xbf16>
    %c0_40 = arith.constant 0 : index
    %c0_41 = arith.constant 0 : index
    %54 = vector.load %arg15[%c0_40, %c0_41] : memref<8x128xbf16, #tpu.memory_space<vmem>>, vector<8x128xbf16>
    tpu.vector_store %arg15[%c0_40, %c0_41], %53 {strides = array<i32>} : memref<8x128xbf16, #tpu.memory_space<vmem>>, vector<8x128xbf16>,
    return
  }
  func.func @transform_0(%arg0: i32) -> (i32, i32) {
    %c0_i32 = arith.constant 0 : i32
    %c0_i32_0 = arith.constant 0 : i32
    return %arg0, %c0_i32 : i32, i32
  }
  func.func @transform_1(%arg0: i32) -> (i32, i32) {
    %c0_i32 = arith.constant 0 : i32
    %c0_i32_0 = arith.constant 0 : i32
    return %arg0, %c0_i32 : i32, i32
  }
  func.func @transform_2(%arg0: i32) -> (i32, i32) {
    %c0_i32 = arith.constant 0 : i32
    %c0_i32_0 = arith.constant 0 : i32
    %c0_i32_1 = arith.constant 0 : i32
    return %c0_i32, %c0_i32_0 : i32, i32
  }
  func.func @transform_3(%arg0: i32) -> (i32, i32) {
    %c0_i32 = arith.constant 0 : i32
    %c0_i32_0 = arith.constant 0 : i32
    %c0_i32_1 = arith.constant 0 : i32
    return %c0_i32, %c0_i32_0 : i32, i32
  }
  func.func @transform_4(%arg0: i32) -> (i32, i32) {
    %c0_i32 = arith.constant 0 : i32
    %c0_i32_0 = arith.constant 0 : i32
    %c0_i32_1 = arith.constant 0 : i32
    return %c0_i32, %c0_i32_0 : i32, i32
  }
  func.func @transform_5(%arg0: i32) -> (i32, i32) {
    %c0_i32 = arith.constant 0 : i32
    %c0_i32_0 = arith.constant 0 : i32
    %c0_i32_1 = arith.constant 0 : i32
    return %c0_i32, %c0_i32_0 : i32, i32
  }
  func.func @transform_6(%arg0: i32) -> (i32, i32) {
    %c0_i32 = arith.constant 0 : i32
    %c0_i32_0 = arith.constant 0 : i32
    %c0_i32_1 = arith.constant 0 : i32
    return %c0_i32, %c0_i32_0 : i32, i32
  }
  func.func @transform_7(%arg0: i32) -> (i32, i32) {
    %c0_i32 = arith.constant 0 : i32
    %c0_i32_0 = arith.constant 0 : i32
    %c0_i32_1 = arith.constant 0 : i32
    return %c0_i32, %c0_i32_0 : i32, i32
  }
  func.func @transform_8(%arg0: i32) -> (i32, i32) {
    %c0_i32 = arith.constant 0 : i32
    %c0_i32_0 = arith.constant 0 : i32
    %c0_i32_1 = arith.constant 0 : i32
    return %c0_i32, %c0_i32_0 : i32, i32
  }
  func.func @transform_9(%arg0: i32) -> (i32, i32) {
    %c0_i32 = arith.constant 0 : i32
    %c0_i32_0 = arith.constant 0 : i32
    %c0_i32_1 = arith.constant 0 : i32
    return %c0_i32, %c0_i32_0 : i32, i32
  }
  func.func @transform_10(%arg0: i32) -> (i32, i32) {
    %c0_i32 = arith.constant 0 : i32
    %c0_i32_0 = arith.constant 0 : i32
    %c0_i32_1 = arith.constant 0 : i32
    return %c0_i32, %c0_i32_0 : i32, i32
  }
  func.func @transform_11(%arg0: i32) -> (i32, i32) {
    %c0_i32 = arith.constant 0 : i32
    %c0_i32_0 = arith.constant 0 : i32
    %c0_i32_1 = arith.constant 0 : i32
    return %c0_i32, %c0_i32_0 : i32, i32
  }
  func.func @transform_12(%arg0: i32) -> (i32, i32) {
    %c0_i32 = arith.constant 0 : i32
    %c0_i32_0 = arith.constant 0 : i32
    %c0_i32_1 = arith.constant 0 : i32
    return %c0_i32, %c0_i32_0 : i32, i32
  }
  func.func @transform_13(%arg0: i32) -> (i32, i32) {
    %c0_i32 = arith.constant 0 : i32
    %c0_i32_0 = arith.constant 0 : i32
    %c0_i32_1 = arith.constant 0 : i32
    return %c0_i32, %c0_i32_0 : i32, i32
  }
  func.func @transform_14(%arg0: i32) -> (i32, i32) {
    %c0_i32 = arith.constant 0 : i32
    %c0_i32_0 = arith.constant 0 : i32
    return %arg0, %c0_i32 : i32, i32
  }
}

module attributes {stable_mosaic.version = 11 : i64} {
  func.func @kernel(%arg0: i32, %arg1: memref<16x144xbf16, #tpu.memory_space<vmem>>, %arg2: memref<144x64xbf16, #tpu.memory_space<vmem>>, %arg3: memref<1x64xf32, #tpu.memory_space<vmem>>, %arg4: memref<64x128xbf16, #tpu.memory_space<vmem>>, %arg5: memref<1x128xf32, #tpu.memory_space<vmem>>, %arg6: memref<128x256xbf16, #tpu.memory_space<vmem>>, %arg7: memref<1x256xf32, #tpu.memory_space<vmem>>, %arg8: memref<256x128xbf16, #tpu.memory_space<vmem>>, %arg9: memref<1x128xf32, #tpu.memory_space<vmem>>, %arg10: memref<128x64xbf16, #tpu.memory_space<vmem>>, %arg11: memref<1x64xf32, #tpu.memory_space<vmem>>, %arg12: memref<64x40xbf16, #tpu.memory_space<vmem>>, %arg13: memref<1x40xf32, #tpu.memory_space<vmem>>, %arg14: memref<2x40xf32, #tpu.memory_space<vmem>>) attributes {dimension_semantics = [#tpu.dimension_semantics<arbitrary>], iteration_bounds = array<i64: 1>, scalar_prefetch = 0 : i64, scratch_operands = 0 : i64, tpu.core_type = #tpu.core_type<tc>, window_params = [{pipeline_mode = #tpu.pipeline_mode<synchronous>, transform_indices = @transform_0, window_bounds = array<i64: 16, 144>}, {pipeline_mode = #tpu.pipeline_mode<synchronous>, transform_indices = @transform_1, window_bounds = array<i64: 144, 64>}, {pipeline_mode = #tpu.pipeline_mode<synchronous>, transform_indices = @transform_2, window_bounds = array<i64: 1, 64>}, {pipeline_mode = #tpu.pipeline_mode<synchronous>, transform_indices = @transform_3, window_bounds = array<i64: 64, 128>}, {pipeline_mode = #tpu.pipeline_mode<synchronous>, transform_indices = @transform_4, window_bounds = array<i64: 1, 128>}, {pipeline_mode = #tpu.pipeline_mode<synchronous>, transform_indices = @transform_5, window_bounds = array<i64: 128, 256>}, {pipeline_mode = #tpu.pipeline_mode<synchronous>, transform_indices = @transform_6, window_bounds = array<i64: 1, 256>}, {pipeline_mode = #tpu.pipeline_mode<synchronous>, transform_indices = @transform_7, window_bounds = array<i64: 256, 128>}, {pipeline_mode = #tpu.pipeline_mode<synchronous>, transform_indices = @transform_8, window_bounds = array<i64: 1, 128>}, {pipeline_mode = #tpu.pipeline_mode<synchronous>, transform_indices = @transform_9, window_bounds = array<i64: 128, 64>}, {pipeline_mode = #tpu.pipeline_mode<synchronous>, transform_indices = @transform_10, window_bounds = array<i64: 1, 64>}, {pipeline_mode = #tpu.pipeline_mode<synchronous>, transform_indices = @transform_11, window_bounds = array<i64: 64, 40>}, {pipeline_mode = #tpu.pipeline_mode<synchronous>, transform_indices = @transform_12, window_bounds = array<i64: 1, 40>}, {pipeline_mode = #tpu.pipeline_mode<synchronous>, transform_indices = @transform_13, window_bounds = array<i64: 2, 40>}]} {
    %c0 = arith.constant 0 : index
    %c0_0 = arith.constant 0 : index
    %0 = vector.load %arg1[%c0, %c0_0] : memref<16x144xbf16, #tpu.memory_space<vmem>>, vector<16x144xbf16>
    %c0_1 = arith.constant 0 : index
    %c0_2 = arith.constant 0 : index
    %1 = vector.load %arg2[%c0_1, %c0_2] : memref<144x64xbf16, #tpu.memory_space<vmem>>, vector<144x64xbf16>
    %c0_3 = arith.constant 0 : index
    %c0_4 = arith.constant 0 : index
    %2 = vector.load %arg3[%c0_3, %c0_4] : memref<1x64xf32, #tpu.memory_space<vmem>>, vector<1x64xf32>
    %cst = arith.constant dense<0.000000e+00> : vector<16x64xf32>
    %3 = tpu.matmul %0, %1, %cst {dimension_numbers = #tpu.dot_dimension_numbers<[1], [0], [0], [1], [0, 0, 1, 1], [], []>} : vector<16x144xbf16>, vector<144x64xbf16>, vector<16x64xf32> -> vector<16x64xf32>
    %4 = vector.broadcast %2 : vector<1x64xf32> to vector<16x64xf32>
    %5 = arith.addf %3, %4 : vector<16x64xf32>
    %cst_5 = arith.constant 0.000000e+00 : f32
    %6 = vector.broadcast %cst_5 : f32 to vector<16x64xf32>
    %7 = arith.maximumf %5, %6 : vector<16x64xf32>
    %8 = arith.truncf %7 : vector<16x64xf32> to vector<16x64xbf16>
    %c0_6 = arith.constant 0 : index
    %c0_7 = arith.constant 0 : index
    %9 = vector.load %arg4[%c0_6, %c0_7] : memref<64x128xbf16, #tpu.memory_space<vmem>>, vector<64x128xbf16>
    %c0_8 = arith.constant 0 : index
    %c0_9 = arith.constant 0 : index
    %10 = vector.load %arg5[%c0_8, %c0_9] : memref<1x128xf32, #tpu.memory_space<vmem>>, vector<1x128xf32>
    %cst_10 = arith.constant dense<0.000000e+00> : vector<16x128xf32>
    %11 = tpu.matmul %8, %9, %cst_10 {dimension_numbers = #tpu.dot_dimension_numbers<[1], [0], [0], [1], [0, 0, 1, 1], [], []>} : vector<16x64xbf16>, vector<64x128xbf16>, vector<16x128xf32> -> vector<16x128xf32>
    %12 = vector.broadcast %10 : vector<1x128xf32> to vector<16x128xf32>
    %13 = arith.addf %11, %12 : vector<16x128xf32>
    %cst_11 = arith.constant 0.000000e+00 : f32
    %14 = vector.broadcast %cst_11 : f32 to vector<16x128xf32>
    %15 = arith.maximumf %13, %14 : vector<16x128xf32>
    %16 = arith.truncf %15 : vector<16x128xf32> to vector<16x128xbf16>
    %c0_12 = arith.constant 0 : index
    %c0_13 = arith.constant 0 : index
    %17 = vector.load %arg6[%c0_12, %c0_13] : memref<128x256xbf16, #tpu.memory_space<vmem>>, vector<128x256xbf16>
    %c0_14 = arith.constant 0 : index
    %c0_15 = arith.constant 0 : index
    %18 = vector.load %arg7[%c0_14, %c0_15] : memref<1x256xf32, #tpu.memory_space<vmem>>, vector<1x256xf32>
    %cst_16 = arith.constant dense<0.000000e+00> : vector<16x256xf32>
    %19 = tpu.matmul %16, %17, %cst_16 {dimension_numbers = #tpu.dot_dimension_numbers<[1], [0], [0], [1], [0, 0, 1, 1], [], []>} : vector<16x128xbf16>, vector<128x256xbf16>, vector<16x256xf32> -> vector<16x256xf32>
    %20 = vector.broadcast %18 : vector<1x256xf32> to vector<16x256xf32>
    %21 = arith.addf %19, %20 : vector<16x256xf32>
    %cst_17 = arith.constant 0.000000e+00 : f32
    %22 = vector.broadcast %cst_17 : f32 to vector<16x256xf32>
    %23 = arith.maximumf %21, %22 : vector<16x256xf32>
    %24 = vector.shape_cast %23 : vector<16x256xf32> to vector<2x8x256xf32>
    %cst_18 = arith.constant dense<0xFF800000> : vector<2x256xf32>
    %25 = vector.multi_reduction <maximumf>, %24, %cst_18 [1] : vector<2x8x256xf32> to vector<2x256xf32>
    %26 = arith.truncf %25 : vector<2x256xf32> to vector<2x256xbf16>
    %c0_19 = arith.constant 0 : index
    %c0_20 = arith.constant 0 : index
    %27 = vector.load %arg8[%c0_19, %c0_20] : memref<256x128xbf16, #tpu.memory_space<vmem>>, vector<256x128xbf16>
    %c0_21 = arith.constant 0 : index
    %c0_22 = arith.constant 0 : index
    %28 = vector.load %arg9[%c0_21, %c0_22] : memref<1x128xf32, #tpu.memory_space<vmem>>, vector<1x128xf32>
    %cst_23 = arith.constant dense<0.000000e+00> : vector<2x128xf32>
    %29 = tpu.matmul %26, %27, %cst_23 {dimension_numbers = #tpu.dot_dimension_numbers<[1], [0], [0], [1], [0, 0, 1, 1], [], []>} : vector<2x256xbf16>, vector<256x128xbf16>, vector<2x128xf32> -> vector<2x128xf32>
    %30 = vector.broadcast %28 : vector<1x128xf32> to vector<2x128xf32>
    %31 = arith.addf %29, %30 : vector<2x128xf32>
    %cst_24 = arith.constant 0.000000e+00 : f32
    %32 = vector.broadcast %cst_24 : f32 to vector<2x128xf32>
    %33 = arith.maximumf %31, %32 : vector<2x128xf32>
    %34 = arith.truncf %33 : vector<2x128xf32> to vector<2x128xbf16>
    %c0_25 = arith.constant 0 : index
    %c0_26 = arith.constant 0 : index
    %35 = vector.load %arg10[%c0_25, %c0_26] : memref<128x64xbf16, #tpu.memory_space<vmem>>, vector<128x64xbf16>
    %c0_27 = arith.constant 0 : index
    %c0_28 = arith.constant 0 : index
    %36 = vector.load %arg11[%c0_27, %c0_28] : memref<1x64xf32, #tpu.memory_space<vmem>>, vector<1x64xf32>
    %cst_29 = arith.constant dense<0.000000e+00> : vector<2x64xf32>
    %37 = tpu.matmul %34, %35, %cst_29 {dimension_numbers = #tpu.dot_dimension_numbers<[1], [0], [0], [1], [0, 0, 1, 1], [], []>} : vector<2x128xbf16>, vector<128x64xbf16>, vector<2x64xf32> -> vector<2x64xf32>
    %38 = vector.broadcast %36 : vector<1x64xf32> to vector<2x64xf32>
    %39 = arith.addf %37, %38 : vector<2x64xf32>
    %cst_30 = arith.constant 0.000000e+00 : f32
    %40 = vector.broadcast %cst_30 : f32 to vector<2x64xf32>
    %41 = arith.maximumf %39, %40 : vector<2x64xf32>
    %42 = arith.truncf %41 : vector<2x64xf32> to vector<2x64xbf16>
    %c0_31 = arith.constant 0 : index
    %c0_32 = arith.constant 0 : index
    %43 = vector.load %arg12[%c0_31, %c0_32] : memref<64x40xbf16, #tpu.memory_space<vmem>>, vector<64x40xbf16>
    %c0_33 = arith.constant 0 : index
    %c0_34 = arith.constant 0 : index
    %44 = vector.load %arg13[%c0_33, %c0_34] : memref<1x40xf32, #tpu.memory_space<vmem>>, vector<1x40xf32>
    %cst_35 = arith.constant dense<0.000000e+00> : vector<2x40xf32>
    %45 = tpu.matmul %42, %43, %cst_35 {dimension_numbers = #tpu.dot_dimension_numbers<[1], [0], [0], [1], [0, 0, 1, 1], [], []>} : vector<2x64xbf16>, vector<64x40xbf16>, vector<2x40xf32> -> vector<2x40xf32>
    %46 = vector.broadcast %44 : vector<1x40xf32> to vector<2x40xf32>
    %47 = arith.addf %45, %46 : vector<2x40xf32>
    %c0_36 = arith.constant 0 : index
    %c0_37 = arith.constant 0 : index
    %48 = vector.load %arg14[%c0_36, %c0_37] : memref<2x40xf32, #tpu.memory_space<vmem>>, vector<2x40xf32>
    tpu.vector_store %arg14[%c0_36, %c0_37], %47 {strides = array<i32>} : memref<2x40xf32, #tpu.memory_space<vmem>>, vector<2x40xf32>,
    return
  }
  func.func @transform_0(%arg0: i32) -> (i32, i32) {
    %c0_i32 = arith.constant 0 : i32
    %c0_i32_0 = arith.constant 0 : i32
    %c0_i32_1 = arith.constant 0 : i32
    return %c0_i32, %c0_i32_0 : i32, i32
  }
  func.func @transform_1(%arg0: i32) -> (i32, i32) {
    %c0_i32 = arith.constant 0 : i32
    %c0_i32_0 = arith.constant 0 : i32
    %c0_i32_1 = arith.constant 0 : i32
    return %c0_i32, %c0_i32_0 : i32, i32
  }
  func.func @transform_2(%arg0: i32) -> (i32, i32) {
    %c0_i32 = arith.constant 0 : i32
    %c0_i32_0 = arith.constant 0 : i32
    %c0_i32_1 = arith.constant 0 : i32
    return %c0_i32, %c0_i32_0 : i32, i32
  }
  func.func @transform_3(%arg0: i32) -> (i32, i32) {
    %c0_i32 = arith.constant 0 : i32
    %c0_i32_0 = arith.constant 0 : i32
    %c0_i32_1 = arith.constant 0 : i32
    return %c0_i32, %c0_i32_0 : i32, i32
  }
  func.func @transform_4(%arg0: i32) -> (i32, i32) {
    %c0_i32 = arith.constant 0 : i32
    %c0_i32_0 = arith.constant 0 : i32
    %c0_i32_1 = arith.constant 0 : i32
    return %c0_i32, %c0_i32_0 : i32, i32
  }
  func.func @transform_5(%arg0: i32) -> (i32, i32) {
    %c0_i32 = arith.constant 0 : i32
    %c0_i32_0 = arith.constant 0 : i32
    %c0_i32_1 = arith.constant 0 : i32
    return %c0_i32, %c0_i32_0 : i32, i32
  }
  func.func @transform_6(%arg0: i32) -> (i32, i32) {
    %c0_i32 = arith.constant 0 : i32
    %c0_i32_0 = arith.constant 0 : i32
    %c0_i32_1 = arith.constant 0 : i32
    return %c0_i32, %c0_i32_0 : i32, i32
  }
  func.func @transform_7(%arg0: i32) -> (i32, i32) {
    %c0_i32 = arith.constant 0 : i32
    %c0_i32_0 = arith.constant 0 : i32
    %c0_i32_1 = arith.constant 0 : i32
    return %c0_i32, %c0_i32_0 : i32, i32
  }
  func.func @transform_8(%arg0: i32) -> (i32, i32) {
    %c0_i32 = arith.constant 0 : i32
    %c0_i32_0 = arith.constant 0 : i32
    %c0_i32_1 = arith.constant 0 : i32
    return %c0_i32, %c0_i32_0 : i32, i32
  }
  func.func @transform_9(%arg0: i32) -> (i32, i32) {
    %c0_i32 = arith.constant 0 : i32
    %c0_i32_0 = arith.constant 0 : i32
    %c0_i32_1 = arith.constant 0 : i32
    return %c0_i32, %c0_i32_0 : i32, i32
  }
  func.func @transform_10(%arg0: i32) -> (i32, i32) {
    %c0_i32 = arith.constant 0 : i32
    %c0_i32_0 = arith.constant 0 : i32
    %c0_i32_1 = arith.constant 0 : i32
    return %c0_i32, %c0_i32_0 : i32, i32
  }
  func.func @transform_11(%arg0: i32) -> (i32, i32) {
    %c0_i32 = arith.constant 0 : i32
    %c0_i32_0 = arith.constant 0 : i32
    %c0_i32_1 = arith.constant 0 : i32
    return %c0_i32, %c0_i32_0 : i32, i32
  }
  func.func @transform_12(%arg0: i32) -> (i32, i32) {
    %c0_i32 = arith.constant 0 : i32
    %c0_i32_0 = arith.constant 0 : i32
    %c0_i32_1 = arith.constant 0 : i32
    return %c0_i32, %c0_i32_0 : i32, i32
  }
  func.func @transform_13(%arg0: i32) -> (i32, i32) {
    %c0_i32 = arith.constant 0 : i32
    %c0_i32_0 = arith.constant 0 : i32
    %c0_i32_1 = arith.constant 0 : i32
    return %c0_i32, %c0_i32_0 : i32, i32
  }
}

</mosaic_0001>

<bundles_post_ra>
// kernel: custom-call.20
= control target key start
LH: loop header
LB: loop body
LE: loop exit
PB: predicated region body
PF: predicated region fallthrough
CT: control target
= control target key end

     0   :  { %s6_s0 = inlined_call_operand.vmem [shape: f32[2,64], index: 0, kind: output, shape index: {}]  }

// kernel: custom-call.21
= control target key start
LH: loop header
LB: loop body
LE: loop exit
PB: predicated region body
PF: predicated region fallthrough
CT: control target
= control target key end

     0   :  { %s6_s0 = inlined_call_operand.vmem [shape: f32[2,16], index: 0, kind: output, shape index: {}]  }

// kernel: pointnet2_forward.3
= control target key start
LH: loop header
LB: loop body
LE: loop exit
PB: predicated region body
PF: predicated region fallthrough
CT: control target
= control target key end

     0   :  { %s2306_s29 = smov 0   ;;  %s2703_s0 = inlined_call_operand.vmem [shape: bf16[256,16], index: 0, kind: input, shape index: {}]   ;;  %s2704_s1 = inlined_call_operand.vmem [shape: bf16[512,16], index: 1, kind: input, shape index: {}]   ;;  %s2705_s2 = inlined_call_operand.vmem [shape: bf16[16,16], index: 2, kind: input, shape index: {}]   ;;  %s2706_s3 = inlined_call_operand.vmem [shape: f32[1,16], index: 3, kind: input, shape index: {}]   ;;  %s2707_s4 = inlined_call_operand.vmem [shape: bf16[16,16], index: 4, kind: input, shape index: {}]   ;;  %s2708_s5 = inlined_call_operand.vmem [shape: f32[1,16], index: 5, kind: input, shape index: {}]   ;;  %s2709_s6 = inlined_call_operand.vmem [shape: bf16[16,32], index: 6, kind: input, shape index: {}]   ;;  %s2710_s7 = inlined_call_operand.vmem [shape: f32[1,32], index: 7, kind: input, shape index: {}]   ;;  %s2711_s8 = inlined_call_operand.vmem [shape: bf16[16,16], index: 8, kind: input, shape index: {}]   ;;  %s2712_s9 = inlined_call_operand.vmem [shape: f32[1,16], index: 9, kind: input, shape index: {}]   ;;  %s2713_s10 = inlined_call_operand.vmem [shape: bf16[16,16], index: 10, kind: input, shape index: {}]   ;;  %s2714_s11 = inlined_call_operand.vmem [shape: f32[1,16], index: 11, kind: input, shape index: {}]   ;;  %s2715_s12 = inlined_call_operand.vmem [shape: bf16[16,32], index: 12, kind: input, shape index: {}]   ;;  %s2716_s13 = inlined_call_operand.vmem [shape: f32[1,32], index: 13, kind: input, shape index: {}]   ;;  %s2717_s14 = inlined_call_operand.vmem [shape: bf16[32,64], index: 14, kind: output, shape index: {}]  }
   0x1 LB: > { %s2312_s30 = sadd.s32 4294967295, %s2228_s29   ;;  %p1968_p0 = scmp.ge.s32.totalorder %s2228_s29, 1  ;;  %s2228_s29 = sphi %s2306_s29, %s24_s29  }
   0x2   : > { %p424_p1 = scmp.lt.s32.totalorder %s2228_s29, 3 }
   0x4   : > { %p425_p2 = pnand %p1968_p0, %p424_p1 }
   0x5   : > { %s1969_s17 = sshll.u32 (!%p425_p2), %s2312_s30, 4  ;;  %s1971_s24 = sshll.u32 (!%p425_p2), %s2312_s30, 5 }
   0x6   : > { %428 = sbr.rel (%p425_p2) target bundleno = 851 (0x353), region = 76  ;;  %p476_p3 = scmp.lt.s32.totalorder (!%p425_p2), %s1969_s17, 31 }
   0x7   : > { %p482_p4 = scmp.lt.s32.totalorder (!%p425_p2), %s1971_s24, 63  ;;  %s2230_s21 = smov (!%p425_p2), 32  }
   0x8   : > { %s1973_s22 = sshll.u32 (!%p425_p2), %s2312_s30, 1 }
   0x9   : > { %p488_p5 = scmp.lt.s32.totalorder (!%p425_p2), %s1973_s22, 3 }
   0xb   : > { %v2177_v0 = vld [vmem:[%s2705_s2] sm:$0xff]  ;;  %s2719_s17 = smov (!%p476_p3, %s1969_s17), 31  ;;  %vm562_vm0 = vcmask 130048   ;;  %s2721_s24 = smov (!%p482_p4, %s1971_s24), 63  ;;  %vm870_vm1 = vcmask 261120   ;;  %vm1830_vm2 = vcmask 1041409  }
   0xc   : > { %v2196_v1 = vld [vmem:[%s2711_s8] sm:$0xff]  ;;  %594 = vmatpush.bf16.msra.mxu2 %v2177_v0  ;;  %2199 = vmatpush.bf16.msra.mxu3 %v2177_v0  ;;  %s1970_s20 = sshll.u32 %s2719_s17, 2  ;;  %s1972_s25 = sshll.u32 %s2721_s24, 2  ;;  %vm1832_vm3 = vcmask 1042434   ;;  %vm1834_vm4 = vcmask 1043459   ;;  %vm1836_vm5 = vcmask 1044484  }
   0xd   : > { %s479_s23 = scalar_lea.vmem %s2703_s0, %s1970_s20  ;;  %s2334_s28 = scalar_lea.vmem %s2704_s1, %s1972_s25  ;;  %v2178_v16 = vld [vmem:[%s2707_s4] sm:$0xff]  ;;  %vm1838_vm6 = vcmask 1045509   ;;  %vm1840_vm7 = vcmask 1046534   ;;  %vm1842_vm8 = vcmask 1047559   ;;  %vm1893_vm9 = vcmask 519168  }
   0xe   : > { %v2169_v2 = vld [vmem:[%s479_s23] sm:$0xff]  ;;  %v2175_v3 = vld [vmem:[%s479_s23 + $0x30] sm:$0xff]  ;;  %v2170_v4 = vld [vmem:[%s479_s23 + $0x8] sm:$0xff]  ;;  %703 = vmatpush.bf16.msra.mxu0 %v2178_v16  ;;  %2200 = vmatpush.bf16.msra.mxu1 %v2178_v16  ;;  %s2723_s22 = smov (!%p488_p5, %s1973_s22), 3 }
   0xf   : > { %2011 = vmatmul.msk.bf16.vlgmr.msra.gmra.mxu2 %vm562_vm0, %v2169_v2  ;;  %2017 = vmatmul.msk.bf16.vlgmr.msra.gmra.mxu3 %vm562_vm0, %v2175_v3  ;;  %v2176_v5 = vld [vmem:[%s479_s23 + $0x38] sm:$0xff]  ;;  %v2171_v6 = vld [vmem:[%s479_s23 + $0x10] sm:$0xff]  ;;  %v2180_v7 = vld [vmem:[%s2334_s28] sm:$0xff]  ;;  %s1974_s30 = sshll.u32 %s2723_s22, 2 }
  0x10   : > { %1162 = vmatpush.bf16.msrb.mxu3 %v2196_v1  ;;  %v2172_v8 = vld [vmem:[%s479_s23 + $0x18] sm:$0xff]  ;;  %v2181_v9 = vld [vmem:[%s2334_s28 + $0x8] sm:$0xff]  ;;  %v2173_v10 = vld [vmem:[%s479_s23 + $0x20] sm:$0xff]  ;;  %2201 = vmatpush.bf16.msrb.mxu2 %v2178_v16  ;;  %s491_s25 = scalar_lea.vmem %s2717_s14, %s1974_s30 }
  0x11   : > { %v2182_v11 = vld [vmem:[%s2334_s28 + $0x10] sm:$0xff]  ;;  %v2174_v12 = vld [vmem:[%s479_s23 + $0x28] sm:$0xff]  ;;  %v2183_v13 = vld [vmem:[%s2334_s28 + $0x18] sm:$0xff] }
  0x12   : > { %v2184_v14 = vld [vmem:[%s2334_s28 + $0x20] sm:$0xff]  ;;  %v2185_v15 = vld [vmem:[%s2334_s28 + $0x28] sm:$0xff]  ;;  %v2186_v18 = vld [vmem:[%s2334_s28 + $0x30] sm:$0xff] }
  0x13   : > { %v2197_v17 = vld [vmem:[%s2713_s10] sm:$0xff]  ;;  %v2187_v28 = vld [vmem:[%s2334_s28 + $0x38] sm:$0xff]  ;;  %v2189_v60 = vld [vmem:[%s2334_s28 + $0x48] sm:$0xff] }
  0x14   : > { %1359 = vmatpush.bf16.msrb.mxu0 %v2197_v17  ;;  %v2363_v21 = vld [vmem:[%s2706_s3] ss:$0 sm:$0xff] }
  0x15   : > { %v2188_v43 = vld [vmem:[%s2334_s28 + $0x40] sm:$0xff] }
  0x16   : > { %v2386_v52 = vld [vmem:[%s2712_s9] ss:$0 sm:$0xff] }
  0x1f   : > { %2012 = vmatmul.msk.bf16.gmra.mxu2 %vm562_vm0, %v2170_v4  ;;  %2018 = vmatmul.msk.bf16.gmra.mxu3 %vm562_vm0, %v2176_v5 }
  0x2f   : > { %2013 = vmatmul.msk.bf16.gmra.mxu2 %vm562_vm0, %v2171_v6  ;;  %2111 = vmatmul.msk.bf16.vlgmr.msrb.gmra.mxu3 %vm562_vm0, %v2180_v7 }
  0x3f   : > { %2014 = vmatmul.msk.bf16.gmra.mxu2 %vm562_vm0, %v2172_v8  ;;  %2112 = vmatmul.msk.bf16.gmra.mxu3 %vm562_vm0, %v2181_v9 }
  0x4f   : > { %2015 = vmatmul.msk.bf16.gmra.mxu2 %vm562_vm0, %v2173_v10  ;;  %2113 = vmatmul.msk.bf16.gmra.mxu3 %vm562_vm0, %v2182_v11  ;;  %v2190_v11 = vld [vmem:[%s2334_s28 + $0x50] sm:$0xff] }
  0x5f   : > { %2016 = vmatmul.msk.bf16.gmra.mxu2 %vm562_vm0, %v2174_v12  ;;  %2114 = vmatmul.msk.bf16.gmra.mxu3 %vm562_vm0, %v2183_v13 }
  0x6f   : > { %2115 = vmatmul.msk.bf16.gmra.mxu3 %vm562_vm0, %v2184_v14 }
  0x7f   : > { %2116 = vmatmul.msk.bf16.gmra.mxu3 %vm562_vm0, %v2185_v15 }
  0x8f   : > { %2117 = vmatmul.msk.bf16.gmra.mxu3 %vm562_vm0, %v2186_v18 }
  0x92   : > { %v596_v19 = vpop.f32.mrf.mxu2  ;;  %v626_v20 = vpop.f32.mrf.mxu3 }
  0x93   : > { %v597_v22 = vadd.f32 %v2363_v21, %v596_v19  ;;  %v627_v23 = vadd.f32 %v2363_v21, %v626_v20 }
  0x95   : > { %v636_v29 = vmax.f32 %v597_v22, 0.0  ;;  %v648_v30 = vmax.f32 %v627_v23, 0.0 }
  0x9a   : > { %v598_v24 = vpop.f32.mrf.mxu2  ;;  %v628_v25 = vpop.f32.mrf.mxu3 }
  0x9b   : > { %v599_v26 = vadd.f32 %v2363_v21, %v598_v24  ;;  %v629_v27 = vadd.f32 %v2363_v21, %v628_v25 }
  0x9d   : > { %v637_v31 = vmax.f32 %v599_v26, 0.0  ;;  %v649_v32 = vmax.f32 %v629_v27, 0.0  ;;  %v2191_v27 = vld [vmem:[%s2334_s28 + $0x58] sm:$0xff] }
  0x9f   : > { %2118 = vmatmul.msk.bf16.gmra.mxu3 %vm562_vm0, %v2187_v28  ;;  %v652_v33 = vpack.c.bf16 %v637_v31, %v636_v29  ;;  %v2371_v34 = vpack.c.bf16 %v649_v32, %v648_v30 }
  0xa1   : > { %2023 = vmatmul.msk.bf16.vlgmr.msra.gmra.mxu0 %vm562_vm0, %v652_v33 }
  0xa2   : > { %v601_v35 = vpop.f32.mrf.mxu2  ;;  %v631_v36 = vpop.f32.mrf.mxu3 }
  0xa3   : > { %v602_v37 = vadd.f32 %v2363_v21, %v601_v35  ;;  %v632_v38 = vadd.f32 %v2363_v21, %v631_v36 }
  0xa5   : > { %v638_v44 = vmax.f32 %v602_v37, 0.0  ;;  %v650_v45 = vmax.f32 %v632_v38, 0.0 }
  0xaa   : > { %v603_v39 = vpop.f32.mrf.mxu2  ;;  %v633_v40 = vpop.f32.mrf.mxu3 }
  0xab   : > { %v604_v41 = vadd.f32 %v2363_v21, %v603_v39  ;;  %v634_v42 = vadd.f32 %v2363_v21, %v633_v40 }
  0xad   : > { %v639_v46 = vmax.f32 %v604_v41, 0.0  ;;  %v651_v47 = vmax.f32 %v634_v42, 0.0 }
  0xaf   : > { %2119 = vmatmul.msk.bf16.gmra.mxu3 %vm562_vm0, %v2188_v43  ;;  %v653_v48 = vpack.c.bf16 %v639_v46, %v638_v44  ;;  %v2380_v49 = vpack.c.bf16 %v651_v47, %v650_v45  ;;  %v2192_v43 = vld [vmem:[%s2334_s28 + $0x60] sm:$0xff] }
  0xb1   : > { %2024 = vmatmul.msk.bf16.gmra.mxu0 %vm562_vm0, %v653_v48 }
  0xb2   : > { %v606_v50 = vpop.f32.mrf.mxu2  ;;  %v1164_v51 = vpop.f32.mrf.mxu3 }
  0xb3   : > { %v607_v53 = vadd.f32 %v2363_v21, %v606_v50  ;;  %v1165_v54 = vadd.f32 %v2386_v52, %v1164_v51 }
  0xb5   : > { %v640_v57 = vmax.f32 %v607_v53, 0.0  ;;  %v1244_v61 = vmax.f32 %v1165_v54, 0.0  ;;  %v2193_v54 = vld [vmem:[%s2334_s28 + $0x68] sm:$0xff] }
  0xba   : > { %v608_v55 = vpop.f32.mrf.mxu2  ;;  %v1166_v56 = vpop.f32.mrf.mxu3 }
  0xbb   : > { %v609_v58 = vadd.f32 %v2363_v21, %v608_v55  ;;  %v1167_v59 = vadd.f32 %v2386_v52, %v1166_v56 }
  0xbd   : > { %v641_v62 = vmax.f32 %v609_v58, 0.0  ;;  %v1245_v63 = vmax.f32 %v1167_v59, 0.0  ;;  %v2179_v59 = vld [vmem:[%s2709_s6] sm:$0xff] }
  0xbe   : > { %812 = vmatpush.bf16.msra.mxu2 %v2179_v59 }
  0xbf   : > { %v1276_v0 = vpack.c.bf16 %v1245_v63, %v1244_v61  ;;  %2120 = vmatmul.msk.bf16.gmra.mxu3 %vm562_vm0, %v2189_v60  ;;  %v654_v1 = vpack.c.bf16 %v641_v62, %v640_v57  ;;  %v2194_v63 = vld [vmem:[%s2334_s28 + $0x70] sm:$0xff] }
  0xc1   : > { %2025 = vmatmul.msk.bf16.vlgmr.msra.gmra.mxu1 %vm562_vm0, %v654_v1  ;;  %2131 = vmatmul.msk.bf16.vlgmr.msrb.gmra.mxu0 %vm562_vm0, %v1276_v0 }
  0xc2   : > { %v611_v2 = vpop.f32.mrf.mxu2  ;;  %v1169_v3 = vpop.f32.mrf.mxu3 }
  0xc3   : > { %v612_v4 = vadd.f32 %v2363_v21, %v611_v2  ;;  %v1170_v5 = vadd.f32 %v2386_v52, %v1169_v3 }
  0xc5   : > { %v642_v8 = vmax.f32 %v612_v4, 0.0  ;;  %v1246_v12 = vmax.f32 %v1170_v5, 0.0 }
  0xca   : > { %v613_v6 = vpop.f32.mrf.mxu2  ;;  %v1171_v7 = vpop.f32.mrf.mxu3 }
  0xcb   : > { %v614_v9 = vadd.f32 %v2363_v21, %v613_v6  ;;  %v1172_v10 = vadd.f32 %v2386_v52, %v1171_v7  ;;  %v2195_v7 = vld [vmem:[%s2334_s28 + $0x78] sm:$0xff] }
  0xcd   : > { %v643_v13 = vmax.f32 %v614_v9, 0.0  ;;  %v1247_v14 = vmax.f32 %v1172_v10, 0.0 }
  0xcf   : > { %2121 = vmatmul.msk.bf16.gmra.mxu3 %vm562_vm0, %v2190_v11  ;;  %v655_v15 = vpack.c.bf16 %v643_v13, %v642_v8  ;;  %v1277_v16 = vpack.c.bf16 %v1247_v14, %v1246_v12 }
  0xd1   : > { %2026 = vmatmul.msk.bf16.gmra.mxu1 %vm562_vm0, %v655_v15  ;;  %2132 = vmatmul.msk.bf16.gmra.mxu0 %vm562_vm0, %v1277_v16 }
  0xd2   : > { %v616_v17 = vpop.f32.mrf.mxu2  ;;  %v1174_v18 = vpop.f32.mrf.mxu3 }
  0xd3   : > { %v617_v19 = vadd.f32 %v2363_v21, %v616_v17  ;;  %v1175_v20 = vadd.f32 %v2386_v52, %v1174_v18 }
  0xd5   : > { %v644_v24 = vmax.f32 %v617_v19, 0.0  ;;  %v1248_v28 = vmax.f32 %v1175_v20, 0.0 }
  0xda   : > { %v618_v22 = vpop.f32.mrf.mxu2  ;;  %v1176_v23 = vpop.f32.mrf.mxu3 }
  0xdb   : > { %v619_v25 = vadd.f32 %v2363_v21, %v618_v22  ;;  %v1177_v26 = vadd.f32 %v2386_v52, %v1176_v23 }
  0xdd   : > { %v645_v29 = vmax.f32 %v619_v25, 0.0  ;;  %v1249_v30 = vmax.f32 %v1177_v26, 0.0 }
  0xdf   : > { %v656_v31 = vpack.c.bf16 %v645_v29, %v644_v24  ;;  %2122 = vmatmul.msk.bf16.gmra.mxu3 %vm562_vm0, %v2191_v27  ;;  %v1278_v32 = vpack.c.bf16 %v1249_v30, %v1248_v28 }
  0xe1   : > { %2027 = vmatmul.msk.bf16.vlgmr.msrb.gmra.mxu2 %vm562_vm0, %v656_v31  ;;  %2133 = vmatmul.msk.bf16.gmra.mxu0 %vm562_vm0, %v1278_v32 }
  0xe2   : > { %v621_v33 = vpop.f32.mrf.mxu2  ;;  %v1179_v35 = vpop.f32.mrf.mxu3 }
  0xe3   : > { %v622_v36 = vadd.f32 %v2363_v21, %v621_v33  ;;  %v1180_v37 = vadd.f32 %v2386_v52, %v1179_v35 }
  0xe5   : > { %v646_v40 = vmax.f32 %v622_v36, 0.0  ;;  %v1250_v44 = vmax.f32 %v1180_v37, 0.0 }
  0xea   : > { %v623_v38 = vpop.f32.mrf.mxu2  ;;  %v1181_v39 = vpop.f32.mrf.mxu3 }
  0xeb   : > { %v624_v41 = vadd.f32 %v2363_v21, %v623_v38  ;;  %v1182_v42 = vadd.f32 %v2386_v52, %v1181_v39 }
  0xed   : > { %v647_v45 = vmax.f32 %v624_v41, 0.0  ;;  %v1251_v46 = vmax.f32 %v1182_v42, 0.0 }
  0xef   : > { %2123 = vmatmul.msk.bf16.gmra.mxu3 %vm562_vm0, %v2192_v43  ;;  %v657_v47 = vpack.c.bf16 %v647_v45, %v646_v40  ;;  %v1279_v48 = vpack.c.bf16 %v1251_v46, %v1250_v44  ;;  %v2464_v43 = vld [vmem:[%s2714_s11] ss:$0 sm:$0xff] }
  0xf1   : > { %2028 = vmatmul.msk.bf16.gmra.mxu2 %vm562_vm0, %v657_v47  ;;  %2134 = vmatmul.msk.bf16.gmra.mxu0 %vm562_vm0, %v1279_v48 }
  0xf2   : > { %v1184_v50 = vpop.f32.mrf.mxu3 }
  0xf3   : > { %v1185_v51 = vadd.f32 %v2386_v52, %v1184_v50 }
  0xf5   : > { %v1252_v55 = vmax.f32 %v1185_v51, 0.0 }
  0xfa   : > { %v1186_v53 = vpop.f32.mrf.mxu3 }
  0xfb   : > { %v1187_v21 = vadd.f32 %v2386_v52, %v1186_v53 }
  0xfd   : > { %v1253_v56 = vmax.f32 %v1187_v21, 0.0 }
  0xff   : > { %v1280_v57 = vpack.c.bf16 %v1253_v56, %v1252_v55  ;;  %2124 = vmatmul.msk.bf16.gmra.mxu3 %vm562_vm0, %v2193_v54 }
 0x101   : > { %2029 = vmatmul.msk.bf16.gmra.mxu2 %vm562_vm0, %v2371_v34  ;;  %2135 = vmatmul.msk.bf16.gmra.mxu0 %vm562_vm0, %v1280_v57  ;;  %v2198_v34 = vld [vmem:[%s2715_s12] sm:$0xff] }
 0x102   : > { %v1189_v58 = vpop.f32.mrf.mxu3  ;;  %1556 = vmatpush.bf16.msrb.mxu1 %v2198_v34 }
 0x103   : > { %v1190_v60 = vadd.f32 %v2386_v52, %v1189_v58 }
 0x105   : > { %v1254_v0 = vmax.f32 %v1190_v60, 0.0 }
 0x10a   : > { %v1191_v61 = vpop.f32.mrf.mxu3 }
 0x10b   : > { %v1192_v62 = vadd.f32 %v2386_v52, %v1191_v61 }
 0x10d   : > { %v1255_v1 = vmax.f32 %v1192_v62, 0.0 }
 0x10f   : > { %v1281_v2 = vpack.c.bf16 %v1255_v1, %v1254_v0  ;;  %2125 = vmatmul.msk.bf16.gmra.mxu3 %vm562_vm0, %v2194_v63 }
 0x111   : > { %2030 = vmatmul.msk.bf16.gmra.mxu2 %vm562_vm0, %v2380_v49  ;;  %2136 = vmatmul.msk.bf16.gmra.mxu0 %vm562_vm0, %v1281_v2  ;;  %v2447_v49 = vld [vmem:[%s2708_s5] ss:$0 sm:$0xff] }
 0x112   : > { %v1194_v3 = vpop.f32.mrf.mxu3 }
 0x113   : > { %v1195_v4 = vadd.f32 %v2386_v52, %v1194_v3 }
 0x115   : > { %v1256_v8 = vmax.f32 %v1195_v4, 0.0 }
 0x11a   : > { %v1196_v5 = vpop.f32.mrf.mxu3 }
 0x11b   : > { %v1197_v6 = vadd.f32 %v2386_v52, %v1196_v5 }
 0x11d   : > { %v1257_v9 = vmax.f32 %v1197_v6, 0.0 }
 0x11e   : > { %v705_v10 = vpop.f32.mrf.mxu0 }
 0x11f   : > { %v1282_v11 = vpack.c.bf16 %v1257_v9, %v1256_v8  ;;  %2126 = vmatmul.msk.bf16.gmra.mxu3 %vm562_vm0, %v2195_v7  ;;  %v706_v13 = vadd.f32 %v2447_v49, %v705_v10 }
 0x121   : > { %2137 = vmatmul.msk.bf16.gmra.mxu0 %vm562_vm0, %v1282_v11  ;;  %v745_v16 = vmax.f32 %v706_v13, 0.0 }
 0x122   : > { %v1199_v12 = vpop.f32.mrf.mxu3 }
 0x123   : > { %v1200_v17 = vadd.f32 %v2386_v52, %v1199_v12 }
 0x125   : > { %v1258_v23 = vmax.f32 %v1200_v17, 0.0 }
 0x126   : > { %v707_v14 = vpop.f32.mrf.mxu0 }
 0x127   : > { %v708_v15 = vadd.f32 %v2447_v49, %v707_v14 }
 0x129   : > { %v746_v18 = vmax.f32 %v708_v15, 0.0 }
 0x12a   : > { %v1201_v19 = vpop.f32.mrf.mxu3 }
 0x12b   : > { %v761_v20 = vpack.c.bf16 %v746_v18, %v745_v16  ;;  %v1202_v22 = vadd.f32 %v2386_v52, %v1201_v19 }
 0x12d   : > { %v1259_v24 = vmax.f32 %v1202_v22, 0.0  ;;  %2035 = vmatmul.msk.bf16.vlgmr.msra.gmra.mxu2 %vm562_vm0, %v761_v20 }
 0x12e   : > { %v710_v25 = vpop.f32.mrf.mxu0 }
 0x12f   : > { %v1283_v26 = vpack.c.bf16 %v1259_v24, %v1258_v23  ;;  %v711_v28 = vadd.f32 %v2447_v49, %v710_v25 }
 0x131   : > { %2138 = vmatmul.msk.bf16.gmra.mxu0 %vm562_vm0, %v1283_v26  ;;  %v747_v31 = vmax.f32 %v711_v28, 0.0 }
 0x132   : > { %v1204_v27 = vpop.f32.mrf.mxu3 }
 0x133   : > { %v1205_v32 = vadd.f32 %v2386_v52, %v1204_v27 }
 0x135   : > { %v1260_v38 = vmax.f32 %v1205_v32, 0.0 }
 0x136   : > { %v712_v29 = vpop.f32.mrf.mxu0 }
 0x137   : > { %v713_v30 = vadd.f32 %v2447_v49, %v712_v29 }
 0x139   : > { %v748_v33 = vmax.f32 %v713_v30, 0.0 }
 0x13a   : > { %v1206_v35 = vpop.f32.mrf.mxu3 }
 0x13b   : > { %v1207_v36 = vadd.f32 %v2386_v52, %v1206_v35  ;;  %v762_v37 = vpack.c.bf16 %v748_v33, %v747_v31 }
 0x13d   : > { %v1261_v39 = vmax.f32 %v1207_v36, 0.0  ;;  %2036 = vmatmul.msk.bf16.gmra.mxu2 %vm562_vm0, %v762_v37 }
 0x13e   : > { %v715_v40 = vpop.f32.mrf.mxu1  ;;  %v1361_v41 = vpop.f32.mrf.mxu0 }
 0x13f   : > { %v1284_v42 = vpack.c.bf16 %v1261_v39, %v1260_v38  ;;  %v716_v45 = vadd.f32 %v2447_v49, %v715_v40  ;;  %v1362_v46 = vadd.f32 %v2464_v43, %v1361_v41 }
 0x141   : > { %2139 = vmatmul.msk.bf16.gmra.mxu0 %vm562_vm0, %v1284_v42  ;;  %v749_v50 = vmax.f32 %v716_v45, 0.0  ;;  %v1441_v21 = vmax.f32 %v1362_v46, 0.0 }
 0x142   : > { %v1209_v44 = vpop.f32.mrf.mxu3 }
 0x143   : > { %v1210_v54 = vadd.f32 %v2386_v52, %v1209_v44 }
 0x145   : > { %v1262_v61 = vmax.f32 %v1210_v54, 0.0 }
 0x146   : > { %v717_v47 = vpop.f32.mrf.mxu1  ;;  %v1363_v48 = vpop.f32.mrf.mxu0 }
 0x147   : > { %v718_v51 = vadd.f32 %v2447_v49, %v717_v47  ;;  %v1364_v53 = vadd.f32 %v2464_v43, %v1363_v48 }
 0x149   : > { %v750_v55 = vmax.f32 %v718_v51, 0.0  ;;  %v1442_v56 = vmax.f32 %v1364_v53, 0.0 }
 0x14a   : > { %v1211_v57 = vpop.f32.mrf.mxu3 }
 0x14b   : > { %v763_v58 = vpack.c.bf16 %v750_v55, %v749_v50  ;;  %v1473_v59 = vpack.c.bf16 %v1442_v56, %v1441_v21  ;;  %v1212_v60 = vadd.f32 %v2386_v52, %v1211_v57 }
 0x14d   : > { %v1263_v62 = vmax.f32 %v1212_v60, 0.0  ;;  %2037 = vmatmul.msk.bf16.gmra.mxu2 %vm562_vm0, %v763_v58  ;;  %2151 = vmatmul.msk.bf16.vlgmr.msrb.gmra.mxu1 %vm562_vm0, %v1473_v59 }
 0x14e   : > { %v720_v63 = vpop.f32.mrf.mxu1  ;;  %v1366_v0 = vpop.f32.mrf.mxu0 }
 0x14f   : > { %v1285_v1 = vpack.c.bf16 %v1263_v62, %v1262_v61  ;;  %v721_v34 = vadd.f32 %v2447_v49, %v720_v63  ;;  %v1367_v3 = vadd.f32 %v2464_v43, %v1366_v0 }
 0x151   : > { %2140 = vmatmul.msk.bf16.gmra.mxu0 %vm562_vm0, %v1285_v1  ;;  %v751_v6 = vmax.f32 %v721_v34, 0.0  ;;  %v1443_v9 = vmax.f32 %v1367_v3, 0.0 }
 0x152   : > { %v1214_v2 = vpop.f32.mrf.mxu3 }
 0x153   : > { %v1215_v10 = vadd.f32 %v2386_v52, %v1214_v2 }
 0x155   : > { %v1264_v17 = vmax.f32 %v1215_v10, 0.0 }
 0x156   : > { %v722_v4 = vpop.f32.mrf.mxu1  ;;  %v1368_v5 = vpop.f32.mrf.mxu0 }
 0x157   : > { %v723_v7 = vadd.f32 %v2447_v49, %v722_v4  ;;  %v1369_v8 = vadd.f32 %v2464_v43, %v1368_v5 }
 0x159   : > { %v752_v11 = vmax.f32 %v723_v7, 0.0  ;;  %v1444_v12 = vmax.f32 %v1369_v8, 0.0 }
 0x15a   : > { %v1216_v13 = vpop.f32.mrf.mxu3 }
 0x15b   : > { %v764_v14 = vpack.c.bf16 %v752_v11, %v751_v6  ;;  %v1217_v15 = vadd.f32 %v2386_v52, %v1216_v13  ;;  %v1474_v16 = vpack.c.bf16 %v1444_v12, %v1443_v9 }
 0x15d   : > { %v1265_v18 = vmax.f32 %v1217_v15, 0.0  ;;  %2038 = vmatmul.msk.bf16.gmra.mxu2 %vm562_vm0, %v764_v14  ;;  %2152 = vmatmul.msk.bf16.gmra.mxu1 %vm562_vm0, %v1474_v16 }
 0x15e   : > { %v1371_v19 = vpop.f32.mrf.mxu0 }
 0x15f   : > { %v1286_v20 = vpack.c.bf16 %v1265_v18, %v1264_v17  ;;  %v1372_v24 = vadd.f32 %v2464_v43, %v1371_v19 }
 0x161   : > { %2141 = vmatmul.msk.bf16.gmra.mxu0 %vm562_vm0, %v1286_v20  ;;  %v1445_v27 = vmax.f32 %v1372_v24, 0.0 }
 0x162   : > { %v1219_v22 = vpop.f32.mrf.mxu3 }
 0x163   : > { %v1220_v28 = vadd.f32 %v2386_v52, %v1219_v22 }
 0x164   : > { %v725_v23 = vpop.f32.mrf.mxu2 }
 0x165   : > { %v726_v29 = vadd.f32 %v2447_v49, %v725_v23  ;;  %v1266_v36 = vmax.f32 %v1220_v28, 0.0 }
 0x166   : > { %v1373_v25 = vpop.f32.mrf.mxu0 }
 0x167   : > { %v1374_v26 = vadd.f32 %v2464_v43, %v1373_v25  ;;  %v753_v37 = vmax.f32 %v726_v29, 0.0 }
 0x169   : > { %v1446_v30 = vmax.f32 %v1374_v26, 0.0 }
 0x16a   : > { %v1221_v31 = vpop.f32.mrf.mxu3 }
 0x16b   : > { %v1222_v32 = vadd.f32 %v2386_v52, %v1221_v31  ;;  %v1475_v33 = vpack.c.bf16 %v1446_v30, %v1445_v27 }
 0x16c   : > { %v727_v35 = vpop.f32.mrf.mxu2 }
 0x16d   : > { %v1267_v38 = vmax.f32 %v1222_v32, 0.0  ;;  %v728_v39 = vadd.f32 %v2447_v49, %v727_v35  ;;  %2153 = vmatmul.msk.bf16.gmra.mxu1 %vm562_vm0, %v1475_v33 }
 0x16e   : > { %v1376_v40 = vpop.f32.mrf.mxu0 }
 0x16f   : > { %v1287_v41 = vpack.c.bf16 %v1267_v38, %v1266_v36  ;;  %v754_v42 = vmax.f32 %v728_v39, 0.0  ;;  %v1377_v47 = vadd.f32 %v2464_v43, %v1376_v40 }
 0x171   : > { %v765_v44 = vpack.c.bf16 %v754_v42, %v753_v37  ;;  %2142 = vmatmul.msk.bf16.gmra.mxu0 %vm562_vm0, %v1287_v41  ;;  %v1447_v51 = vmax.f32 %v1377_v47, 0.0 }
 0x172   : > { %v1224_v45 = vpop.f32.mrf.mxu3 }
 0x173   : > { %2039 = vmatmul.msk.bf16.gmra.mxu2 %vm562_vm0, %v765_v44  ;;  %v1225_v53 = vadd.f32 %v2386_v52, %v1224_v45 }
 0x174   : > { %v730_v46 = vpop.f32.mrf.mxu2 }
 0x175   : > { %v731_v21 = vadd.f32 %v2447_v49, %v730_v46  ;;  %v1268_v59 = vmax.f32 %v1225_v53, 0.0 }
 0x176   : > { %v1378_v48 = vpop.f32.mrf.mxu0 }
 0x177   : > { %v1379_v50 = vadd.f32 %v2464_v43, %v1378_v48  ;;  %v755_v60 = vmax.f32 %v731_v21, 0.0 }
 0x179   : > { %v1448_v54 = vmax.f32 %v1379_v50, 0.0 }
 0x17a   : > { %v1226_v55 = vpop.f32.mrf.mxu3 }
 0x17b   : > { %v1227_v56 = vadd.f32 %v2386_v52, %v1226_v55  ;;  %v1476_v57 = vpack.c.bf16 %v1448_v54, %v1447_v51 }
 0x17c   : > { %v732_v58 = vpop.f32.mrf.mxu2 }
 0x17d   : > { %v1269_v61 = vmax.f32 %v1227_v56, 0.0  ;;  %v733_v62 = vadd.f32 %v2447_v49, %v732_v58  ;;  %2154 = vmatmul.msk.bf16.gmra.mxu1 %vm562_vm0, %v1476_v57 }
 0x17e   : > { %v1381_v63 = vpop.f32.mrf.mxu0 }
 0x17f   : > { %v1288_v0 = vpack.c.bf16 %v1269_v61, %v1268_v59  ;;  %v756_v1 = vmax.f32 %v733_v62, 0.0  ;;  %v1382_v4 = vadd.f32 %v2464_v43, %v1381_v63  ;;  %v2529_v59 = vld [vmem:[%s2710_s7] ss:$0 sm:$0xff] }
 0x181   : > { %v766_v2 = vpack.c.bf16 %v756_v1, %v755_v60  ;;  %2143 = vmatmul.msk.bf16.gmra.mxu0 %vm562_vm0, %v1288_v0  ;;  %v1449_v7 = vmax.f32 %v1382_v4, 0.0 }
 0x182   : > { %v1229_v34 = vpop.f32.mrf.mxu3 }
 0x183   : > { %2040 = vmatmul.msk.bf16.gmra.mxu2 %vm562_vm0, %v766_v2  ;;  %v1230_v8 = vadd.f32 %v2386_v52, %v1229_v34 }
 0x184   : > { %v735_v3 = vpop.f32.mrf.mxu2 }
 0x185   : > { %v736_v11 = vadd.f32 %v2447_v49, %v735_v3  ;;  %v1270_v15 = vmax.f32 %v1230_v8, 0.0 }
 0x186   : > { %v1383_v5 = vpop.f32.mrf.mxu0 }
 0x187   : > { %v1384_v6 = vadd.f32 %v2464_v43, %v1383_v5  ;;  %v757_v19 = vmax.f32 %v736_v11, 0.0 }
 0x189   : > { %v1450_v9 = vmax.f32 %v1384_v6, 0.0 }
 0x18a   : > { %v1231_v10 = vpop.f32.mrf.mxu3 }
 0x18b   : > { %v1477_v12 = vpack.c.bf16 %v1450_v9, %v1449_v7  ;;  %v1232_v13 = vadd.f32 %v2386_v52, %v1231_v10 }
 0x18c   : > { %v737_v14 = vpop.f32.mrf.mxu2 }
 0x18d   : > { %v1271_v16 = vmax.f32 %v1232_v13, 0.0  ;;  %v738_v17 = vadd.f32 %v2447_v49, %v737_v14  ;;  %2155 = vmatmul.msk.bf16.gmra.mxu1 %vm562_vm0, %v1477_v12 }
 0x18e   : > { %v1386_v18 = vpop.f32.mrf.mxu0 }
 0x18f   : > { %v1289_v20 = vpack.c.bf16 %v1271_v16, %v1270_v15  ;;  %v758_v22 = vmax.f32 %v738_v17, 0.0  ;;  %v1387_v26 = vadd.f32 %v2464_v43, %v1386_v18 }
 0x191   : > { %v767_v23 = vpack.c.bf16 %v758_v22, %v757_v19  ;;  %2144 = vmatmul.msk.bf16.gmra.mxu0 %vm562_vm0, %v1289_v20  ;;  %v1451_v29 = vmax.f32 %v1387_v26, 0.0 }
 0x192   : > { %v1234_v24 = vpop.f32.mrf.mxu3 }
 0x193   : > { %2041 = vmatmul.msk.bf16.gmra.mxu2 %vm562_vm0, %v767_v23  ;;  %v1235_v30 = vadd.f32 %v2386_v52, %v1234_v24 }
 0x194   : > { %v740_v25 = vpop.f32.mrf.mxu2 }
 0x195   : > { %v741_v33 = vadd.f32 %v2447_v49, %v740_v25  ;;  %v1272_v38 = vmax.f32 %v1235_v30, 0.0 }
 0x196   : > { %v1388_v27 = vpop.f32.mrf.mxu0 }
 0x197   : > { %v1389_v28 = vadd.f32 %v2464_v43, %v1388_v27  ;;  %v759_v42 = vmax.f32 %v741_v33, 0.0 }
 0x199   : > { %v1452_v31 = vmax.f32 %v1389_v28, 0.0 }
 0x19a   : > { %v1236_v32 = vpop.f32.mrf.mxu3 }
 0x19b   : > { %v1478_v35 = vpack.c.bf16 %v1452_v31, %v1451_v29  ;;  %v1237_v36 = vadd.f32 %v2386_v52, %v1236_v32 }
 0x19c   : > { %v742_v37 = vpop.f32.mrf.mxu2 }
 0x19d   : > { %v1273_v39 = vmax.f32 %v1237_v36, 0.0  ;;  %v743_v40 = vadd.f32 %v2447_v49, %v742_v37  ;;  %2156 = vmatmul.msk.bf16.gmra.mxu1 %vm562_vm0, %v1478_v35 }
 0x19e   : > { %v1391_v41 = vpop.f32.mrf.mxu0 }
 0x19f   : > { %v1290_v44 = vpack.c.bf16 %v1273_v39, %v1272_v38  ;;  %v760_v45 = vmax.f32 %v743_v40, 0.0  ;;  %v1392_v48 = vadd.f32 %v2464_v43, %v1391_v41 }
 0x1a1   : > { %v768_v46 = vpack.c.bf16 %v760_v45, %v759_v42  ;;  %2145 = vmatmul.msk.bf16.gmra.mxu0 %vm562_vm0, %v1290_v44  ;;  %v1453_v53 = vmax.f32 %v1392_v48, 0.0  ;;  %v2548_v44 = vld [vmem:[%s2716_s13] ss:$0 sm:$0xff] }
 0x1a2   : > { %v1239_v47 = vpop.f32.mrf.mxu3 }
 0x1a3   : > { %2042 = vmatmul.msk.bf16.gmra.mxu2 %vm562_vm0, %v768_v46  ;;  %v1240_v49 = vadd.f32 %v2386_v52, %v1239_v47 }
 0x1a5   : > { %v1274_v57 = vmax.f32 %v1240_v49, 0.0 }
 0x1a6   : > { %v1393_v50 = vpop.f32.mrf.mxu0 }
 0x1a7   : > { %v1394_v51 = vadd.f32 %v2464_v43, %v1393_v50 }
 0x1a9   : > { %v1454_v21 = vmax.f32 %v1394_v51, 0.0 }
 0x1aa   : > { %v1241_v54 = vpop.f32.mrf.mxu3 }
 0x1ab   : > { %v1479_v55 = vpack.c.bf16 %v1454_v21, %v1453_v53  ;;  %v1242_v56 = vadd.f32 %v2386_v52, %v1241_v54 }
 0x1ad   : > { %v1275_v58 = vmax.f32 %v1242_v56, 0.0  ;;  %2157 = vmatmul.msk.bf16.gmra.mxu1 %vm562_vm0, %v1479_v55 }
 0x1ae   : > { %v1396_v60 = vpop.f32.mrf.mxu0 }
 0x1af   : > { %v1291_v61 = vpack.c.bf16 %v1275_v58, %v1274_v57  ;;  %v1397_v52 = vadd.f32 %v2464_v43, %v1396_v60 }
 0x1b0   : > { %v814_v62 = vpop.f32.mrf.mxu2 }
 0x1b1   : > { %v815_v63 = vadd.f32 %v2529_v59, %v814_v62  ;;  %2146 = vmatmul.msk.bf16.gmra.mxu0 %vm562_vm0, %v1291_v61  ;;  %v1455_v6 = vmax.f32 %v1397_v52, 0.0 }
 0x1b3   : > { %v854_v0 = vmax.f32 %v815_v63, 0.0 }
 0x1b5   : > { %v871_v1 = vsel %vm870_vm1, %v854_v0, -inf }
 0x1b6   : > { %v872_v2 = vrot.slane %v871_v1, 4  ;;  %v1398_v34 = vpop.f32.mrf.mxu0 }
 0x1b7   : > { %v1399_v3 = vadd.f32 %v2464_v43, %v1398_v34 }
 0x1b8   : > { %v873_v4 = vmax.f32 %v871_v1, %v872_v2  ;;  %v816_v5 = vpop.f32.mrf.mxu2 }
 0x1b9   : > { %v1456_v7 = vmax.f32 %v1399_v3, 0.0  ;;  %v817_v8 = vadd.f32 %v2529_v59, %v816_v5 }
 0x1ba   : > { %v874_v11 = vrot.slane %v873_v4, 2 }
 0x1bb   : > { %v1480_v9 = vpack.c.bf16 %v1456_v7, %v1455_v6  ;;  %v855_v10 = vmax.f32 %v817_v8, 0.0 }
 0x1bc   : > { %v875_v15 = vmax.f32 %v873_v4, %v874_v11 }
 0x1bd   : > { %v878_v12 = vsel %vm870_vm1, %v855_v10, -inf  ;;  %2158 = vmatmul.msk.bf16.gmra.mxu1 %vm562_vm0, %v1480_v9 }
 0x1be   : > { %v879_v13 = vrot.slane %v878_v12, 4  ;;  %v1401_v14 = vpop.f32.mrf.mxu0  ;;  %v876_v22 = vrot.slane %v875_v15, 1 }
 0x1bf   : > { %v1402_v24 = vadd.f32 %v2464_v43, %v1401_v14 }
 0x1c0   : > { %v880_v16 = vmax.f32 %v878_v12, %v879_v13  ;;  %v819_v17 = vpop.f32.mrf.mxu2  ;;  %v877_v30 = vmax.f32 %v875_v15, %v876_v22 }
 0x1c1   : > { %v820_v18 = vadd.f32 %v2529_v59, %v819_v17  ;;  %v1457_v35 = vmax.f32 %v1402_v24, 0.0 }
 0x1c2   : > { %v881_v19 = vrot.slane %v880_v16, 2 }
 0x1c3   : > { %v856_v20 = vmax.f32 %v820_v18, 0.0 }
 0x1c4   : > { %v882_v23 = vmax.f32 %v880_v16, %v881_v19 }
 0x1c5   : > { %v885_v25 = vsel %vm870_vm1, %v856_v20, -inf }
 0x1c6   : > { %v883_v26 = vrot.slane %v882_v23, 1  ;;  %v886_v27 = vrot.slane %v885_v25, 4  ;;  %v1403_v28 = vpop.f32.mrf.mxu0 }
 0x1c7   : > { %v1404_v29 = vadd.f32 %v2464_v43, %v1403_v28 }
 0x1c8   : > { %v884_v31 = vmax.f32 %v882_v23, %v883_v26  ;;  %v887_v32 = vmax.f32 %v885_v25, %v886_v27  ;;  %v821_v33 = vpop.f32.mrf.mxu2 }
 0x1c9   : > { %v1458_v36 = vmax.f32 %v1404_v29, 0.0  ;;  %v822_v37 = vadd.f32 %v2529_v59, %v821_v33 }
 0x1ca   : > { %v1831_v38 = vsel %vm1830_vm2, %v884_v31, %v877_v30  ;;  %v888_v39 = vrot.slane %v887_v32, 2  ;;  %v1558_v40 = vpop.f32.mrf.mxu1 }
 0x1cb   : > { %v1481_v41 = vpack.c.bf16 %v1458_v36, %v1457_v35  ;;  %v857_v42 = vmax.f32 %v822_v37, 0.0  ;;  %v1559_v51 = vadd.f32 %v2548_v44, %v1558_v40 }
 0x1cc   : > { %v889_v45 = vmax.f32 %v887_v32, %v888_v39 }
 0x1cd   : > { %v892_v46 = vsel %vm870_vm1, %v857_v42, -inf  ;;  %2159 = vmatmul.msk.bf16.gmra.mxu1 %vm562_vm0, %v1481_v41  ;;  %v1638_v58 = vmax.f32 %v1559_v51, 0.0 }
 0x1ce   : > { %v890_v47 = vrot.slane %v889_v45, 1  ;;  %v893_v48 = vrot.slane %v892_v46, 4  ;;  %v1406_v50 = vpop.f32.mrf.mxu0 }
 0x1cf   : > { %v1407_v63 = vadd.f32 %v2464_v43, %v1406_v50  ;;  %v1670_v3 = vsel %vm870_vm1, %v1638_v58, -inf }
 0x1d0   : > { %v891_v53 = vmax.f32 %v889_v45, %v890_v47  ;;  %v894_v49 = vmax.f32 %v892_v46, %v893_v48  ;;  %v824_v21 = vpop.f32.mrf.mxu2 }
 0x1d1   : > { %v825_v54 = vadd.f32 %v2529_v59, %v824_v21  ;;  %v1459_v10 = vmax.f32 %v1407_v63, 0.0 }
 0x1d2   : > { %v1833_v55 = vsel %vm1832_vm3, %v891_v53, %v1831_v38  ;;  %v895_v56 = vrot.slane %v894_v49, 2  ;;  %v1560_v57 = vpop.f32.mrf.mxu1 }
 0x1d3   : > { %v858_v60 = vmax.f32 %v825_v54, 0.0  ;;  %v1561_v61 = vadd.f32 %v2548_v44, %v1560_v57 }
 0x1d4   : > { %v896_v62 = vmax.f32 %v894_v49, %v895_v56 }
 0x1d5   : > { %v899_v0 = vsel %vm870_vm1, %v858_v60, -inf  ;;  %v1639_v52 = vmax.f32 %v1561_v61, 0.0 }
 0x1d6   : > { %v897_v1 = vrot.slane %v896_v62, 1  ;;  %v900_v2 = vrot.slane %v899_v0, 4  ;;  %v1408_v34 = vpop.f32.mrf.mxu0 }
 0x1d7   : > { %v1671_v4 = vsel %vm870_vm1, %v1639_v52, -inf  ;;  %v1409_v5 = vadd.f32 %v2464_v43, %v1408_v34 }
 0x1d8   : > { %v898_v6 = vmax.f32 %v896_v62, %v897_v1  ;;  %v901_v7 = vmax.f32 %v899_v0, %v900_v2  ;;  %v1672_v8 = vmax.f32 %v1670_v3, %v1671_v4  ;;  %v826_v9 = vpop.f32.mrf.mxu2 }
 0x1d9   : > { %v1460_v11 = vmax.f32 %v1409_v5, 0.0  ;;  %v827_v12 = vadd.f32 %v2529_v59, %v826_v9 }
 0x1da   : > { %v1835_v13 = vsel %vm1834_vm4, %v898_v6, %v1833_v55  ;;  %v902_v14 = vrot.slane %v901_v7, 2  ;;  %v1563_v15 = vpop.f32.mrf.mxu1  ;;  %v1673_v26 = vrot.slane %v1672_v8, 4 }
 0x1db   : > { %v1482_v16 = vpack.c.bf16 %v1460_v11, %v1459_v10  ;;  %v859_v17 = vmax.f32 %v827_v12, 0.0  ;;  %v1564_v24 = vadd.f32 %v2548_v44, %v1563_v15 }
 0x1dc   : > { %v903_v18 = vmax.f32 %v901_v7, %v902_v14  ;;  %v1674_v37 = vmax.f32 %v1672_v8, %v1673_v26 }
 0x1dd   : > { %v906_v19 = vsel %vm870_vm1, %v859_v17, -inf  ;;  %2160 = vmatmul.msk.bf16.gmra.mxu1 %vm562_vm0, %v1482_v16  ;;  %v1640_v33 = vmax.f32 %v1564_v24, 0.0 }
 0x1de   : > { %v904_v20 = vrot.slane %v903_v18, 1  ;;  %v907_v22 = vrot.slane %v906_v19, 4  ;;  %v1411_v23 = vpop.f32.mrf.mxu0  ;;  %v1675_v51 = vrot.slane %v1674_v37, 2 }
 0x1df   : > { %v1412_v39 = vadd.f32 %v2464_v43, %v1411_v23  ;;  %v1679_v47 = vsel %vm870_vm1, %v1640_v33, -inf }
 0x1e0   : > { %v905_v25 = vmax.f32 %v903_v18, %v904_v20  ;;  %v908_v27 = vmax.f32 %v906_v19, %v907_v22  ;;  %v829_v28 = vpop.f32.mrf.mxu2  ;;  %v1676_v62 = vmax.f32 %v1674_v37, %v1675_v51 }
 0x1e1   : > { %v830_v29 = vadd.f32 %v2529_v59, %v829_v28  ;;  %v1461_v54 = vmax.f32 %v1412_v39, 0.0 }
 0x1e2   : > { %v1837_v30 = vsel %vm1836_vm5, %v905_v25, %v1835_v13  ;;  %v909_v31 = vrot.slane %v908_v27, 2  ;;  %v1565_v32 = vpop.f32.mrf.mxu1  ;;  %v1677_v3 = vrot.slane %v1676_v62, 1 }
 0x1e3   : > { %v860_v35 = vmax.f32 %v830_v29, 0.0  ;;  %v1566_v36 = vadd.f32 %v2548_v44, %v1565_v32 }
 0x1e4   : > { %v910_v38 = vmax.f32 %v908_v27, %v909_v31  ;;  %v1678_v11 = vmax.f32 %v1676_v62, %v1677_v3 }
 0x1e5   : > { %v913_v40 = vsel %vm870_vm1, %v860_v35, -inf  ;;  %v1641_v41 = vmax.f32 %v1566_v36, 0.0 }
 0x1e6   : > { %v911_v42 = vrot.slane %v910_v38, 1  ;;  %v914_v45 = vrot.slane %v913_v40, 4  ;;  %v1413_v46 = vpop.f32.mrf.mxu0 }
 0x1e7   : > { %v1680_v48 = vsel %vm870_vm1, %v1641_v41, -inf  ;;  %v1414_v50 = vadd.f32 %v2464_v43, %v1413_v46 }
 0x1e8   : > { %v912_v53 = vmax.f32 %v910_v38, %v911_v42  ;;  %v915_v49 = vmax.f32 %v913_v40, %v914_v45  ;;  %v1681_v21 = vmax.f32 %v1679_v47, %v1680_v48 }
 0x1e9   : > { %v1462_v55 = vmax.f32 %v1414_v50, 0.0 }
 0x1ea   : > { %v916_v56 = vrot.slane %v915_v49, 2  ;;  %v1682_v57 = vrot.slane %v1681_v21, 4  ;;  %v1568_v58 = vpop.f32.mrf.mxu1  ;;  %v1839_v60 = vsel %vm1838_vm6, %v912_v53, %v1837_v30 }
 0x1eb   : > { %v1483_v61 = vpack.c.bf16 %v1462_v55, %v1461_v54  ;;  %v1569_v34 = vadd.f32 %v2548_v44, %v1568_v58 }
 0x1ec   : > { %v917_v63 = vmax.f32 %v915_v49, %v916_v56  ;;  %v1683_v0 = vmax.f32 %v1681_v21, %v1682_v57 }
 0x1ed   : > { %2161 = vmatmul.msk.bf16.gmra.mxu1 %vm562_vm0, %v1483_v61  ;;  %v1642_v9 = vmax.f32 %v1569_v34, 0.0 }
 0x1ee   : > { %v918_v52 = vrot.slane %v917_v63, 1  ;;  %v1684_v1 = vrot.slane %v1683_v0, 2  ;;  %v1416_v2 = vpop.f32.mrf.mxu0 }
 0x1ef   : > { %v1417_v13 = vadd.f32 %v2464_v43, %v1416_v2  ;;  %v1688_v17 = vsel %vm870_vm1, %v1642_v9, -inf }
 0x1f0   : > { %v919_v4 = vmax.f32 %v917_v63, %v918_v52  ;;  %v1685_v5 = vmax.f32 %v1683_v0, %v1684_v1 }
 0x1f1   : > { %v1463_v22 = vmax.f32 %v1417_v13, 0.0 }
 0x1f2   : > { %v1686_v6 = vrot.slane %v1685_v5, 1  ;;  %v1570_v7 = vpop.f32.mrf.mxu1  ;;  %v2578_v8 = vsel %vm1840_vm7, %v919_v4, %v1839_v60 }
 0x1f3   : > { %v1571_v10 = vadd.f32 %v2548_v44, %v1570_v7 }
 0x1f4   : > { %v1687_v12 = vmax.f32 %v1685_v5, %v1686_v6 }
 0x1f5   : > { %v1643_v14 = vmax.f32 %v1571_v10, 0.0 }
 0x1f6   : > { %v1869_v15 = vsel %vm1830_vm2, %v1687_v12, %v1678_v11  ;;  %v1418_v16 = vpop.f32.mrf.mxu0 }
 0x1f7   : > { %v1689_v18 = vsel %vm870_vm1, %v1643_v14, -inf  ;;  %v1419_v19 = vadd.f32 %v2464_v43, %v1418_v16 }
 0x1f8   : > { %v1690_v20 = vmax.f32 %v1688_v17, %v1689_v18 }
 0x1f9   : > { %v1464_v23 = vmax.f32 %v1419_v19, 0.0 }
 0x1fa   : > { %v1691_v24 = vrot.slane %v1690_v20, 4  ;;  %v1573_v25 = vpop.f32.mrf.mxu1 }
 0x1fb   : > { %v1484_v26 = vpack.c.bf16 %v1464_v23, %v1463_v22  ;;  %v1574_v30 = vadd.f32 %v2548_v44, %v1573_v25 }
 0x1fc   : > { %v1692_v27 = vmax.f32 %v1690_v20, %v1691_v24 }
 0x1fd   : > { %2162 = vmatmul.msk.bf16.gmra.mxu1 %vm562_vm0, %v1484_v26  ;;  %v1644_v35 = vmax.f32 %v1574_v30, 0.0 }
 0x1fe   : > { %v1693_v28 = vrot.slane %v1692_v27, 2  ;;  %v1421_v29 = vpop.f32.mrf.mxu0 }
 0x1ff   : > { %v1422_v38 = vadd.f32 %v2464_v43, %v1421_v29  ;;  %v1697_v42 = vsel %vm870_vm1, %v1644_v35, -inf }
 0x200   : > { %v1694_v31 = vmax.f32 %v1692_v27, %v1693_v28 }
 0x201   : > { %v1465_v48 = vmax.f32 %v1422_v38, 0.0 }
 0x202   : > { %v1695_v32 = vrot.slane %v1694_v31, 1  ;;  %v1575_v33 = vpop.f32.mrf.mxu1 }
 0x203   : > { %v1576_v36 = vadd.f32 %v2548_v44, %v1575_v33 }
 0x204   : > { %v1696_v37 = vmax.f32 %v1694_v31, %v1695_v32 }
 0x205   : > { %v1645_v39 = vmax.f32 %v1576_v36, 0.0 }
 0x206   : > { %v1423_v40 = vpop.f32.mrf.mxu0  ;;  %v1870_v41 = vsel %vm1832_vm3, %v1696_v37, %v1869_v15 }
 0x207   : > { %v1698_v45 = vsel %vm870_vm1, %v1645_v39, -inf  ;;  %v1424_v46 = vadd.f32 %v2464_v43, %v1423_v40 }
 0x208   : > { %v1699_v47 = vmax.f32 %v1697_v42, %v1698_v45 }
 0x209   : > { %v1466_v50 = vmax.f32 %v1424_v46, 0.0 }
 0x20a   : > { %v1700_v51 = vrot.slane %v1699_v47, 4  ;;  %v1578_v53 = vpop.f32.mrf.mxu1 }
 0x20b   : > { %v1485_v49 = vpack.c.bf16 %v1466_v50, %v1465_v48  ;;  %v1579_v56 = vadd.f32 %v2548_v44, %v1578_v53 }
 0x20c   : > { %v1701_v21 = vmax.f32 %v1699_v47, %v1700_v51 }
 0x20d   : > { %2163 = vmatmul.msk.bf16.gmra.mxu1 %vm562_vm0, %v1485_v49  ;;  %v1646_v61 = vmax.f32 %v1579_v56, 0.0 }
 0x20e   : > { %v1702_v54 = vrot.slane %v1701_v21, 2  ;;  %v1426_v55 = vpop.f32.mrf.mxu0 }
 0x20f   : > { %v1427_v0 = vadd.f32 %v2464_v43, %v1426_v55  ;;  %v1706_v34 = vsel %vm870_vm1, %v1646_v61, -inf }
 0x210   : > { %v1703_v57 = vmax.f32 %v1701_v21, %v1702_v54 }
 0x211   : > { %v1467_v6 = vmax.f32 %v1427_v0, 0.0 }
 0x212   : > { %v1704_v58 = vrot.slane %v1703_v57, 1  ;;  %v1580_v60 = vpop.f32.mrf.mxu1 }
 0x213   : > { %v1581_v62 = vadd.f32 %v2548_v44, %v1580_v60 }
 0x214   : > { %v1705_v63 = vmax.f32 %v1703_v57, %v1704_v58 }
 0x215   : > { %v1647_v52 = vmax.f32 %v1581_v62, 0.0 }
 0x216   : > { %v1428_v1 = vpop.f32.mrf.mxu0  ;;  %v1871_v2 = vsel %vm1834_vm4, %v1705_v63, %v1870_v41 }
 0x217   : > { %v1707_v3 = vsel %vm870_vm1, %v1647_v52, -inf  ;;  %v1429_v4 = vadd.f32 %v2464_v43, %v1428_v1 }
 0x218   : > { %v1708_v5 = vmax.f32 %v1706_v34, %v1707_v3 }
 0x219   : > { %v1468_v7 = vmax.f32 %v1429_v4, 0.0 }
 0x21a   : > { %v1709_v9 = vrot.slane %v1708_v5, 4  ;;  %v1583_v10 = vpop.f32.mrf.mxu1 }
 0x21b   : > { %v1486_v11 = vpack.c.bf16 %v1468_v7, %v1467_v6  ;;  %v1584_v15 = vadd.f32 %v2548_v44, %v1583_v10 }
 0x21c   : > { %v1710_v12 = vmax.f32 %v1708_v5, %v1709_v9 }
 0x21d   : > { %2164 = vmatmul.msk.bf16.gmra.mxu1 %vm562_vm0, %v1486_v11  ;;  %v1648_v19 = vmax.f32 %v1584_v15, 0.0 }
 0x21e   : > { %v1711_v13 = vrot.slane %v1710_v12, 2  ;;  %v1431_v14 = vpop.f32.mrf.mxu0 }
 0x21f   : > { %v1432_v23 = vadd.f32 %v2464_v43, %v1431_v14  ;;  %v1715_v27 = vsel %vm870_vm1, %v1648_v19, -inf }
 0x220   : > { %v1712_v16 = vmax.f32 %v1710_v12, %v1711_v13 }
 0x221   : > { %v1469_v31 = vmax.f32 %v1432_v23, 0.0 }
 0x222   : > { %v1713_v17 = vrot.slane %v1712_v16, 1  ;;  %v1585_v18 = vpop.f32.mrf.mxu1 }
 0x223   : > { %v1586_v20 = vadd.f32 %v2548_v44, %v1585_v18 }
 0x224   : > { %v1714_v22 = vmax.f32 %v1712_v16, %v1713_v17 }
 0x225   : > { %v1649_v24 = vmax.f32 %v1586_v20, 0.0 }
 0x226   : > { %v1433_v25 = vpop.f32.mrf.mxu0  ;;  %v1872_v26 = vsel %vm1836_vm5, %v1714_v22, %v1871_v2 }
 0x227   : > { %v1716_v28 = vsel %vm870_vm1, %v1649_v24, -inf  ;;  %v1434_v29 = vadd.f32 %v2464_v43, %v1433_v25 }
 0x228   : > { %v1717_v30 = vmax.f32 %v1715_v27, %v1716_v28 }
 0x229   : > { %v1470_v32 = vmax.f32 %v1434_v29, 0.0 }
 0x22a   : > { %v1718_v33 = vrot.slane %v1717_v30, 4  ;;  %v1588_v35 = vpop.f32.mrf.mxu1 }
 0x22b   : > { %v1487_v36 = vpack.c.bf16 %v1470_v32, %v1469_v31  ;;  %v1589_v40 = vadd.f32 %v2548_v44, %v1588_v35 }
 0x22c   : > { %v1719_v37 = vmax.f32 %v1717_v30, %v1718_v33 }
 0x22d   : > { %2165 = vmatmul.msk.bf16.gmra.mxu1 %vm562_vm0, %v1487_v36  ;;  %v1650_v46 = vmax.f32 %v1589_v40, 0.0 }
 0x22e   : > { %v1720_v38 = vrot.slane %v1719_v37, 2  ;;  %v1436_v39 = vpop.f32.mrf.mxu0 }
 0x22f   : > { %v1437_v50 = vadd.f32 %v2464_v43, %v1436_v39  ;;  %v1724_v21 = vsel %vm870_vm1, %v1650_v46, -inf }
 0x230   : > { %v1721_v41 = vmax.f32 %v1719_v37, %v1720_v38 }
 0x231   : > { %v1471_v57 = vmax.f32 %v1437_v50, 0.0 }
 0x232   : > { %v1722_v42 = vrot.slane %v1721_v41, 1  ;;  %v1590_v45 = vpop.f32.mrf.mxu1 }
 0x233   : > { %v1591_v47 = vadd.f32 %v2548_v44, %v1590_v45 }
 0x234   : > { %v1723_v48 = vmax.f32 %v1721_v41, %v1722_v42 }
 0x235   : > { %v1651_v51 = vmax.f32 %v1591_v47, 0.0 }
 0x236   : > { %v1438_v53 = vpop.f32.mrf.mxu0  ;;  %v1873_v49 = vsel %vm1838_vm6, %v1723_v48, %v1872_v26 }
 0x237   : > { %v1725_v54 = vsel %vm870_vm1, %v1651_v51, -inf  ;;  %v1439_v55 = vadd.f32 %v2464_v43, %v1438_v53 }
 0x238   : > { %v1726_v56 = vmax.f32 %v1724_v21, %v1725_v54 }
 0x239   : > { %v1472_v58 = vmax.f32 %v1439_v55, 0.0 }
 0x23a   : > { %v1727_v60 = vrot.slane %v1726_v56, 4  ;;  %v1593_v61 = vpop.f32.mrf.mxu1 }
 0x23b   : > { %v1488_v62 = vpack.c.bf16 %v1472_v58, %v1471_v57  ;;  %v1594_v52 = vadd.f32 %v2548_v44, %v1593_v61 }
 0x23c   : > { %v1728_v63 = vmax.f32 %v1726_v56, %v1727_v60 }
 0x23d   : > { %2166 = vmatmul.msk.bf16.gmra.mxu1 %vm562_vm0, %v1488_v62  ;;  %v1652_v3 = vmax.f32 %v1594_v52, 0.0 }
 0x23e   : > { %v1729_v0 = vrot.slane %v1728_v63, 2 }
 0x23f   : > { %v1733_v7 = vsel %vm870_vm1, %v1652_v3, -inf }
 0x240   : > { %v1730_v1 = vmax.f32 %v1728_v63, %v1729_v0 }
 0x242   : > { %v1731_v2 = vrot.slane %v1730_v1, 1  ;;  %v1595_v34 = vpop.f32.mrf.mxu1 }
 0x243   : > { %v1596_v4 = vadd.f32 %v2548_v44, %v1595_v34 }
 0x244   : > { %v1732_v5 = vmax.f32 %v1730_v1, %v1731_v2 }
 0x245   : > { %v1653_v43 = vmax.f32 %v1596_v4, 0.0 }
 0x246   : > { %v1874_v6 = vsel %vm1840_vm7, %v1732_v5, %v1873_v49 }
 0x247   : > { %v1734_v9 = vsel %vm870_vm1, %v1653_v43, -inf }
 0x248   : > { %v1735_v10 = vmax.f32 %v1733_v7, %v1734_v9 }
 0x24a   : > { %v1736_v11 = vrot.slane %v1735_v10, 4  ;;  %v1598_v12 = vpop.f32.mrf.mxu1 }
 0x24b   : > { %v1599_v15 = vadd.f32 %v2548_v44, %v1598_v12 }
 0x24c   : > { %v1737_v13 = vmax.f32 %v1735_v10, %v1736_v11 }
 0x24d   : > { %v1654_v19 = vmax.f32 %v1599_v15, 0.0 }
 0x24e   : > { %v1738_v14 = vrot.slane %v1737_v13, 2 }
 0x24f   : > { %v1742_v25 = vsel %vm870_vm1, %v1654_v19, -inf }
 0x250   : > { %v1739_v16 = vmax.f32 %v1737_v13, %v1738_v14 }
 0x252   : > { %v1600_v17 = vpop.f32.mrf.mxu1  ;;  %v1740_v18 = vrot.slane %v1739_v16, 1 }
 0x253   : > { %v1601_v20 = vadd.f32 %v2548_v44, %v1600_v17 }
 0x254   : > { %v1741_v22 = vmax.f32 %v1739_v16, %v1740_v18 }
 0x255   : > { %v1655_v23 = vmax.f32 %v1601_v20, 0.0 }
 0x256   : > { %v2627_v24 = vsel %vm1842_vm8, %v1741_v22, %v1874_v6 }
 0x257   : > { %v1743_v26 = vsel %vm870_vm1, %v1655_v23, -inf }
 0x258   : > { %v1744_v27 = vmax.f32 %v1742_v25, %v1743_v26 }
 0x25a   : > { %v1603_v28 = vpop.f32.mrf.mxu1  ;;  %v1745_v30 = vrot.slane %v1744_v27, 4 }
 0x25b   : > { %v1604_v29 = vadd.f32 %v2548_v44, %v1603_v28 }
 0x25c   : > { %v1746_v35 = vmax.f32 %v1744_v27, %v1745_v30 }
 0x25d   : > { %v1656_v32 = vmax.f32 %v1604_v29, 0.0 }
 0x25e   : > { %v1747_v39 = vrot.slane %v1746_v35, 2 }
 0x25f   : > { %v1751_v37 = vsel %vm870_vm1, %v1656_v32, -inf }
 0x260   : > { %v1748_v45 = vmax.f32 %v1746_v35, %v1747_v39 }
 0x262   : > { %v1605_v31 = vpop.f32.mrf.mxu1  ;;  %v1749_v50 = vrot.slane %v1748_v45, 1 }
 0x263   : > { %v1606_v33 = vadd.f32 %v2548_v44, %v1605_v31 }
 0x264   : > { %v1750_v55 = vmax.f32 %v1748_v45, %v1749_v50 }
 0x265   : > { %v1657_v36 = vmax.f32 %v1606_v33, 0.0 }
 0x267   : > { %v1752_v38 = vsel %vm870_vm1, %v1657_v36, -inf }
 0x268   : > { %v1753_v40 = vmax.f32 %v1751_v37, %v1752_v38 }
 0x26a   : > { %v1754_v41 = vrot.slane %v1753_v40, 4  ;;  %v1608_v42 = vpop.f32.mrf.mxu1 }
 0x26b   : > { %v1609_v48 = vadd.f32 %v2548_v44, %v1608_v42 }
 0x26c   : > { %v1755_v46 = vmax.f32 %v1753_v40, %v1754_v41 }
 0x26d   : > { %v1658_v21 = vmax.f32 %v1609_v48, 0.0 }
 0x26e   : > { %v1756_v47 = vrot.slane %v1755_v46, 2 }
 0x26f   : > { %v1760_v60 = vsel %vm870_vm1, %v1658_v21, -inf }
 0x270   : > { %v1757_v51 = vmax.f32 %v1755_v46, %v1756_v47 }
 0x272   : > { %v1758_v53 = vrot.slane %v1757_v51, 1  ;;  %v1610_v49 = vpop.f32.mrf.mxu1 }
 0x273   : > { %v1611_v54 = vadd.f32 %v2548_v44, %v1610_v49 }
 0x274   : > { %v1759_v56 = vmax.f32 %v1757_v51, %v1758_v53 }
 0x275   : > { %v1659_v57 = vmax.f32 %v1611_v54, 0.0 }
 0x276   : > { %v1876_v58 = vsel %vm1830_vm2, %v1759_v56, %v1750_v55 }
 0x277   : > { %v1761_v61 = vsel %vm870_vm1, %v1659_v57, -inf }
 0x278   : > { %v1762_v62 = vmax.f32 %v1760_v60, %v1761_v61 }
 0x27a   : > { %v1763_v63 = vrot.slane %v1762_v62, 4  ;;  %v1613_v0 = vpop.f32.mrf.mxu1 }
 0x27b   : > { %v1614_v2 = vadd.f32 %v2548_v44, %v1613_v0 }
 0x27c   : > { %v1764_v52 = vmax.f32 %v1762_v62, %v1763_v63 }
 0x27d   : > { %v1660_v5 = vmax.f32 %v1614_v2, 0.0 }
 0x27e   : > { %v1765_v1 = vrot.slane %v1764_v52, 2 }
 0x27f   : > { %v1769_v10 = vsel %vm870_vm1, %v1660_v5, -inf }
 0x280   : > { %v1766_v34 = vmax.f32 %v1764_v52, %v1765_v1 }
 0x282   : > { %v1767_v3 = vrot.slane %v1766_v34, 1  ;;  %v1615_v4 = vpop.f32.mrf.mxu1 }
 0x283   : > { %v1616_v43 = vadd.f32 %v2548_v44, %v1615_v4 }
 0x284   : > { %v1768_v6 = vmax.f32 %v1766_v34, %v1767_v3 }
 0x285   : > { %v1661_v7 = vmax.f32 %v1616_v43, 0.0 }
 0x286   : > { %v1877_v9 = vsel %vm1832_vm3, %v1768_v6, %v1876_v58 }
 0x287   : > { %v1770_v11 = vsel %vm870_vm1, %v1661_v7, -inf }
 0x288   : > { %v1771_v12 = vmax.f32 %v1769_v10, %v1770_v11 }
 0x28a   : > { %v1772_v13 = vrot.slane %v1771_v12, 4  ;;  %v1618_v14 = vpop.f32.mrf.mxu1 }
 0x28b   : > { %v1619_v29 = vadd.f32 %v2548_v44, %v1618_v14 }
 0x28c   : > { %v1773_v15 = vmax.f32 %v1771_v12, %v1772_v13 }
 0x28d   : > { %v1662_v35 = vmax.f32 %v1619_v29, 0.0 }
 0x28e   : > { %v1774_v16 = vrot.slane %v1773_v15, 2 }
 0x28f   : > { %v1778_v45 = vsel %vm870_vm1, %v1662_v35, -inf }
 0x290   : > { %v1775_v17 = vmax.f32 %v1773_v15, %v1774_v16 }
 0x292   : > { %v1776_v18 = vrot.slane %v1775_v17, 1  ;;  %v1620_v19 = vpop.f32.mrf.mxu1 }
 0x293   : > { %v1621_v27 = vadd.f32 %v2548_v44, %v1620_v19 }
 0x294   : > { %v1777_v20 = vmax.f32 %v1775_v17, %v1776_v18 }
 0x295   : > { %v1663_v31 = vmax.f32 %v1621_v27, 0.0  ;;  %v831_v27 = vpop.f32.mrf.mxu2 }
 0x296   : > { %v1878_v22 = vsel %vm1834_vm4, %v1777_v20, %v1877_v9 }
 0x297   : > { %v1779_v39 = vsel %vm870_vm1, %v1663_v31, -inf }
 0x298   : > { %v1780_v46 = vmax.f32 %v1778_v45, %v1779_v39 }
 0x29a   : > { %v1623_v23 = vpop.f32.mrf.mxu1  ;;  %v1781_v21 = vrot.slane %v1780_v46, 4 }
 0x29b   : > { %v1624_v30 = vadd.f32 %v2548_v44, %v1623_v23 }
 0x29c   : > { %v1782_v56 = vmax.f32 %v1780_v46, %v1781_v21  ;;  %v832_v21 = vadd.f32 %v2529_v59, %v831_v27 }
 0x29d   : > { %v1664_v37 = vmax.f32 %v1624_v30, 0.0 }
 0x29e   : > { %v1783_v62 = vrot.slane %v1782_v56, 2 }
 0x29f   : > { %v1787_v47 = vsel %vm870_vm1, %v1664_v37, -inf }
 0x2a0   : > { %v1784_v34 = vmax.f32 %v1782_v56, %v1783_v62 }
 0x2a2   : > { %v1625_v25 = vpop.f32.mrf.mxu1  ;;  %v1785_v9 = vrot.slane %v1784_v34, 1 }
 0x2a3   : > { %v1626_v28 = vadd.f32 %v2548_v44, %v1625_v25 }
 0x2a4   : > { %v1786_v14 = vmax.f32 %v1784_v34, %v1785_v9 }
 0x2a5   : > { %v1665_v33 = vmax.f32 %v1626_v28, 0.0  ;;  %v834_v28 = vpop.f32.mrf.mxu2 }
 0x2a6   : > { %v1879_v18 = vsel %vm1836_vm5, %v1786_v14, %v1878_v22  ;;  %v835_v22 = vadd.f32 %v2529_v59, %v834_v28 }
 0x2a7   : > { %v1788_v41 = vsel %vm870_vm1, %v1665_v33, -inf }
 0x2a8   : > { %v1789_v50 = vmax.f32 %v1787_v47, %v1788_v41 }
 0x2aa   : > { %v1628_v26 = vpop.f32.mrf.mxu1  ;;  %v1790_v54 = vrot.slane %v1789_v50, 4 }
 0x2ab   : > { %v1629_v32 = vadd.f32 %v2548_v44, %v1628_v26 }
 0x2ac   : > { %v1791_v58 = vmax.f32 %v1789_v50, %v1790_v54 }
 0x2ad   : > { %v1666_v40 = vmax.f32 %v1629_v32, 0.0  ;;  %v836_v29 = vpop.f32.mrf.mxu2 }
 0x2ae   : > { %v1792_v52 = vrot.slane %v1791_v58, 2 }
 0x2af   : > { %v1796_v51 = vsel %vm870_vm1, %v1666_v40, -inf }
 0x2b0   : > { %v1793_v5 = vmax.f32 %v1791_v58, %v1792_v52 }
 0x2b2   : > { %v1630_v36 = vpop.f32.mrf.mxu1  ;;  %v1794_v10 = vrot.slane %v1793_v5, 1 }
 0x2b3   : > { %v1631_v38 = vadd.f32 %v2548_v44, %v1630_v36  ;;  %v837_v36 = vadd.f32 %v2529_v59, %v836_v29 }
 0x2b4   : > { %v1795_v15 = vmax.f32 %v1793_v5, %v1794_v10 }
 0x2b5   : > { %v1667_v42 = vmax.f32 %v1631_v38, 0.0  ;;  %v839_v30 = vpop.f32.mrf.mxu2  ;;  %v862_v38 = vmax.f32 %v835_v22, 0.0  ;;  %v863_v39 = vmax.f32 %v837_v36, 0.0 }
 0x2b6   : > { %v1880_v20 = vsel %vm1838_vm6, %v1795_v15, %v1879_v18  ;;  %v840_v37 = vadd.f32 %v2529_v59, %v839_v30 }
 0x2b7   : > { %v1797_v48 = vsel %vm870_vm1, %v1667_v42, -inf  ;;  %v927_v41 = vsel %vm870_vm1, %v862_v38, -inf  ;;  %v934_v42 = vsel %vm870_vm1, %v863_v39, -inf }
 0x2b8   : > { %v1798_v53 = vmax.f32 %v1796_v51, %v1797_v48  ;;  %v864_v40 = vmax.f32 %v840_v37, 0.0  ;;  %v928_v50 = vrot.slane %v927_v41, 4  ;;  %v935_v51 = vrot.slane %v934_v42, 4 }
 0x2ba   : > { %v1633_v49 = vpop.f32.mrf.mxu1  ;;  %v1799_v55 = vrot.slane %v1798_v53, 4 }
 0x2bb   : > { %v1634_v57 = vadd.f32 %v2548_v44, %v1633_v49 }
 0x2bc   : > { %v1800_v60 = vmax.f32 %v1798_v53, %v1799_v55  ;;  %v941_v53 = vsel %vm870_vm1, %v864_v40, -inf }
 0x2bd   : > { %v1668_v63 = vmax.f32 %v1634_v57, 0.0  ;;  %v841_v31 = vpop.f32.mrf.mxu2  ;;  %v942_v56 = vrot.slane %v941_v53, 4 }
 0x2be   : > { %v1801_v1 = vrot.slane %v1800_v60, 2 }
 0x2bf   : > { %v1805_v3 = vsel %vm870_vm1, %v1668_v63, -inf  ;;  %v861_v63 = vmax.f32 %v832_v21, 0.0 }
 0x2c0   : > { %v1802_v6 = vmax.f32 %v1800_v60, %v1801_v1  ;;  %v929_v60 = vmax.f32 %v927_v41, %v928_v50 }
 0x2c1   : > { %v920_v5 = vsel %vm870_vm1, %v861_v63, -inf }
 0x2c2   : > { %v1635_v61 = vpop.f32.mrf.mxu1  ;;  %v1803_v12 = vrot.slane %v1802_v6, 1 }
 0x2c3   : > { %v1636_v0 = vadd.f32 %v2548_v44, %v1635_v61  ;;  %v936_v61 = vmax.f32 %v934_v42, %v935_v51 }
 0x2c4   : > { %v1804_v16 = vmax.f32 %v1802_v6, %v1803_v12  ;;  %v921_v12 = vrot.slane %v920_v5, 4 }
 0x2c5   : > { %v1669_v2 = vmax.f32 %v1636_v0, 0.0  ;;  %v844_v32 = vpop.f32.mrf.mxu2 }
 0x2c6   : > { %v1881_v23 = vsel %vm1840_vm7, %v1804_v16, %v1880_v20  ;;  %v845_v45 = vadd.f32 %v2529_v59, %v844_v32  ;;  %v922_v20 = vmax.f32 %v920_v5, %v921_v12 }
 0x2c7   : > { %v1806_v4 = vsel %vm870_vm1, %v1669_v2, -inf  ;;  %v943_v2 = vmax.f32 %v941_v53, %v942_v56 }
 0x2c8   : > { %v1807_v43 = vmax.f32 %v1805_v3, %v1806_v4  ;;  %v866_v55 = vmax.f32 %v845_v45, 0.0  ;;  %v930_v3 = vrot.slane %v929_v60, 2  ;;  %v937_v4 = vrot.slane %v936_v61, 2 }
 0x2c9   : > { %v944_v10 = vrot.slane %v943_v2, 2  ;;  %v923_v32 = vrot.slane %v922_v20, 2 }
 0x2ca   : > { %v1808_v7 = vrot.slane %v1807_v43, 4  ;;  %v955_v1 = vsel %vm870_vm1, %v866_v55, -inf  ;;  %v938_v14 = vmax.f32 %v936_v61, %v937_v4 }
 0x2cb   : > { %v945_v18 = vmax.f32 %v943_v2, %v944_v10  ;;  %v924_v40 = vmax.f32 %v922_v20, %v923_v32 }
 0x2cc   : > { %v1809_v11 = vmax.f32 %v1807_v43, %v1808_v7  ;;  %v956_v43 = vrot.slane %v955_v1, 4 }
 0x2cd   : > { %v846_v33 = vpop.f32.mrf.mxu2  ;;  %v946_v30 = vrot.slane %v945_v18, 1  ;;  %v925_v51 = vrot.slane %v924_v40, 1 }
 0x2ce   : > { %v1810_v13 = vrot.slane %v1809_v11, 2  ;;  %v847_v48 = vadd.f32 %v2529_v59, %v846_v33 }
 0x2cf   : > { %v947_v39 = vmax.f32 %v945_v18, %v946_v30  ;;  %v926_v56 = vmax.f32 %v924_v40, %v925_v51 }
 0x2d0   : > { %v1811_v44 = vmax.f32 %v1809_v11, %v1810_v13  ;;  %v867_v58 = vmax.f32 %v847_v48, 0.0  ;;  %v931_v13 = vmax.f32 %v929_v60, %v930_v3 }
 0x2d2   : > { %v1812_v17 = vrot.slane %v1811_v44, 1  ;;  %v962_v34 = vsel %vm870_vm1, %v867_v58, -inf }
 0x2d3   : > { %v963_v9 = vrot.slane %v962_v34, 4 }
 0x2d4   : > { %v1813_v19 = vmax.f32 %v1811_v44, %v1812_v17  ;;  %v957_v44 = vmax.f32 %v955_v1, %v956_v43 }
 0x2d5   : > { %v849_v35 = vpop.f32.mrf.mxu2  ;;  %v964_v17 = vmax.f32 %v962_v34, %v963_v9 }
 0x2d6   : > { %v1882_v25 = vsel %vm1842_vm8, %v1813_v19, %v1881_v23  ;;  %v850_v49 = vadd.f32 %v2529_v59, %v849_v35  ;;  %v932_v23 = vrot.slane %v931_v13, 1  ;;  %v958_v27 = vrot.slane %v957_v44, 2 }
 0x2d7   : > { %v2211_v26 = vpack.i.bf16 %v1882_v25, %v2627_v24  ;;  %v842_v24 = vadd.f32 %v2529_v59, %v841_v31  ;;  %v939_v25 = vrot.slane %v938_v14, 1  ;;  %v965_v29 = vrot.slane %v964_v17, 2 }
 0x2d8   : > { %v868_v62 = vmax.f32 %v850_v49, 0.0  ;;  %v933_v33 = vmax.f32 %v931_v13, %v932_v23  ;;  %v959_v36 = vmax.f32 %v957_v44, %v958_v27 }
 0x2d9   : > { %2212 = vrot.lane.b32.xlu0 %v2211_v26, %s2230_s21  ;;  %v865_v47 = vmax.f32 %v842_v24, 0.0  ;;  %v940_v35 = vmax.f32 %v938_v14, %v939_v25  ;;  %v966_v38 = vmax.f32 %v964_v17, %v965_v29 }
 0x2da   : > { %v960_v45 = vrot.slane %v959_v36, 1 }
 0x2db   : > { %v948_v57 = vsel %vm870_vm1, %v865_v47, -inf  ;;  %v1844_v41 = vsel %vm1830_vm2, %v940_v35, %v933_v33  ;;  %v967_v47 = vrot.slane %v966_v38, 1 }
 0x2dc   : > { %v949_v52 = vrot.slane %v948_v57, 4  ;;  %v1845_v48 = vsel %vm1832_vm3, %v947_v39, %v1844_v41  ;;  %v961_v49 = vmax.f32 %v959_v36, %v960_v45 }
 0x2dd   : > { %v851_v46 = vpop.f32.mrf.mxu2 }
 0x2de   : > { %v852_v54 = vadd.f32 %v2529_v59, %v851_v46  ;;  %v969_v59 = vsel %vm870_vm1, %v868_v62, -inf  ;;  %v950_v7 = vmax.f32 %v948_v57, %v949_v52  ;;  %v1843_v52 = vsel %vm1842_vm8, %v926_v56, %v2578_v8 }
 0x2df   : > { %v970_v11 = vrot.slane %v969_v59, 4 }
 0x2e0   : > { %v869_v0 = vmax.f32 %v852_v54, 0.0  ;;  %v951_v16 = vrot.slane %v950_v7, 2  ;;  %v968_v54 = vmax.f32 %v966_v38, %v967_v47 }
 0x2e1   : > { %v971_v19 = vmax.f32 %v969_v59, %v970_v11 }
 0x2e2   : > { %v976_v6 = vsel %vm870_vm1, %v869_v0, -inf  ;;  %v952_v28 = vmax.f32 %v950_v7, %v951_v16 }
 0x2e3   : > { %v977_v15 = vrot.slane %v976_v6, 4  ;;  %v972_v31 = vrot.slane %v971_v19, 2 }
 0x2e4   : > { %v953_v37 = vrot.slane %v952_v28, 1 }
 0x2e5   : > { %v978_v26 = vmax.f32 %v976_v6, %v977_v15  ;;  %v973_v24 = vmax.f32 %v971_v19, %v972_v31 }
 0x2e6   : > { %v954_v46 = vmax.f32 %v952_v28, %v953_v37 }
 0x2e7   : > { %v979_v22 = vrot.slane %v978_v26, 2  ;;  %v974_v50 = vrot.slane %v973_v24, 1 }
 0x2e8   : > { %v1846_v21 = vsel %vm1834_vm4, %v954_v46, %v1845_v48 }
 0x2e9   : > { %v980_v42 = vmax.f32 %v978_v26, %v979_v22  ;;  %v975_v55 = vmax.f32 %v973_v24, %v974_v50  ;;  %v1847_v58 = vsel %vm1836_vm5, %v961_v49, %v1846_v21 }
 0x2ea   : > { %v1848_v61 = vsel %vm1838_vm6, %v968_v54, %v1847_v58 }
 0x2eb   : > { %v981_v53 = vrot.slane %v980_v42, 1  ;;  %v1849_v0 = vsel %vm1840_vm7, %v975_v55, %v1848_v61 }
 0x2ed   : > { %v982_v57 = vmax.f32 %v980_v42, %v981_v53 }
 0x2ef   : > { %v1850_v1 = vsel %vm1842_vm8, %v982_v57, %v1849_v0 }
 0x34b   : > { %v2213_v60 = vpop.permute.xlu0 %2212 }
 0x34c   : > { %v2215_v62 = vunpack.i.h.bf16 %v2213_v60  ;;  %v2214_v63 = vunpack.i.l.bf16 %v2213_v60 }
 0x34e   : > { %v1889_v2 = vsel %vm870_vm1, %v1843_v52, %v2214_v63  ;;  %v1890_v34 = vsel %vm870_vm1, %v1850_v1, %v2215_v62 }
 0x34f   : > { %v1891_v3 = vpack.c.bf16 %v1889_v2, %v1889_v2  ;;  %v1892_v4 = vpack.c.bf16 %v1890_v34, %v1890_v34 }
 0x351   : > { %1894 = vst.msk [vmem:[%s491_s25] sm:$0xf] %vm1893_vm9, %v1891_v3 }
 0x352   : > { %1895 = vst.msk [vmem:[%s491_s25 + $0x4] sm:$0xf] %vm1893_vm9, %v1892_v4 }
 0x353 PF: > { %s24_s29 = sadd.s32 1, %s2228_s29  }
 0x354   : > { %p21_p6 = scmp.ge.s32.totalorder %s24_s29, 4  }
 0x356   :  { %23 = sbr.rel (!%p21_p6) target bundleno = 1 (0x1), region = 109 }

// kernel: pointnet2_forward.4
= control target key start
LH: loop header
LB: loop body
LE: loop exit
PB: predicated region body
PF: predicated region fallthrough
CT: control target
= control target key end

     0   :  { %s1724_s29 = smov 0   ;;  %s1956_s0 = inlined_call_operand.vmem [shape: bf16[128,80], index: 0, kind: input, shape index: {}]   ;;  %s1957_s1 = inlined_call_operand.vmem [shape: bf16[256,80], index: 1, kind: input, shape index: {}]   ;;  %s1958_s2 = inlined_call_operand.vmem [shape: bf16[80,32], index: 2, kind: input, shape index: {}]   ;;  %s1959_s3 = inlined_call_operand.vmem [shape: f32[1,32], index: 3, kind: input, shape index: {}]   ;;  %s1960_s4 = inlined_call_operand.vmem [shape: bf16[32,32], index: 4, kind: input, shape index: {}]   ;;  %s1961_s5 = inlined_call_operand.vmem [shape: f32[1,32], index: 5, kind: input, shape index: {}]   ;;  %s1962_s6 = inlined_call_operand.vmem [shape: bf16[32,64], index: 6, kind: input, shape index: {}]   ;;  %s1963_s7 = inlined_call_operand.vmem [shape: f32[1,64], index: 7, kind: input, shape index: {}]   ;;  %s1964_s8 = inlined_call_operand.vmem [shape: bf16[80,32], index: 8, kind: input, shape index: {}]   ;;  %s1965_s9 = inlined_call_operand.vmem [shape: f32[1,32], index: 9, kind: input, shape index: {}]   ;;  %s1966_s10 = inlined_call_operand.vmem [shape: bf16[32,32], index: 10, kind: input, shape index: {}]   ;;  %s1967_s11 = inlined_call_operand.vmem [shape: f32[1,32], index: 11, kind: input, shape index: {}]   ;;  %s1968_s12 = inlined_call_operand.vmem [shape: bf16[32,64], index: 12, kind: input, shape index: {}]   ;;  %s1969_s13 = inlined_call_operand.vmem [shape: f32[1,64], index: 13, kind: input, shape index: {}]   ;;  %s1970_s14 = inlined_call_operand.vmem [shape: bf16[16,128], index: 14, kind: output, shape index: {}]  }
   0x1 LB: > { %s1730_s30 = sadd.s32 4294967295, %s1646_s29   ;;  %p1425_p0 = scmp.ge.s32.totalorder %s1646_s29, 1  ;;  %s1646_s29 = sphi %s1724_s29, %s24_s29  }
   0x2   : > { %p424_p1 = scmp.lt.s32.totalorder %s1646_s29, 3 }
   0x4   : > { %p425_p2 = pnand %p1425_p0, %p424_p1 }
   0x5   : > { %s1426_s17 = sshll.u32 (!%p425_p2), %s1730_s30, 3  ;;  %s1648_s18 = smov (!%p425_p2), 64  }
   0x6   : > { %428 = sbr.rel (%p425_p2) target bundleno = 1052 (0x41c), region = 76  ;;  %p475_p3 = scmp.lt.s32.totalorder (!%p425_p2), %s1426_s17, 15 }
   0x7   : > { %p486_p5 = scmp.lt.s32.totalorder (!%p425_p2), %s1730_s30, 1 }
   0xb   : > { %v1597_v0 = vld [vmem:[%s1958_s2 + $0x20] sm:$0xff]  ;;  %v1596_v1 = vld [vmem:[%s1958_s2 + $0x18] sm:$0xff]  ;;  %v1595_v2 = vld [vmem:[%s1958_s2 + $0x10] sm:$0xff]  ;;  %s1972_s17 = smov (!%p475_p3, %s1426_s17), 15  ;;  %vm563_vm0 = vcmask 654336   ;;  %vm637_vm1 = vcmask 261120  }
   0xc   : > { %579 = vmatpush.bf16.msra.mxu0 %v1597_v0  ;;  %v1594_v3 = vld [vmem:[%s1958_s2 + $0x8] sm:$0xff]  ;;  %s1427_s24 = sshll.u32 %s1972_s17, 2  ;;  %v1593_v4 = vld [vmem:[%s1958_s2] sm:$0xff]  ;;  %v1613_v58 = vld [vmem:[%s1964_s8 + $0x18] sm:$0xff]  ;;  %vm760_vm2 = vcmask 523264   ;;  %vm1320_vm3 = vcmask 1041409  }
   0xd   : > { %s478_s15 = scalar_lea.vmem %s1956_s0, %s1427_s24  ;;  %v1599_v7 = vld [vmem:[%s1960_s4 + $0x8] sm:$0xff]  ;;  %v1598_v8 = vld [vmem:[%s1960_s4] sm:$0xff]  ;;  %v1612_v60 = vld [vmem:[%s1964_s8 + $0x10] sm:$0xff]  ;;  %s1428_s24 = sshll.u32 %s1730_s30, 4  ;;  %vm1322_vm4 = vcmask 1042434   ;;  %vm1324_vm5 = vcmask 1043459  }
   0xe   : > { %v1589_v5 = vld [vmem:[%s478_s15] sm:$0xff]  ;;  %v1590_v6 = vld [vmem:[%s478_s15 + $0x8] sm:$0xff]  ;;  %v1591_v9 = vld [vmem:[%s478_s15 + $0x10] sm:$0xff]  ;;  %p481_p4 = scmp.lt.s32.totalorder %s1428_s24, 31  ;;  %vm1326_vm6 = vcmask 1044484   ;;  %vm1328_vm7 = vcmask 1045509  }
   0xf   : > { %v1592_v10 = vld [vmem:[%s478_s15 + $0x18] sm:$0xff]  ;;  %v1634_v12 = vld [vmem:[%s1959_s3] ss:$0 sm:$0xff]  ;;  %v1601_v40 = vld [vmem:[%s1962_s6 + $0x8] sm:$0xff]  ;;  %vm1330_vm8 = vcmask 1046534   ;;  %vm1332_vm9 = vcmask 1047559  }
  0x10   : > { %580 = vmatpush.bf16.msra.mxu0 %v1596_v1  ;;  %1619 = vmatpush.bf16.msra.mxu1 %v1601_v40  ;;  %v1600_v41 = vld [vmem:[%s1962_s6] sm:$0xff]  ;;  %v1611_v61 = vld [vmem:[%s1964_s8 + $0x8] sm:$0xff]  ;;  %s1974_s24 = smov (!%p481_p4, %s1428_s24), 31  ;;  %s1976_s30 = smov (!%p486_p5, %s1730_s30), 1 }
  0x11   : > { %1620 = vmatpush.bf16.msra.mxu2 %v1601_v40  ;;  %1621 = vmatpush.bf16.msra.mxu3 %v1601_v40  ;;  %v1635_v43 = vld [vmem:[%s1961_s5] ss:$0 sm:$0xff]  ;;  %s1429_s25 = sshll.u32 %s1974_s24, 2  ;;  %s1430_s17 = sshll.u32 %s1976_s30, 2 }
  0x12   : > { %v1614_v54 = vld [vmem:[%s1964_s8 + $0x20] sm:$0xff]  ;;  %s1802_s28 = scalar_lea.vmem %s1957_s1, %s1429_s25  ;;  %s489_s21 = scalar_lea.vmem %s1970_s14, %s1430_s17 }
  0x13   : > { %v1610_v0 = vld [vmem:[%s1964_s8] sm:$0xff] }
  0x14   : > { %581 = vmatpush.bf16.msra.mxu0 %v1595_v2  ;;  %1622 = vmatpush.bf16.msra.mxu1 %v1600_v41 }
  0x15   : > { %1623 = vmatpush.bf16.msra.mxu2 %v1600_v41  ;;  %1624 = vmatpush.bf16.msra.mxu3 %v1600_v41 }
  0x18   : > { %582 = vmatpush.bf16.msra.mxu0 %v1594_v3 }
  0x19   : > { %944 = vmatpush.bf16.msrb.mxu3 %v1614_v54 }
  0x1c   : > { %583 = vmatpush.bf16.msra.mxu0 %v1593_v4 }
  0x1d   : > { %945 = vmatpush.bf16.msrb.mxu3 %v1613_v58 }
  0x1f   : > { %1467 = vmatmul.msk.bf16.vlgmr.msra.gmra.mxu0 %vm563_vm0, %v1589_v5 }
  0x20   : > { %656 = vmatpush.bf16.msrb.mxu0 %v1599_v7 }
  0x21   : > { %946 = vmatpush.bf16.msrb.mxu3 %v1612_v60 }
  0x24   : > { %657 = vmatpush.bf16.msrb.mxu0 %v1598_v8 }
  0x25   : > { %947 = vmatpush.bf16.msrb.mxu3 %v1611_v61 }
  0x28   : > { %729 = vmatpush.bf16.msra.mxu0 %v1601_v40 }
  0x29   : > { %948 = vmatpush.bf16.msrb.mxu3 %v1610_v0 }
  0x2c   : > { %730 = vmatpush.bf16.msra.mxu0 %v1600_v41 }
  0x2f   : > { %1468 = vmatmul.msk.bf16.gmra.mxu0 %vm563_vm0, %v1590_v6 }
  0x3f   : > { %1469 = vmatmul.msk.bf16.gmra.mxu0 %vm563_vm0, %v1591_v9 }
  0x4f   : > { %1470 = vmatmul.msk.bf16.gmra.mxu0 %vm563_vm0, %v1592_v10 }
  0x9c   : > { %v585_v11 = vpop.f32.mrf.mxu0 }
  0x9d   : > { %v586_v13 = vadd.f32 %v1634_v12, %v585_v11 }
  0x9f   : > { %v605_v16 = vmax.f32 %v586_v13, 0.0  ;;  %v1603_v13 = vld [vmem:[%s1802_s28 + $0x8] sm:$0xff] }
  0xa4   : > { %v587_v14 = vpop.f32.mrf.mxu0 }
  0xa5   : > { %v588_v15 = vadd.f32 %v1634_v12, %v587_v14  ;;  %v1604_v14 = vld [vmem:[%s1802_s28 + $0x10] sm:$0xff] }
  0xa7   : > { %v606_v17 = vmax.f32 %v588_v15, 0.0  ;;  %v1605_v15 = vld [vmem:[%s1802_s28 + $0x18] sm:$0xff] }
  0xa9   : > { %v613_v18 = vpack.c.bf16 %v606_v17, %v605_v16  ;;  %v1606_v16 = vld [vmem:[%s1802_s28 + $0x20] sm:$0xff] }
  0xab   : > { %1479 = vmatmul.msk.bf16.vlgmr.msrb.gmra.mxu0 %vm637_vm1, %v613_v18 }
  0xac   : > { %v590_v19 = vpop.f32.mrf.mxu0 }
  0xad   : > { %v591_v20 = vadd.f32 %v1634_v12, %v590_v19  ;;  %v1607_v19 = vld [vmem:[%s1802_s28 + $0x28] sm:$0xff] }
  0xaf   : > { %v607_v23 = vmax.f32 %v591_v20, 0.0  ;;  %v1818_v20 = vld [vmem:[%s1963_s7] ss:$0 sm:$0xff] }
  0xb4   : > { %v592_v21 = vpop.f32.mrf.mxu0 }
  0xb5   : > { %v593_v22 = vadd.f32 %v1634_v12, %v592_v21 }
  0xb7   : > { %v608_v24 = vmax.f32 %v593_v22, 0.0 }
  0xb9   : > { %v614_v25 = vpack.c.bf16 %v608_v24, %v607_v23 }
  0xbb   : > { %1480 = vmatmul.msk.bf16.gmra.mxu0 %vm637_vm1, %v614_v25 }
  0xbc   : > { %v595_v26 = vpop.f32.mrf.mxu0 }
  0xbd   : > { %v596_v27 = vadd.f32 %v1634_v12, %v595_v26 }
  0xbf   : > { %v609_v30 = vmax.f32 %v596_v27, 0.0 }
  0xc4   : > { %v597_v28 = vpop.f32.mrf.mxu0 }
  0xc5   : > { %v598_v29 = vadd.f32 %v1634_v12, %v597_v28 }
  0xc7   : > { %v610_v31 = vmax.f32 %v598_v29, 0.0 }
  0xc9   : > { %v615_v32 = vpack.c.bf16 %v610_v31, %v609_v30 }
  0xcb   : > { %1481 = vmatmul.msk.bf16.gmra.mxu0 %vm637_vm1, %v615_v32 }
  0xcc   : > { %v600_v33 = vpop.f32.mrf.mxu0 }
  0xcd   : > { %v601_v34 = vadd.f32 %v1634_v12, %v600_v33 }
  0xcf   : > { %v611_v37 = vmax.f32 %v601_v34, 0.0 }
  0xd4   : > { %v602_v35 = vpop.f32.mrf.mxu0 }
  0xd5   : > { %v603_v36 = vadd.f32 %v1634_v12, %v602_v35  ;;  %v1602_v12 = vld [vmem:[%s1802_s28] sm:$0xff] }
  0xd7   : > { %v612_v38 = vmax.f32 %v603_v36, 0.0 }
  0xd9   : > { %v616_v39 = vpack.c.bf16 %v612_v38, %v611_v37 }
  0xdb   : > { %1482 = vmatmul.msk.bf16.gmra.mxu0 %vm637_vm1, %v616_v39  ;;  %v1608_v39 = vld [vmem:[%s1802_s28 + $0x30] sm:$0xff] }
 0x128   : > { %v659_v42 = vpop.f32.mrf.mxu0 }
 0x129   : > { %v660_v44 = vadd.f32 %v1635_v43, %v659_v42 }
 0x12b   : > { %v679_v47 = vmax.f32 %v660_v44, 0.0 }
 0x130   : > { %v661_v45 = vpop.f32.mrf.mxu0 }
 0x131   : > { %v662_v46 = vadd.f32 %v1635_v43, %v661_v45 }
 0x133   : > { %v680_v48 = vmax.f32 %v662_v46, 0.0 }
 0x135   : > { %v687_v49 = vpack.c.bf16 %v680_v48, %v679_v47 }
 0x137   : > { %1491 = vmatmul.msk.bf16.vlgmr.msra.gmra.mxu0 %vm637_vm1, %v687_v49 }
 0x138   : > { %v664_v50 = vpop.f32.mrf.mxu0 }
 0x139   : > { %v665_v51 = vadd.f32 %v1635_v43, %v664_v50 }
 0x13b   : > { %v681_v55 = vmax.f32 %v665_v51, 0.0 }
 0x140   : > { %v666_v52 = vpop.f32.mrf.mxu0 }
 0x141   : > { %v667_v53 = vadd.f32 %v1635_v43, %v666_v52 }
 0x143   : > { %v682_v56 = vmax.f32 %v667_v53, 0.0 }
 0x145   : > { %v688_v57 = vpack.c.bf16 %v682_v56, %v681_v55 }
 0x147   : > { %1492 = vmatmul.msk.bf16.vlgmr.msra.gmra.mxu1 %vm637_vm1, %v688_v57  ;;  %v1616_v57 = vld [vmem:[%s1966_s10 + $0x8] sm:$0xff] }
 0x148   : > { %v669_v59 = vpop.f32.mrf.mxu0  ;;  %1064 = vmatpush.bf16.msrb.mxu1 %v1616_v57 }
 0x149   : > { %v670_v62 = vadd.f32 %v1635_v43, %v669_v59 }
 0x14b   : > { %v683_v2 = vmax.f32 %v670_v62, 0.0  ;;  %v1615_v62 = vld [vmem:[%s1966_s10] sm:$0xff] }
 0x14c   : > { %1065 = vmatpush.bf16.msrb.mxu1 %v1615_v62 }
 0x150   : > { %v671_v63 = vpop.f32.mrf.mxu0 }
 0x151   : > { %v672_v1 = vadd.f32 %v1635_v43, %v671_v63 }
 0x153   : > { %v684_v3 = vmax.f32 %v672_v1, 0.0 }
 0x155   : > { %v689_v4 = vpack.c.bf16 %v684_v3, %v683_v2  ;;  %v1609_v2 = vld [vmem:[%s1802_s28 + $0x38] sm:$0xff] }
 0x157   : > { %1493 = vmatmul.msk.bf16.vlgmr.msra.gmra.mxu2 %vm637_vm1, %v689_v4 }
 0x158   : > { %v674_v5 = vpop.f32.mrf.mxu0 }
 0x159   : > { %v675_v6 = vadd.f32 %v1635_v43, %v674_v5 }
 0x15b   : > { %v685_v9 = vmax.f32 %v675_v6, 0.0 }
 0x160   : > { %v676_v7 = vpop.f32.mrf.mxu0 }
 0x161   : > { %v677_v8 = vadd.f32 %v1635_v43, %v676_v7 }
 0x163   : > { %v686_v10 = vmax.f32 %v677_v8, 0.0 }
 0x165   : > { %v690_v11 = vpack.c.bf16 %v686_v10, %v685_v9 }
 0x167   : > { %1494 = vmatmul.msk.bf16.vlgmr.msra.gmra.mxu3 %vm637_vm1, %v690_v11 }
 0x177   : > { %1547 = vmatmul.msk.bf16.vlgmr.msrb.gmra.mxu3 %vm563_vm0, %v1602_v12 }
 0x187   : > { %1548 = vmatmul.msk.bf16.gmra.mxu3 %vm563_vm0, %v1603_v13 }
 0x197   : > { %1549 = vmatmul.msk.bf16.gmra.mxu3 %vm563_vm0, %v1604_v14 }
 0x1a7   : > { %1550 = vmatmul.msk.bf16.gmra.mxu3 %vm563_vm0, %v1605_v15 }
 0x1b4   : > { %v732_v17 = vpop.f32.mrf.mxu0 }
 0x1b5   : > { %v733_v24 = vadd.f32 %v1818_v20, %v732_v17 }
 0x1b7   : > { %1551 = vmatmul.msk.bf16.gmra.mxu3 %vm563_vm0, %v1606_v16  ;;  %v752_v27 = vmax.f32 %v733_v24, 0.0 }
 0x1b9   : > { %v761_v33 = vsel %vm760_vm2, %v752_v27, -inf }
 0x1ba   : > { %v762_v37 = vrot.slane %v761_v33, 4 }
 0x1bc   : > { %v734_v18 = vpop.f32.mrf.mxu0  ;;  %v763_v42 = vmax.f32 %v761_v33, %v762_v37 }
 0x1bd   : > { %v735_v22 = vadd.f32 %v1818_v20, %v734_v18 }
 0x1be   : > { %v764_v47 = vrot.slane %v763_v42, 2 }
 0x1bf   : > { %v753_v25 = vmax.f32 %v735_v22, 0.0 }
 0x1c0   : > { %v765_v53 = vmax.f32 %v763_v42, %v764_v47 }
 0x1c1   : > { %v768_v30 = vsel %vm760_vm2, %v753_v25, -inf }
 0x1c2   : > { %v769_v34 = vrot.slane %v768_v30, 4  ;;  %v766_v63 = vrot.slane %v765_v53, 1 }
 0x1c4   : > { %v737_v21 = vpop.f32.mrf.mxu1  ;;  %v770_v40 = vmax.f32 %v768_v30, %v769_v34  ;;  %v767_v8 = vmax.f32 %v765_v53, %v766_v63 }
 0x1c5   : > { %v738_v23 = vadd.f32 %v1818_v20, %v737_v21 }
 0x1c6   : > { %v771_v44 = vrot.slane %v770_v40, 2 }
 0x1c7   : > { %1552 = vmatmul.msk.bf16.gmra.mxu3 %vm563_vm0, %v1607_v19  ;;  %v754_v26 = vmax.f32 %v738_v23, 0.0 }
 0x1c8   : > { %v772_v50 = vmax.f32 %v770_v40, %v771_v44 }
 0x1c9   : > { %v775_v31 = vsel %vm760_vm2, %v754_v26, -inf }
 0x1ca   : > { %v776_v36 = vrot.slane %v775_v31, 4  ;;  %v773_v58 = vrot.slane %v772_v50, 1 }
 0x1cc   : > { %v739_v28 = vpop.f32.mrf.mxu1  ;;  %v777_v41 = vmax.f32 %v775_v31, %v776_v36  ;;  %v774_v4 = vmax.f32 %v772_v50, %v773_v58 }
 0x1cd   : > { %v740_v29 = vadd.f32 %v1818_v20, %v739_v28 }
 0x1ce   : > { %v778_v45 = vrot.slane %v777_v41, 2  ;;  %v1321_v13 = vsel %vm1320_vm3, %v774_v4, %v767_v8 }
 0x1cf   : > { %v755_v32 = vmax.f32 %v740_v29, 0.0 }
 0x1d0   : > { %v779_v52 = vmax.f32 %v777_v41, %v778_v45 }
 0x1d1   : > { %v782_v35 = vsel %vm760_vm2, %v755_v32, -inf }
 0x1d2   : > { %v783_v38 = vrot.slane %v782_v35, 4  ;;  %v780_v59 = vrot.slane %v779_v52, 1 }
 0x1d4   : > { %v784_v43 = vmax.f32 %v782_v35, %v783_v38  ;;  %v781_v6 = vmax.f32 %v779_v52, %v780_v59 }
 0x1d6   : > { %v785_v48 = vrot.slane %v784_v43, 2  ;;  %v1323_v14 = vsel %vm1322_vm4, %v781_v6, %v1321_v13 }
 0x1d7   : > { %1553 = vmatmul.msk.bf16.gmra.mxu3 %vm563_vm0, %v1608_v39 }
 0x1d8   : > { %v786_v54 = vmax.f32 %v784_v43, %v785_v48 }
 0x1da   : > { %v742_v46 = vpop.f32.mrf.mxu2  ;;  %v787_v0 = vrot.slane %v786_v54, 1 }
 0x1db   : > { %v743_v49 = vadd.f32 %v1818_v20, %v742_v46 }
 0x1dc   : > { %v788_v9 = vmax.f32 %v786_v54, %v787_v0 }
 0x1dd   : > { %v756_v51 = vmax.f32 %v743_v49, 0.0 }
 0x1de   : > { %v1325_v19 = vsel %vm1324_vm5, %v788_v9, %v1323_v14 }
 0x1df   : > { %v789_v55 = vsel %vm760_vm2, %v756_v51, -inf }
 0x1e0   : > { %v790_v56 = vrot.slane %v789_v55, 4 }
 0x1e2   : > { %v791_v60 = vmax.f32 %v789_v55, %v790_v56  ;;  %v744_v61 = vpop.f32.mrf.mxu2 }
 0x1e3   : > { %v745_v1 = vadd.f32 %v1818_v20, %v744_v61 }
 0x1e4   : > { %v792_v3 = vrot.slane %v791_v60, 2 }
 0x1e5   : > { %v757_v5 = vmax.f32 %v745_v1, 0.0 }
 0x1e6   : > { %v793_v7 = vmax.f32 %v791_v60, %v792_v3 }
 0x1e7   : > { %v796_v10 = vsel %vm760_vm2, %v757_v5, -inf  ;;  %1554 = vmatmul.msk.bf16.gmra.mxu3 %vm563_vm0, %v1609_v2 }
 0x1e8   : > { %v794_v11 = vrot.slane %v793_v7, 1  ;;  %v797_v12 = vrot.slane %v796_v10, 4 }
 0x1ea   : > { %v795_v15 = vmax.f32 %v793_v7, %v794_v11  ;;  %v798_v16 = vmax.f32 %v796_v10, %v797_v12  ;;  %v747_v17 = vpop.f32.mrf.mxu3 }
 0x1eb   : > { %v748_v18 = vadd.f32 %v1818_v20, %v747_v17 }
 0x1ec   : > { %v799_v21 = vrot.slane %v798_v16, 2  ;;  %v1327_v22 = vsel %vm1326_vm6, %v795_v15, %v1325_v19 }
 0x1ed   : > { %v758_v23 = vmax.f32 %v748_v18, 0.0 }
 0x1ee   : > { %v800_v24 = vmax.f32 %v798_v16, %v799_v21 }
 0x1ef   : > { %v803_v25 = vsel %vm760_vm2, %v758_v23, -inf }
 0x1f0   : > { %v804_v26 = vrot.slane %v803_v25, 4  ;;  %v801_v29 = vrot.slane %v800_v24, 1 }
 0x1f2   : > { %v805_v27 = vmax.f32 %v803_v25, %v804_v26  ;;  %v749_v28 = vpop.f32.mrf.mxu3  ;;  %v802_v34 = vmax.f32 %v800_v24, %v801_v29  ;;  %v1618_v26 = vld [vmem:[%s1968_s12 + $0x8] sm:$0xff] }
 0x1f3   : > { %v750_v30 = vadd.f32 %v1818_v20, %v749_v28  ;;  %v1856_v20 = vld [vmem:[%s1965_s9] ss:$0 sm:$0xff]  ;;  %1181 = vmatpush.bf16.msrb.mxu2 %v1618_v26 }
 0x1f4   : > { %v806_v31 = vrot.slane %v805_v27, 2  ;;  %v1329_v41 = vsel %vm1328_vm7, %v802_v34, %v1327_v22  ;;  %v1617_v34 = vld [vmem:[%s1968_s12] sm:$0xff] }
 0x1f5   : > { %v759_v32 = vmax.f32 %v750_v30, 0.0 }
 0x1f6   : > { %v807_v33 = vmax.f32 %v805_v27, %v806_v31 }
 0x1f7   : > { %v810_v35 = vsel %vm760_vm2, %v759_v32, -inf  ;;  %1182 = vmatpush.bf16.msrb.mxu2 %v1617_v34 }
 0x1f8   : > { %v808_v36 = vrot.slane %v807_v33, 1  ;;  %v811_v37 = vrot.slane %v810_v35, 4 }
 0x1fa   : > { %v809_v38 = vmax.f32 %v807_v33, %v808_v36  ;;  %v812_v39 = vmax.f32 %v810_v35, %v811_v37  ;;  %v950_v40 = vpop.f32.mrf.mxu3 }
 0x1fb   : > { %v951_v46 = vadd.f32 %v1856_v20, %v950_v40 }
 0x1fc   : > { %v813_v42 = vrot.slane %v812_v39, 2  ;;  %v1331_v43 = vsel %vm1330_vm8, %v809_v38, %v1329_v41 }
 0x1fd   : > { %v990_v51 = vmax.f32 %v951_v46, 0.0 }
 0x1fe   : > { %v814_v44 = vmax.f32 %v812_v39, %v813_v42 }
 0x200   : > { %v815_v45 = vrot.slane %v814_v44, 1 }
 0x202   : > { %v816_v47 = vmax.f32 %v814_v44, %v815_v45  ;;  %v952_v48 = vpop.f32.mrf.mxu3 }
 0x203   : > { %v953_v49 = vadd.f32 %v1856_v20, %v952_v48 }
 0x204   : > { %v1861_v50 = vsel %vm1332_vm9, %v816_v47, %v1331_v43  ;;  %v1638_v43 = vld [vmem:[%s1967_s11] ss:$0 sm:$0xff] }
 0x205   : > { %v991_v52 = vmax.f32 %v953_v49, 0.0 }
 0x207   : > { %v1006_v53 = vpack.c.bf16 %v991_v52, %v990_v51 }
 0x209   : > { %1563 = vmatmul.msk.bf16.vlgmr.msrb.gmra.mxu1 %vm637_vm1, %v1006_v53 }
 0x20a   : > { %v955_v54 = vpop.f32.mrf.mxu3 }
 0x20b   : > { %v956_v55 = vadd.f32 %v1856_v20, %v955_v54 }
 0x20d   : > { %v992_v58 = vmax.f32 %v956_v55, 0.0 }
 0x212   : > { %v957_v56 = vpop.f32.mrf.mxu3 }
 0x213   : > { %v958_v57 = vadd.f32 %v1856_v20, %v957_v56 }
 0x215   : > { %v993_v59 = vmax.f32 %v958_v57, 0.0 }
 0x217   : > { %v1007_v60 = vpack.c.bf16 %v993_v59, %v992_v58 }
 0x219   : > { %1564 = vmatmul.msk.bf16.gmra.mxu1 %vm637_vm1, %v1007_v60 }
 0x21a   : > { %v960_v61 = vpop.f32.mrf.mxu3 }
 0x21b   : > { %v961_v62 = vadd.f32 %v1856_v20, %v960_v61 }
 0x21d   : > { %v994_v1 = vmax.f32 %v961_v62, 0.0 }
 0x222   : > { %v962_v63 = vpop.f32.mrf.mxu3 }
 0x223   : > { %v963_v0 = vadd.f32 %v1856_v20, %v962_v63 }
 0x225   : > { %v995_v2 = vmax.f32 %v963_v0, 0.0 }
 0x227   : > { %v1008_v3 = vpack.c.bf16 %v995_v2, %v994_v1 }
 0x229   : > { %1565 = vmatmul.msk.bf16.gmra.mxu1 %vm637_vm1, %v1008_v3 }
 0x22a   : > { %v965_v4 = vpop.f32.mrf.mxu3 }
 0x22b   : > { %v966_v5 = vadd.f32 %v1856_v20, %v965_v4 }
 0x22d   : > { %v996_v8 = vmax.f32 %v966_v5, 0.0 }
 0x232   : > { %v967_v6 = vpop.f32.mrf.mxu3 }
 0x233   : > { %v968_v7 = vadd.f32 %v1856_v20, %v967_v6 }
 0x235   : > { %v997_v9 = vmax.f32 %v968_v7, 0.0 }
 0x237   : > { %v1009_v10 = vpack.c.bf16 %v997_v9, %v996_v8 }
 0x239   : > { %1566 = vmatmul.msk.bf16.gmra.mxu1 %vm637_vm1, %v1009_v10 }
 0x23a   : > { %v970_v11 = vpop.f32.mrf.mxu3 }
 0x23b   : > { %v971_v12 = vadd.f32 %v1856_v20, %v970_v11 }
 0x23d   : > { %v998_v15 = vmax.f32 %v971_v12, 0.0 }
 0x242   : > { %v972_v13 = vpop.f32.mrf.mxu3 }
 0x243   : > { %v973_v14 = vadd.f32 %v1856_v20, %v972_v13 }
 0x245   : > { %v999_v16 = vmax.f32 %v973_v14, 0.0 }
 0x247   : > { %v1010_v17 = vpack.c.bf16 %v999_v16, %v998_v15 }
 0x249   : > { %1567 = vmatmul.msk.bf16.gmra.mxu1 %vm637_vm1, %v1010_v17 }
 0x24a   : > { %v975_v18 = vpop.f32.mrf.mxu3 }
 0x24b   : > { %v976_v19 = vadd.f32 %v1856_v20, %v975_v18 }
 0x24d   : > { %v1000_v23 = vmax.f32 %v976_v19, 0.0 }
 0x252   : > { %v977_v21 = vpop.f32.mrf.mxu3 }
 0x253   : > { %v978_v22 = vadd.f32 %v1856_v20, %v977_v21 }
 0x255   : > { %v1001_v24 = vmax.f32 %v978_v22, 0.0 }
 0x257   : > { %v1011_v25 = vpack.c.bf16 %v1001_v24, %v1000_v23 }
 0x259   : > { %1568 = vmatmul.msk.bf16.gmra.mxu1 %vm637_vm1, %v1011_v25 }
 0x25a   : > { %v980_v27 = vpop.f32.mrf.mxu3 }
 0x25b   : > { %v981_v28 = vadd.f32 %v1856_v20, %v980_v27 }
 0x25d   : > { %v1002_v31 = vmax.f32 %v981_v28, 0.0 }
 0x262   : > { %v982_v29 = vpop.f32.mrf.mxu3 }
 0x263   : > { %v983_v30 = vadd.f32 %v1856_v20, %v982_v29 }
 0x265   : > { %v1003_v32 = vmax.f32 %v983_v30, 0.0 }
 0x267   : > { %v1012_v33 = vpack.c.bf16 %v1003_v32, %v1002_v31 }
 0x269   : > { %1569 = vmatmul.msk.bf16.gmra.mxu1 %vm637_vm1, %v1012_v33 }
 0x26a   : > { %v985_v35 = vpop.f32.mrf.mxu3 }
 0x26b   : > { %v986_v36 = vadd.f32 %v1856_v20, %v985_v35 }
 0x26d   : > { %v1004_v39 = vmax.f32 %v986_v36, 0.0 }
 0x272   : > { %v987_v37 = vpop.f32.mrf.mxu3 }
 0x273   : > { %v988_v38 = vadd.f32 %v1856_v20, %v987_v37  ;;  %v1905_v37 = vld [vmem:[%s1969_s13] ss:$0 sm:$0xff] }
 0x275   : > { %v1005_v40 = vmax.f32 %v988_v38, 0.0 }
 0x277   : > { %v1013_v41 = vpack.c.bf16 %v1005_v40, %v1004_v39 }
 0x279   : > { %1570 = vmatmul.msk.bf16.gmra.mxu1 %vm637_vm1, %v1013_v41 }
 0x286   : > { %v1067_v42 = vpop.f32.mrf.mxu1 }
 0x287   : > { %v1068_v44 = vadd.f32 %v1638_v43, %v1067_v42 }
 0x289   : > { %v1107_v47 = vmax.f32 %v1068_v44, 0.0 }
 0x28e   : > { %v1069_v45 = vpop.f32.mrf.mxu1 }
 0x28f   : > { %v1070_v46 = vadd.f32 %v1638_v43, %v1069_v45 }
 0x291   : > { %v1108_v48 = vmax.f32 %v1070_v46, 0.0 }
 0x293   : > { %v1123_v49 = vpack.c.bf16 %v1108_v48, %v1107_v47 }
 0x295   : > { %1579 = vmatmul.msk.bf16.vlgmr.msrb.gmra.mxu2 %vm637_vm1, %v1123_v49 }
 0x296   : > { %v1072_v51 = vpop.f32.mrf.mxu1 }
 0x297   : > { %v1073_v20 = vadd.f32 %v1638_v43, %v1072_v51 }
 0x299   : > { %v1109_v54 = vmax.f32 %v1073_v20, 0.0 }
 0x29e   : > { %v1074_v52 = vpop.f32.mrf.mxu1 }
 0x29f   : > { %v1075_v53 = vadd.f32 %v1638_v43, %v1074_v52 }
 0x2a1   : > { %v1110_v55 = vmax.f32 %v1075_v53, 0.0 }
 0x2a3   : > { %v1124_v56 = vpack.c.bf16 %v1110_v55, %v1109_v54 }
 0x2a5   : > { %1580 = vmatmul.msk.bf16.gmra.mxu2 %vm637_vm1, %v1124_v56 }
 0x2a6   : > { %v1077_v57 = vpop.f32.mrf.mxu1 }
 0x2a7   : > { %v1078_v58 = vadd.f32 %v1638_v43, %v1077_v57 }
 0x2a9   : > { %v1111_v61 = vmax.f32 %v1078_v58, 0.0 }
 0x2ae   : > { %v1079_v59 = vpop.f32.mrf.mxu1 }
 0x2af   : > { %v1080_v60 = vadd.f32 %v1638_v43, %v1079_v59 }
 0x2b1   : > { %v1112_v62 = vmax.f32 %v1080_v60, 0.0 }
 0x2b3   : > { %v1125_v63 = vpack.c.bf16 %v1112_v62, %v1111_v61 }
 0x2b5   : > { %1581 = vmatmul.msk.bf16.gmra.mxu2 %vm637_vm1, %v1125_v63 }
 0x2b6   : > { %v1082_v0 = vpop.f32.mrf.mxu1 }
 0x2b7   : > { %v1083_v1 = vadd.f32 %v1638_v43, %v1082_v0 }
 0x2b9   : > { %v1113_v4 = vmax.f32 %v1083_v1, 0.0 }
 0x2be   : > { %v1084_v2 = vpop.f32.mrf.mxu1 }
 0x2bf   : > { %v1085_v3 = vadd.f32 %v1638_v43, %v1084_v2 }
 0x2c1   : > { %v1114_v5 = vmax.f32 %v1085_v3, 0.0 }
 0x2c3   : > { %v1126_v6 = vpack.c.bf16 %v1114_v5, %v1113_v4 }
 0x2c5   : > { %1582 = vmatmul.msk.bf16.gmra.mxu2 %vm637_vm1, %v1126_v6 }
 0x2c6   : > { %v1087_v7 = vpop.f32.mrf.mxu1 }
 0x2c7   : > { %v1088_v8 = vadd.f32 %v1638_v43, %v1087_v7 }
 0x2c9   : > { %v1115_v11 = vmax.f32 %v1088_v8, 0.0 }
 0x2ce   : > { %v1089_v9 = vpop.f32.mrf.mxu1 }
 0x2cf   : > { %v1090_v10 = vadd.f32 %v1638_v43, %v1089_v9 }
 0x2d1   : > { %v1116_v12 = vmax.f32 %v1090_v10, 0.0 }
 0x2d3   : > { %v1127_v13 = vpack.c.bf16 %v1116_v12, %v1115_v11 }
 0x2d5   : > { %1583 = vmatmul.msk.bf16.gmra.mxu2 %vm637_vm1, %v1127_v13 }
 0x2d6   : > { %v1092_v14 = vpop.f32.mrf.mxu1 }
 0x2d7   : > { %v1093_v15 = vadd.f32 %v1638_v43, %v1092_v14 }
 0x2d9   : > { %v1117_v18 = vmax.f32 %v1093_v15, 0.0 }
 0x2de   : > { %v1094_v16 = vpop.f32.mrf.mxu1 }
 0x2df   : > { %v1095_v17 = vadd.f32 %v1638_v43, %v1094_v16 }
 0x2e1   : > { %v1118_v19 = vmax.f32 %v1095_v17, 0.0 }
 0x2e3   : > { %v1128_v21 = vpack.c.bf16 %v1118_v19, %v1117_v18 }
 0x2e5   : > { %1584 = vmatmul.msk.bf16.gmra.mxu2 %vm637_vm1, %v1128_v21 }
 0x2e6   : > { %v1097_v22 = vpop.f32.mrf.mxu1 }
 0x2e7   : > { %v1098_v23 = vadd.f32 %v1638_v43, %v1097_v22 }
 0x2e9   : > { %v1119_v26 = vmax.f32 %v1098_v23, 0.0 }
 0x2ee   : > { %v1099_v24 = vpop.f32.mrf.mxu1 }
 0x2ef   : > { %v1100_v25 = vadd.f32 %v1638_v43, %v1099_v24 }
 0x2f1   : > { %v1120_v27 = vmax.f32 %v1100_v25, 0.0 }
 0x2f3   : > { %v1129_v28 = vpack.c.bf16 %v1120_v27, %v1119_v26 }
 0x2f5   : > { %1585 = vmatmul.msk.bf16.gmra.mxu2 %vm637_vm1, %v1129_v28 }
 0x2f6   : > { %v1102_v29 = vpop.f32.mrf.mxu1 }
 0x2f7   : > { %v1103_v30 = vadd.f32 %v1638_v43, %v1102_v29 }
 0x2f9   : > { %v1121_v33 = vmax.f32 %v1103_v30, 0.0 }
 0x2fe   : > { %v1104_v31 = vpop.f32.mrf.mxu1 }
 0x2ff   : > { %v1105_v32 = vadd.f32 %v1638_v43, %v1104_v31 }
 0x301   : > { %v1122_v34 = vmax.f32 %v1105_v32, 0.0 }
 0x303   : > { %v1130_v35 = vpack.c.bf16 %v1122_v34, %v1121_v33 }
 0x305   : > { %1586 = vmatmul.msk.bf16.gmra.mxu2 %vm637_vm1, %v1130_v35 }
 0x318   : > { %v1184_v36 = vpop.f32.mrf.mxu2 }
 0x319   : > { %v1185_v38 = vadd.f32 %v1905_v37, %v1184_v36 }
 0x31b   : > { %v1224_v40 = vmax.f32 %v1185_v38, 0.0 }
 0x31d   : > { %v1240_v43 = vsel %vm760_vm2, %v1224_v40, -inf }
 0x320   : > { %v1186_v39 = vpop.f32.mrf.mxu2 }
 0x321   : > { %v1187_v41 = vadd.f32 %v1905_v37, %v1186_v39 }
 0x323   : > { %v1225_v42 = vmax.f32 %v1187_v41, 0.0 }
 0x325   : > { %v1241_v44 = vsel %vm760_vm2, %v1225_v42, -inf }
 0x326   : > { %v1242_v45 = vmax.f32 %v1240_v43, %v1241_v44 }
 0x328   : > { %v1189_v46 = vpop.f32.mrf.mxu2  ;;  %v1243_v48 = vrot.slane %v1242_v45, 4 }
 0x329   : > { %v1190_v47 = vadd.f32 %v1905_v37, %v1189_v46 }
 0x32a   : > { %v1244_v52 = vmax.f32 %v1242_v45, %v1243_v48 }
 0x32b   : > { %v1226_v51 = vmax.f32 %v1190_v47, 0.0 }
 0x32c   : > { %v1245_v56 = vrot.slane %v1244_v52, 2 }
 0x32d   : > { %v1249_v54 = vsel %vm760_vm2, %v1226_v51, -inf }
 0x32e   : > { %v1246_v60 = vmax.f32 %v1244_v52, %v1245_v56 }
 0x330   : > { %v1191_v49 = vpop.f32.mrf.mxu2  ;;  %v1247_v0 = vrot.slane %v1246_v60, 1 }
 0x331   : > { %v1192_v20 = vadd.f32 %v1905_v37, %v1191_v49 }
 0x332   : > { %v1248_v6 = vmax.f32 %v1246_v60, %v1247_v0 }
 0x333   : > { %v1227_v53 = vmax.f32 %v1192_v20, 0.0 }
 0x335   : > { %v1250_v55 = vsel %vm760_vm2, %v1227_v53, -inf }
 0x336   : > { %v1251_v57 = vmax.f32 %v1249_v54, %v1250_v55 }
 0x338   : > { %v1252_v58 = vrot.slane %v1251_v57, 4  ;;  %v1194_v59 = vpop.f32.mrf.mxu2 }
 0x339   : > { %v1195_v63 = vadd.f32 %v1905_v37, %v1194_v59 }
 0x33a   : > { %v1253_v61 = vmax.f32 %v1251_v57, %v1252_v58 }
 0x33b   : > { %v1228_v4 = vmax.f32 %v1195_v63, 0.0 }
 0x33c   : > { %v1254_v62 = vrot.slane %v1253_v61, 2 }
 0x33d   : > { %v1258_v10 = vsel %vm760_vm2, %v1228_v4, -inf }
 0x33e   : > { %v1255_v1 = vmax.f32 %v1253_v61, %v1254_v62 }
 0x340   : > { %v1256_v2 = vrot.slane %v1255_v1, 1  ;;  %v1196_v3 = vpop.f32.mrf.mxu2 }
 0x341   : > { %v1197_v5 = vadd.f32 %v1905_v37, %v1196_v3 }
 0x342   : > { %v1257_v7 = vmax.f32 %v1255_v1, %v1256_v2 }
 0x343   : > { %v1229_v8 = vmax.f32 %v1197_v5, 0.0 }
 0x344   : > { %v1343_v9 = vsel %vm1320_vm3, %v1257_v7, %v1248_v6 }
 0x345   : > { %v1259_v11 = vsel %vm760_vm2, %v1229_v8, -inf }
 0x346   : > { %v1260_v12 = vmax.f32 %v1258_v10, %v1259_v11 }
 0x348   : > { %v1261_v13 = vrot.slane %v1260_v12, 4  ;;  %v1199_v14 = vpop.f32.mrf.mxu2 }
 0x349   : > { %v1200_v17 = vadd.f32 %v1905_v37, %v1199_v14 }
 0x34a   : > { %v1262_v15 = vmax.f32 %v1260_v12, %v1261_v13 }
 0x34b   : > { %v1230_v22 = vmax.f32 %v1200_v17, 0.0 }
 0x34c   : > { %v1263_v16 = vrot.slane %v1262_v15, 2 }
 0x34d   : > { %v1267_v27 = vsel %vm760_vm2, %v1230_v22, -inf }
 0x34e   : > { %v1264_v18 = vmax.f32 %v1262_v15, %v1263_v16 }
 0x350   : > { %v1265_v19 = vrot.slane %v1264_v18, 1  ;;  %v1201_v21 = vpop.f32.mrf.mxu2 }
 0x351   : > { %v1202_v23 = vadd.f32 %v1905_v37, %v1201_v21 }
 0x352   : > { %v1266_v24 = vmax.f32 %v1264_v18, %v1265_v19 }
 0x353   : > { %v1231_v25 = vmax.f32 %v1202_v23, 0.0 }
 0x354   : > { %v1344_v26 = vsel %vm1322_vm4, %v1266_v24, %v1343_v9 }
 0x355   : > { %v1268_v28 = vsel %vm760_vm2, %v1231_v25, -inf }
 0x356   : > { %v1269_v29 = vmax.f32 %v1267_v27, %v1268_v28 }
 0x358   : > { %v1270_v30 = vrot.slane %v1269_v29, 4  ;;  %v1204_v31 = vpop.f32.mrf.mxu2 }
 0x359   : > { %v1205_v45 = vadd.f32 %v1905_v37, %v1204_v31 }
 0x35a   : > { %v1271_v32 = vmax.f32 %v1269_v29, %v1270_v30 }
 0x35b   : > { %v1232_v51 = vmax.f32 %v1205_v45, 0.0 }
 0x35c   : > { %v1272_v33 = vrot.slane %v1271_v32, 2 }
 0x35d   : > { %v1276_v58 = vsel %vm760_vm2, %v1232_v51, -inf }
 0x35e   : > { %v1273_v34 = vmax.f32 %v1271_v32, %v1272_v33 }
 0x360   : > { %v1274_v35 = vrot.slane %v1273_v34, 1  ;;  %v1206_v36 = vpop.f32.mrf.mxu2 }
 0x361   : > { %v1207_v43 = vadd.f32 %v1905_v37, %v1206_v36 }
 0x362   : > { %v1275_v38 = vmax.f32 %v1273_v34, %v1274_v35 }
 0x363   : > { %v1233_v47 = vmax.f32 %v1207_v43, 0.0 }
 0x364   : > { %v1345_v39 = vsel %vm1324_vm5, %v1275_v38, %v1344_v26 }
 0x365   : > { %v1277_v54 = vsel %vm760_vm2, %v1233_v47, -inf }
 0x366   : > { %v1278_v59 = vmax.f32 %v1276_v58, %v1277_v54 }
 0x368   : > { %v1209_v40 = vpop.f32.mrf.mxu2  ;;  %v1279_v2 = vrot.slane %v1278_v59, 4 }
 0x369   : > { %v1210_v46 = vadd.f32 %v1905_v37, %v1209_v40 }
 0x36a   : > { %v1280_v5 = vmax.f32 %v1278_v59, %v1279_v2 }
 0x36b   : > { %v1234_v52 = vmax.f32 %v1210_v46, 0.0 }
 0x36c   : > { %v1281_v10 = vrot.slane %v1280_v5, 2 }
 0x36d   : > { %v1285_v60 = vsel %vm760_vm2, %v1234_v52, -inf }
 0x36e   : > { %v1282_v16 = vmax.f32 %v1280_v5, %v1281_v10 }
 0x370   : > { %v1211_v41 = vpop.f32.mrf.mxu2  ;;  %v1283_v24 = vrot.slane %v1282_v16, 1 }
 0x371   : > { %v1212_v44 = vadd.f32 %v1905_v37, %v1211_v41 }
 0x373   : > { %v1235_v49 = vmax.f32 %v1212_v44, 0.0 }
 0x375   : > { %v1286_v56 = vsel %vm760_vm2, %v1235_v49, -inf }
 0x376   : > { %v1287_v62 = vmax.f32 %v1285_v60, %v1286_v56 }
 0x378   : > { %v1214_v42 = vpop.f32.mrf.mxu2  ;;  %v1288_v3 = vrot.slane %v1287_v62, 4 }
 0x379   : > { %v1215_v48 = vadd.f32 %v1905_v37, %v1214_v42 }
 0x37a   : > { %v1289_v7 = vmax.f32 %v1287_v62, %v1288_v3 }
 0x37b   : > { %v1236_v55 = vmax.f32 %v1215_v48, 0.0 }
 0x37c   : > { %v1290_v13 = vrot.slane %v1289_v7, 2 }
 0x37d   : > { %v1294_v63 = vsel %vm760_vm2, %v1236_v55, -inf }
 0x37e   : > { %v1291_v19 = vmax.f32 %v1289_v7, %v1290_v13 }
 0x380   : > { %v1216_v20 = vpop.f32.mrf.mxu2  ;;  %v1292_v25 = vrot.slane %v1291_v19, 1 }
 0x381   : > { %v1217_v53 = vadd.f32 %v1905_v37, %v1216_v20 }
 0x382   : > { %v1293_v29 = vmax.f32 %v1291_v19, %v1292_v25 }
 0x383   : > { %v1237_v57 = vmax.f32 %v1217_v53, 0.0 }
 0x385   : > { %v1295_v61 = vsel %vm760_vm2, %v1237_v57, -inf }
 0x386   : > { %v1296_v0 = vmax.f32 %v1294_v63, %v1295_v61 }
 0x388   : > { %v1219_v1 = vpop.f32.mrf.mxu2  ;;  %v1297_v4 = vrot.slane %v1296_v0, 4 }
 0x389   : > { %v1220_v6 = vadd.f32 %v1905_v37, %v1219_v1 }
 0x38a   : > { %v1298_v8 = vmax.f32 %v1296_v0, %v1297_v4 }
 0x38b   : > { %v1238_v11 = vmax.f32 %v1220_v6, 0.0 }
 0x38c   : > { %v1299_v14 = vrot.slane %v1298_v8, 2 }
 0x38d   : > { %v1303_v17 = vsel %vm760_vm2, %v1238_v11, -inf }
 0x38e   : > { %v1300_v22 = vmax.f32 %v1298_v8, %v1299_v14 }
 0x390   : > { %v1221_v9 = vpop.f32.mrf.mxu2  ;;  %v1301_v27 = vrot.slane %v1300_v22, 1 }
 0x391   : > { %v1222_v12 = vadd.f32 %v1905_v37, %v1221_v9  ;;  %v1284_v37 = vmax.f32 %v1282_v16, %v1283_v24 }
 0x392   : > { %v1302_v31 = vmax.f32 %v1300_v22, %v1301_v27 }
 0x393   : > { %v1239_v15 = vmax.f32 %v1222_v12, 0.0  ;;  %v1346_v33 = vsel %vm1326_vm6, %v1284_v37, %v1345_v39 }
 0x394   : > { %v1347_v35 = vsel %vm1328_vm7, %v1293_v29, %v1346_v33 }
 0x395   : > { %v1304_v18 = vsel %vm760_vm2, %v1239_v15, -inf  ;;  %v1348_v36 = vsel %vm1330_vm8, %v1302_v31, %v1347_v35 }
 0x396   : > { %v1305_v21 = vmax.f32 %v1303_v17, %v1304_v18 }
 0x398   : > { %v1306_v23 = vrot.slane %v1305_v21, 4 }
 0x39a   : > { %v1307_v26 = vmax.f32 %v1305_v21, %v1306_v23 }
 0x39c   : > { %v1308_v28 = vrot.slane %v1307_v26, 2 }
 0x39e   : > { %v1309_v30 = vmax.f32 %v1307_v26, %v1308_v28 }
 0x3a0   : > { %v1310_v32 = vrot.slane %v1309_v30, 1 }
 0x3a2   : > { %v1311_v34 = vmax.f32 %v1309_v30, %v1310_v32 }
 0x3a4   : > { %v1349_v38 = vsel %vm1332_vm9, %v1311_v34, %v1348_v36 }
 0x3a5   : > { %1350 = vrot.lane.b32.xlu0 %v1349_v38, %s1648_s18 }
 0x417   : > { %v1351_v40 = vpop.permute.xlu0 %1350 }
 0x418   : > { %v1353_v39 = vsel %vm760_vm2, %v1861_v50, %v1351_v40 }
 0x419   : > { %v1354_v41 = vpack.c.bf16 %v1353_v39, %v1353_v39 }
 0x41b   : > { %1355 = vst [vmem:[%s489_s21] sm:$0xf] %v1354_v41 }
 0x41c PF: > { %s24_s29 = sadd.s32 1, %s1646_s29  }
 0x41d   : > { %p21_p6 = scmp.ge.s32.totalorder %s24_s29, 4  }
 0x41f   :  { %23 = sbr.rel (!%p21_p6) target bundleno = 1 (0x1), region = 109 }

// kernel: pointnet2_forward.5
= control target key start
LH: loop header
LB: loop body
LE: loop exit
PB: predicated region body
PF: predicated region fallthrough
CT: control target
= control target key end

     0   :  { %vm133_vm0 = vcmask 130048   ;;  %s1370_s0 = inlined_call_operand.vmem [shape: bf16[16,144], index: 0, kind: input, shape index: {}]   ;;  %s1371_s1 = inlined_call_operand.vmem [shape: bf16[144,64], index: 1, kind: input, shape index: {}]   ;;  %s1372_s2 = inlined_call_operand.vmem [shape: f32[1,64], index: 2, kind: input, shape index: {}]   ;;  %s1373_s3 = inlined_call_operand.vmem [shape: bf16[64,128], index: 3, kind: input, shape index: {}]   ;;  %s1374_s4 = inlined_call_operand.vmem [shape: f32[1,128], index: 4, kind: input, shape index: {}]   ;;  %s1375_s5 = inlined_call_operand.vmem [shape: bf16[128,256], index: 5, kind: input, shape index: {}]   ;;  %s1376_s6 = inlined_call_operand.vmem [shape: f32[1,256], index: 6, kind: input, shape index: {}]   ;;  %s1377_s7 = inlined_call_operand.vmem [shape: bf16[256,128], index: 7, kind: input, shape index: {}]   ;;  %s1378_s8 = inlined_call_operand.vmem [shape: f32[1,128], index: 8, kind: input, shape index: {}]   ;;  %s1379_s9 = inlined_call_operand.vmem [shape: bf16[128,64], index: 9, kind: input, shape index: {}]   ;;  %s1380_s10 = inlined_call_operand.vmem [shape: f32[1,64], index: 10, kind: input, shape index: {}]   ;;  %s1381_s11 = inlined_call_operand.vmem [shape: bf16[64,40], index: 11, kind: input, shape index: {}]   ;;  %s1382_s12 = inlined_call_operand.vmem [shape: f32[1,40], index: 12, kind: input, shape index: {}]   ;;  %s1383_s13 = inlined_call_operand.hbm [shape: f32[2,40], index: 13, kind: output, shape index: {}]  }
   0x1   :  { %v963_v0 = vld [vmem:[%s1371_s1 + $0x38] sm:$0xff]  ;;  %v962_v1 = vld [vmem:[%s1371_s1 + $0x30] sm:$0xff]  ;;  %v964_v2 = vld [vmem:[%s1371_s1 + $0x40] sm:$0xff] }
   0x2   :  { %137 = vmatpush.bf16.msra.mxu0 %v963_v0  ;;  %v954_v3 = vld [vmem:[%s1370_s0 + $0x4] sm:$0xf]  ;;  %v719_v4 = vld [vmem:[%s1370_s0 + $0x8] sm:$0xf0]  ;;  %158 = vmatpush.bf16.msra.mxu1 %v964_v2 }
   0x3   :  { %v722_v5 = vor.u32 %v954_v3, %v719_v4  ;;  %v961_v6 = vld [vmem:[%s1371_s1 + $0x28] sm:$0xff] }
   0x6   :  { %138 = vmatpush.bf16.msra.mxu0 %v962_v1 }
   0x7   :  { %18 = vsyncpa [#allocation3], 0  ;;  %759 = vmatmul.msk.bf16.vlgmr.msra.gmra.mxu1 %vm133_vm0, %v722_v5  ;;  %v960_v7 = vld [vmem:[%s1371_s1 + $0x20] sm:$0xff]  ;;  %v959_v8 = vld [vmem:[%s1371_s1 + $0x18] sm:$0xff]  ;;  %vm204_vm1 = vcmask 523264   ;;  %vm431_vm2 = vcmask 1041409  }
   0x8   :  { %v958_v9 = vld [vmem:[%s1371_s1 + $0x10] sm:$0xff]  ;;  %v957_v10 = vld [vmem:[%s1371_s1 + $0x8] sm:$0xff]  ;;  %v956_v11 = vld [vmem:[%s1371_s1] sm:$0xff]  ;;  %s1045_s21 = smov [#allocation2]   ;;  %s706_s22 = sshll.u32 %s1383_s13, 4  ;;  %vm697_vm3 = vcmask 320512   ;;  %s707_s22 = int_to_ptr.hbm [resolvable:$true] %s706_s22 }
   0x9   :  { %v717_v12 = vld [vmem:[%s1370_s0] sm:$0xf]  ;;  %v955_v13 = vld [vmem:[%s1370_s0 + $0x4] sm:$0xf0]  ;;  %v968_v15 = vld [vmem:[%s1373_s3 + $0x18] sm:$0xff] }
   0xa   :  { %139 = vmatpush.bf16.msra.mxu0 %v961_v6  ;;  %v718_v14 = vor.u32 %v955_v13, %v717_v12  ;;  %212 = vmatpush.bf16.msra.mxu2 %v968_v15  ;;  %v967_v16 = vld [vmem:[%s1373_s3 + $0x10] sm:$0xff]  ;;  %v966_v17 = vld [vmem:[%s1373_s3 + $0x8] sm:$0xff]  ;;  %v965_v18 = vld [vmem:[%s1373_s3] sm:$0xff] }
   0xb   :  { %v835_v19 = vld [vmem:[%s1375_s5 + $0x70] sm:$0xf]  ;;  %v984_v20 = vld [vmem:[%s1375_s5 + $0x74] sm:$0xf0]  ;;  %v983_v21 = vld [vmem:[%s1375_s5 + $0x74] sm:$0xf] }
   0xc   :  { %v836_v22 = vor.u32 %v984_v20, %v835_v19  ;;  %v837_v23 = vld [vmem:[%s1375_s5 + $0x78] sm:$0xf0]  ;;  %v827_v24 = vld [vmem:[%s1375_s5 + $0x60] sm:$0xf]  ;;  %v982_v25 = vld [vmem:[%s1375_s5 + $0x64] sm:$0xf0] }
   0xd   :  { %v840_v26 = vor.u32 %v983_v21, %v837_v23  ;;  %v981_v27 = vld [vmem:[%s1375_s5 + $0x64] sm:$0xf]  ;;  %v829_v28 = vld [vmem:[%s1375_s5 + $0x68] sm:$0xf0]  ;;  %v828_v29 = vor.u32 %v982_v25, %v827_v24  ;;  %v819_v31 = vld [vmem:[%s1375_s5 + $0x50] sm:$0xf] }
   0xe   :  { %140 = vmatpush.bf16.msra.mxu0 %v960_v7  ;;  %213 = vmatpush.bf16.msra.mxu2 %v967_v16  ;;  %v832_v30 = vor.u32 %v981_v27, %v829_v28  ;;  %v980_v32 = vld [vmem:[%s1375_s5 + $0x54] sm:$0xf0]  ;;  %v979_v33 = vld [vmem:[%s1375_s5 + $0x54] sm:$0xf]  ;;  %v821_v34 = vld [vmem:[%s1375_s5 + $0x58] sm:$0xf0] }
   0xf   :  { %327 = vmatpush.bf16.msra.mxu3 %v836_v22  ;;  %341 = vmatpush.bf16.msrb.mxu1 %v840_v26  ;;  %v820_v35 = vor.u32 %v980_v32, %v819_v31  ;;  %v824_v36 = vor.u32 %v979_v33, %v821_v34  ;;  %v811_v37 = vld [vmem:[%s1375_s5 + $0x40] sm:$0xf]  ;;  %v978_v38 = vld [vmem:[%s1375_s5 + $0x44] sm:$0xf0]  ;;  %v977_v39 = vld [vmem:[%s1375_s5 + $0x44] sm:$0xf] }
  0x10   :  { %v813_v40 = vld [vmem:[%s1375_s5 + $0x48] sm:$0xf0]  ;;  %v812_v41 = vor.u32 %v978_v38, %v811_v37  ;;  %v1014_v45 = vld [vmem:[%s1372_s2] ss:$0 sm:$0xff]  ;;  %v803_v55 = vld [vmem:[%s1375_s5 + $0x30] sm:$0xf] }
  0x11   :  { %v816_v42 = vor.u32 %v977_v39, %v813_v40  ;;  %v976_v56 = vld [vmem:[%s1375_s5 + $0x34] sm:$0xf0]  ;;  %v975_v57 = vld [vmem:[%s1375_s5 + $0x34] sm:$0xf]  ;;  %v805_v59 = vld [vmem:[%s1375_s5 + $0x38] sm:$0xf0] }
  0x12   :  { %141 = vmatpush.bf16.msra.mxu0 %v959_v8  ;;  %214 = vmatpush.bf16.msra.mxu2 %v966_v17  ;;  %v804_v58 = vor.u32 %v976_v56, %v803_v55  ;;  %v808_v60 = vor.u32 %v975_v57, %v805_v59  ;;  %v795_v61 = vld [vmem:[%s1375_s5 + $0x20] sm:$0xf]  ;;  %v974_v62 = vld [vmem:[%s1375_s5 + $0x24] sm:$0xf0]  ;;  %v973_v63 = vld [vmem:[%s1375_s5 + $0x24] sm:$0xf] }
  0x13   :  { %328 = vmatpush.bf16.msra.mxu3 %v828_v29  ;;  %342 = vmatpush.bf16.msrb.mxu1 %v832_v30  ;;  %v796_v0 = vor.u32 %v974_v62, %v795_v61  ;;  %v797_v1 = vld [vmem:[%s1375_s5 + $0x28] sm:$0xf0]  ;;  %v787_v3 = vld [vmem:[%s1375_s5 + $0x10] sm:$0xf]  ;;  %v972_v4 = vld [vmem:[%s1375_s5 + $0x14] sm:$0xf0] }
  0x14   :  { %v800_v2 = vor.u32 %v973_v63, %v797_v1  ;;  %v971_v5 = vld [vmem:[%s1375_s5 + $0x14] sm:$0xf]  ;;  %v788_v6 = vor.u32 %v972_v4, %v787_v3  ;;  %v789_v7 = vld [vmem:[%s1375_s5 + $0x18] sm:$0xf0]  ;;  %v781_v13 = vld [vmem:[%s1375_s5 + $0x8] sm:$0xf0] }
  0x15   :  { %v792_v8 = vor.u32 %v971_v5, %v789_v7  ;;  %v1015_v16 = vld [vmem:[%s1374_s4] ss:$0 sm:$0xff]  ;;  %v1000_v23 = vld [vmem:[%s1377_s7 + $0x78] sm:$0xff]  ;;  %v999_v24 = vld [vmem:[%s1377_s7 + $0x70] sm:$0xff] }
  0x16   :  { %142 = vmatpush.bf16.msra.mxu0 %v958_v9  ;;  %215 = vmatpush.bf16.msra.mxu2 %v965_v18  ;;  %v779_v9 = vld [vmem:[%s1375_s5] sm:$0xf]  ;;  %v992_v25 = vld [vmem:[%s1377_s7 + $0x38] sm:$0xff]  ;;  %v998_v26 = vld [vmem:[%s1377_s7 + $0x68] sm:$0xff] }
  0x17   :  { %329 = vmatpush.bf16.msra.mxu3 %v820_v35  ;;  %343 = vmatpush.bf16.msrb.mxu1 %v824_v36  ;;  %v991_v27 = vld [vmem:[%s1377_s7 + $0x30] sm:$0xff]  ;;  %v997_v28 = vld [vmem:[%s1377_s7 + $0x60] sm:$0xff]  ;;  %v990_v29 = vld [vmem:[%s1377_s7 + $0x28] sm:$0xff] }
  0x18   :  { %v996_v30 = vld [vmem:[%s1377_s7 + $0x58] sm:$0xff]  ;;  %v989_v31 = vld [vmem:[%s1377_s7 + $0x20] sm:$0xff]  ;;  %v995_v32 = vld [vmem:[%s1377_s7 + $0x50] sm:$0xff] }
  0x19   :  { %v988_v33 = vld [vmem:[%s1377_s7 + $0x18] sm:$0xff]  ;;  %v994_v34 = vld [vmem:[%s1377_s7 + $0x48] sm:$0xff]  ;;  %v987_v35 = vld [vmem:[%s1377_s7 + $0x10] sm:$0xff] }
  0x1a   :  { %143 = vmatpush.bf16.msra.mxu0 %v957_v10  ;;  %v970_v10 = vld [vmem:[%s1375_s5 + $0x4] sm:$0xf0]  ;;  %534 = vmatpush.bf16.msrb.mxu2 %v992_v25  ;;  %v241_v36 = vld [vmem:[%s1376_s6] sm:$0x3] }
  0x1b   :  { %330 = vmatpush.bf16.msra.mxu3 %v812_v41  ;;  %344 = vmatpush.bf16.msrb.mxu1 %v816_v42  ;;  %v780_v12 = vor.u32 %v970_v10, %v779_v9  ;;  %v993_v37 = vld [vmem:[%s1377_s7 + $0x40] sm:$0xff]  ;;  %v244_v38 = vperm.slane %v241_v36, 1  ;;  %v986_v39 = vld [vmem:[%s1377_s7 + $0x8] sm:$0xff] }
  0x1c   :  { %v985_v42 = vld [vmem:[%s1377_s7] sm:$0xff]  ;;  %s704_s7 = sshll.u32 %s1045_s21, 4  ;;  %s705_s7 = int_to_ptr.vmem [resolvable:$true] %s704_s7 }
  0x1e   :  { %144 = vmatpush.bf16.msra.mxu0 %v956_v11  ;;  %v969_v11 = vld [vmem:[%s1375_s5 + $0x4] sm:$0xf]  ;;  %535 = vmatpush.bf16.msrb.mxu2 %v991_v27 }
  0x1f   :  { %331 = vmatpush.bf16.msra.mxu3 %v804_v58  ;;  %345 = vmatpush.bf16.msrb.mxu1 %v808_v60  ;;  %v1006_v58 = vld [vmem:[%s1379_s9 + $0x28] sm:$0xff] }
  0x21   :  { %145 = vmatmul.bf16.vlgmr.msra.gmra.mxu0 %v718_v14  ;;  %v784_v14 = vor.u32 %v969_v11, %v781_v13 }
  0x22   :  { %547 = vmatpush.bf16.msrb.mxu0 %v1000_v23  ;;  %536 = vmatpush.bf16.msrb.mxu2 %v990_v29  ;;  %v1005_v29 = vld [vmem:[%s1379_s9 + $0x20] sm:$0xff] }
  0x23   :  { %332 = vmatpush.bf16.msra.mxu3 %v796_v0  ;;  %346 = vmatpush.bf16.msrb.mxu1 %v800_v2 }
  0x26   :  { %548 = vmatpush.bf16.msrb.mxu0 %v999_v24  ;;  %537 = vmatpush.bf16.msrb.mxu2 %v989_v31  ;;  %v1003_v31 = vld [vmem:[%s1379_s9 + $0x10] sm:$0xff] }
  0x27   :  { %333 = vmatpush.bf16.msra.mxu3 %v788_v6  ;;  %347 = vmatpush.bf16.msrb.mxu1 %v792_v8 }
  0x2a   :  { %549 = vmatpush.bf16.msrb.mxu0 %v998_v26  ;;  %538 = vmatpush.bf16.msrb.mxu2 %v988_v33  ;;  %v1001_v33 = vld [vmem:[%s1379_s9] sm:$0xff] }
  0x2b   :  { %334 = vmatpush.bf16.msra.mxu3 %v780_v12  ;;  %348 = vmatpush.bf16.msrb.mxu1 %v784_v14 }
  0x2e   :  { %550 = vmatpush.bf16.msrb.mxu0 %v997_v28  ;;  %539 = vmatpush.bf16.msrb.mxu2 %v987_v35  ;;  %v1011_v35 = vld [vmem:[%s1381_s11 + $0x10] sm:$0xff] }
  0x32   :  { %551 = vmatpush.bf16.msrb.mxu0 %v996_v30  ;;  %540 = vmatpush.bf16.msrb.mxu2 %v986_v39  ;;  %v1004_v30 = vld [vmem:[%s1379_s9 + $0x18] sm:$0xff]  ;;  %v1016_v39 = vld [vmem:[%s1378_s8] ss:$0 sm:$0xff] }
  0x36   :  { %552 = vmatpush.bf16.msrb.mxu0 %v995_v32  ;;  %541 = vmatpush.bf16.msrb.mxu2 %v985_v42  ;;  %v1002_v32 = vld [vmem:[%s1379_s9 + $0x8] sm:$0xff] }
  0x3a   :  { %553 = vmatpush.bf16.msrb.mxu0 %v994_v34  ;;  %v1012_v34 = vld [vmem:[%s1381_s11 + $0x18] sm:$0xff] }
  0x3b   :  { %688 = vmatpush.bf16.msra.mxu1 %v1012_v34 }
  0x3e   :  { %554 = vmatpush.bf16.msrb.mxu0 %v993_v37 }
  0x3f   :  { %689 = vmatpush.bf16.msra.mxu1 %v1011_v35 }
  0x84   :  { %v160_v43 = vpop.f32.mrf.mxu1 }
  0x8c   :  { %v162_v50 = vpop.f32.mrf.mxu1 }
  0x9e   :  { %v146_v44 = vpop.f32.mrf.mxu0 }
  0x9f   :  { %v147_v46 = vadd.f32 %v1014_v45, %v146_v44  ;;  %v243_v44 = vperm.slane %v241_v36, 0  ;;  %v1010_v36 = vld [vmem:[%s1381_s11 + $0x8] sm:$0xff] }
  0xa0   :  { %690 = vmatpush.bf16.msra.mxu1 %v1010_v36 }
  0xa1   :  { %v161_v48 = vadd.f32 %v160_v43, %v147_v46 }
  0xa3   :  { %v165_v52 = vmax.f32 %v161_v48, 0.0 }
  0xa6   :  { %v148_v47 = vpop.f32.mrf.mxu0 }
  0xa7   :  { %v149_v49 = vadd.f32 %v1014_v45, %v148_v47  ;;  %v1008_v47 = vld [vmem:[%s1379_s9 + $0x38] sm:$0xff] }
  0xa8   :  { %630 = vmatpush.bf16.msrb.mxu3 %v1008_v47  ;;  %v1017_v47 = vld [vmem:[%s1380_s10] ss:$0 sm:$0xff] }
  0xa9   :  { %v163_v51 = vadd.f32 %v162_v50, %v149_v49 }
  0xab   :  { %v166_v53 = vmax.f32 %v163_v51, 0.0  ;;  %v1007_v51 = vld [vmem:[%s1379_s9 + $0x30] sm:$0xff] }
  0xac   :  { %631 = vmatpush.bf16.msrb.mxu3 %v1007_v51 }
  0xad   :  { %v167_v54 = vpack.c.bf16 %v166_v53, %v165_v52 }
  0xaf   :  { %776 = vmatmul.msk.bf16.vlgmr.msra.gmra.mxu2 %vm204_vm1, %v167_v54 }
  0xb0   :  { %632 = vmatpush.bf16.msrb.mxu3 %v1006_v58 }
  0xb4   :  { %633 = vmatpush.bf16.msrb.mxu3 %v1005_v29 }
  0xb8   :  { %634 = vmatpush.bf16.msrb.mxu3 %v1004_v30 }
  0xbc   :  { %635 = vmatpush.bf16.msrb.mxu3 %v1003_v31 }
  0xc0   :  { %636 = vmatpush.bf16.msrb.mxu3 %v1002_v32 }
  0xc4   :  { %637 = vmatpush.bf16.msrb.mxu3 %v1001_v33 }
 0x132   :  { %v217_v15 = vpop.f32.mrf.mxu2 }
 0x133   :  { %v218_v17 = vadd.f32 %v1015_v16, %v217_v15 }
 0x135   :  { %v222_v20 = vmax.f32 %v218_v17, 0.0 }
 0x13a   :  { %v219_v18 = vpop.f32.mrf.mxu2 }
 0x13b   :  { %v220_v19 = vadd.f32 %v1015_v16, %v219_v18 }
 0x13d   :  { %v223_v21 = vmax.f32 %v220_v19, 0.0 }
 0x13f   :  { %v224_v22 = vpack.c.bf16 %v223_v21, %v222_v20 }
 0x141   :  { %335 = vmatmul.bf16.vlgmr.msra.gmra.mxu3 %v224_v22  ;;  %349 = vmatmul.bf16.vlgmr.msrb.gmra.mxu1 %v224_v22 }
 0x1be   :  { %v350_v40 = vpop.f32.mrf.mxu1 }
 0x1bf   :  { %v351_v41 = vadd.f32 %v350_v40, %v244_v38 }
 0x1c1   :  { %v356_v43 = vmax.f32 %v351_v41, 0.0 }
 0x1c3   :  { %v365_v45 = vrot.slane %v356_v43, 4 }
 0x1c4   :  { %v336_v46 = vpop.f32.mrf.mxu3 }
 0x1c5   :  { %v366_v48 = vmax.f32 %v356_v43, %v365_v45  ;;  %v337_v49 = vadd.f32 %v336_v46, %v243_v44  ;;  %v1009_v46 = vld [vmem:[%s1381_s11] sm:$0xff] }
 0x1c6   :  { %v352_v50 = vpop.f32.mrf.mxu1  ;;  %691 = vmatpush.bf16.msra.mxu1 %v1009_v46 }
 0x1c7   :  { %v367_v52 = vrot.slane %v366_v48, 2  ;;  %v355_v53 = vmax.f32 %v337_v49, 0.0  ;;  %v353_v54 = vadd.f32 %v352_v50, %v244_v38 }
 0x1c9   :  { %v368_v55 = vmax.f32 %v366_v48, %v367_v52  ;;  %v359_v56 = vrot.slane %v355_v53, 4  ;;  %v358_v57 = vmax.f32 %v353_v54, 0.0 }
 0x1cb   :  { %v360_v59 = vmax.f32 %v355_v53, %v359_v56  ;;  %v377_v60 = vrot.slane %v358_v57, 4  ;;  %v369_v62 = vrot.slane %v368_v55, 1  ;;  %v1018_v53 = vld [vmem:[%s1382_s12] ss:$0 sm:$0xff] }
 0x1cc   :  { %v338_v61 = vpop.f32.mrf.mxu3 }
 0x1cd   :  { %v361_v63 = vrot.slane %v360_v59, 2  ;;  %v378_v0 = vmax.f32 %v358_v57, %v377_v60  ;;  %v339_v1 = vadd.f32 %v338_v61, %v243_v44  ;;  %v370_v5 = vmax.f32 %v368_v55, %v369_v62 }
 0x1cf   :  { %v362_v2 = vmax.f32 %v360_v59, %v361_v63  ;;  %v379_v3 = vrot.slane %v378_v0, 2  ;;  %v357_v4 = vmax.f32 %v339_v1, 0.0  ;;  %v384_v11 = vpack.c.bf16 %v370_v5, %v370_v5 }
 0x1d1   :  { %v380_v6 = vmax.f32 %v378_v0, %v379_v3  ;;  %v371_v7 = vrot.slane %v357_v4, 4  ;;  %v363_v8 = vrot.slane %v362_v2, 1  ;;  %v428_v17 = vunpack.c.l.b16 %v384_v11 }
 0x1d3   :  { %v381_v9 = vrot.slane %v380_v6, 1  ;;  %v372_v10 = vmax.f32 %v357_v4, %v371_v7  ;;  %v364_v14 = vmax.f32 %v362_v2, %v363_v8 }
 0x1d5   :  { %v382_v12 = vmax.f32 %v380_v6, %v381_v9  ;;  %v373_v13 = vrot.slane %v372_v10, 2  ;;  %v383_v20 = vpack.c.bf16 %v364_v14, %v364_v14 }
 0x1d7   :  { %v386_v15 = vpack.c.bf16 %v382_v12, %v382_v12  ;;  %v374_v16 = vmax.f32 %v372_v10, %v373_v13  ;;  %v427_v25 = vunpack.c.l.b16 %v383_v20 }
 0x1d9   :  { %v430_v18 = vunpack.c.l.b16 %v386_v15  ;;  %v375_v19 = vrot.slane %v374_v16, 1 }
 0x1db   :  { %v376_v21 = vmax.f32 %v374_v16, %v375_v19  ;;  %v433_v22 = vsel %vm431_vm2, %v430_v18, %v428_v17 }
 0x1dc   :  { %v435_v23 = vpack.c.b16 %v433_v22, %v433_v22 }
 0x1dd   :  { %v385_v24 = vpack.c.bf16 %v376_v21, %v376_v21 }
 0x1de   :  { %555 = vmatmul.bf16.vlgmr.msrb.gmra.mxu0 %v435_v23 }
 0x1df   :  { %v429_v26 = vunpack.c.l.b16 %v385_v24 }
 0x1e1   :  { %v432_v27 = vsel %vm431_vm2, %v429_v26, %v427_v25 }
 0x1e2   :  { %v434_v28 = vpack.c.b16 %v432_v27, %v432_v27 }
 0x1e4   :  { %542 = vmatmul.bf16.vlgmr.msrb.gmra.mxu2 %v434_v28 }
 0x25b   :  { %v556_v37 = vpop.f32.mrf.mxu0 }
 0x263   :  { %v558_v38 = vpop.f32.mrf.mxu0 }
 0x267   :  { %v543_v40 = vpop.f32.mrf.mxu2 }
 0x268   :  { %v544_v41 = vadd.f32 %v1016_v39, %v543_v40 }
 0x26a   :  { %v557_v42 = vadd.f32 %v556_v37, %v544_v41 }
 0x26c   :  { %v560_v43 = vmax.f32 %v557_v42, 0.0 }
 0x26e   :  { %v561_v44 = vpack.c.bf16 %v560_v43, %v560_v43 }
 0x26f   :  { %v545_v45 = vpop.f32.mrf.mxu2 }
 0x270   :  { %638 = vmatmul.bf16.vlgmr.msrb.gmra.mxu3 %v561_v44 }
 0x2f3   :  { %v639_v48 = vpop.f32.mrf.mxu3 }
 0x2f4   :  { %v640_v49 = vadd.f32 %v1017_v47, %v639_v48 }
 0x2f6   :  { %v643_v50 = vmax.f32 %v640_v49, 0.0 }
 0x2f8   :  { %v644_v51 = vpack.c.bf16 %v643_v50, %v643_v50 }
 0x2fa   :  { %953 = vmatmul.msk.bf16.vlgmr.msra.gmra.mxu1 %vm204_vm1, %v644_v51 }
 0x2fb   :  { %v641_v52 = vpop.f32.mrf.mxu3 }
 0x377   :  { %v693_v54 = vpop.f32.mrf.mxu1 }
 0x378   :  { %v694_v55 = vadd.f32 %v1018_v53, %v693_v54 }
 0x37a   :  { %698 = vst.msk [vmem:[#allocation2] sm:$0x3] %vm697_vm3, %v694_v55 }
 0x37b   :  { %709 = dma.vmem_to_hbm [thread:$0]  %s705_s7, 32, %s707_s22, [#allocation3]  }
 0x37f   :  { %v695_v56 = vpop.f32.mrf.mxu1 }
 0x380   :  { %1043 = dma.done.wait [#allocation3], 32  }
 0x381   :  { %1044 = vsyncadd [#allocation3], 4294967264 }
 0x382   :  { %714 = vsyncpa [#allocation3], 1 }

</bundles_post_ra>
